<compile_context>
chip_gen: v5e
topology: v5e:2x2
jax: 0.10.0
libtpu: 0.0.40
codegen_flags: <defaults>
</compile_context>

<pallas_src>
import functools

import jax
import jax.numpy as jnp
from jax import lax
from jax.experimental import pallas as pl
from jax.experimental.pallas import tpu as pltpu

ADAM_BETA1 = 0.9
ADAM_BETA2 = 0.999
ADAM_EPS = 1e-8


def cw_kernel(lr_sched_ref, x_ref, y_ref, wm_ref, wt_ref, bias_ref, best_ref, *,
              c, tau, steps, unroll):
    X = x_ref[...]                      # (TB, D) f32
    y_i = y_ref[...]                    # (TB, 1) int32
    Wm = wm_ref[...]                    # (D, C)  f32
    Wt = wt_ref[...]                    # (C, D)  f32 (pre-transposed on host)
    TB, D = X.shape
    C = Wm.shape[1]

    # Loop-invariant values hoisted out of the fori_loop (JAX does not CSE
    # broadcast_in_dim, so broadcasting bias inside the loop would repeat it).
    bias_b = jnp.broadcast_to(bias_ref[...], (TB, C))          # (TB, C)
    iota_c = lax.broadcasted_iota(jnp.int32, (TB, C), 1)       # (TB, C) int32
    onehot = (iota_c == y_i).astype(jnp.float32)               # (TB, C)
    x_psd = jnp.max(X, axis=1, keepdims=True)                  # (TB, 1)
    log10_scale = 20.0 / jnp.log(10.0)
    eps2 = ADAM_EPS * ADAM_EPS
    half_c = 0.5 * float(c)

    # w = atanh(X)  (clip_min/clip_max = -1/1; caller keeps X strictly inside).
    # Rows padded past B in a ragged last tile may produce inf/NaN here; all
    # math below is row-wise and out-of-bounds output rows are dropped.
    w0 = 0.5 * jnp.log((1.0 + X) / (1.0 - X))

    # best_X_adv lives directly in the output block (no (TB,D) carry, no final copy).
    best_ref[...] = X

    def step_fn(t, carry):
        w, m, v, best_loss = carry

        X_adv = jnp.tanh(w)                                    # (TB, D)
        diff = X_adv - X
        # F.mse_loss(..., reduction='none').sum(dim=1)
        current_loss = jnp.sum(diff * diff, axis=1, keepdims=True)   # (TB, 1)

        # model(X_adv): linear classifier logits (MXU)
        z = jnp.dot(X_adv, Wm, preferred_element_type=jnp.float32) + bias_b  # (TB,C)

        # --- analytic gradient of cost = sum(diff^2) - c * sum(CE(z, y)) ---
        z_max = jnp.max(z, axis=1, keepdims=True)
        e = jnp.exp(z - z_max)
        inv_denom = pl.reciprocal(jnp.sum(e, axis=1, keepdims=True), approx=True)
        sm = e * inv_denom                                     # softmax (TB, C)
        # d(sum CE)/dX_adv = (softmax - onehot) @ W^T  (pre-transposed operand,
        # plain MXU push, no in-loop transpose)
        g_ce = jnp.dot(sm - onehot, Wt, preferred_element_type=jnp.float32)  # (TB,D)
        # 0.5 * d(cost)/dX_adv; the factor 2 cancels through Adam's m*rsqrt(v)
        # (up to the eps term — documented numerics deviation).
        g_xadv = diff - half_c * g_ce
        # chain rule through tanh: dX_adv/dw = 1 - tanh(w)^2
        g_w = g_xadv * (1.0 - X_adv * X_adv)

        # --- Adam update with bias correction folded into scalar lr_t ---
        m_new = ADAM_BETA1 * m + (1.0 - ADAM_BETA1) * g_w
        v_new = ADAM_BETA2 * v + (1.0 - ADAM_BETA2) * g_w * g_w
        lr_t = lr_sched_ref[t]          # scalar f32 from SMEM: lr*sqrt(1-b2^t)/(1-b1^t)
        # Single rsqrt per element (eps moved inside the sqrt; minor numerics
        # change vs PyTorch's m_hat/(sqrt(v_hat)+eps)).
        w_new = w - lr_t * m_new * lax.rsqrt(v_new + eps2)

        # --- bookkeeping on the (pre-update) X_adv / logits ---
        is_max = z == z_max
        # first argmax index (matches torch.argmax tie-breaking to first max)
        pred = jnp.min(jnp.where(is_max, iota_c, C), axis=1, keepdims=True)  # (TB,1)
        wrong = pred != y_i                                     # (TB, 1) bool

        # snr_loss(X_adv, X) = 20*log10( max_d X / max_d (X_adv - X) )
        delta_psd = jnp.max(diff, axis=1, keepdims=True)        # (TB, 1)
        snr = log10_scale * jnp.log(x_psd * pl.reciprocal(delta_psd, approx=True))

        mask = wrong & (best_loss > current_loss) & (snr > tau)  # (TB, 1) bool
        best_loss_new = jnp.where(mask, current_loss, best_loss)

        # Skip the full (TB,D) select+store when no row improved this step.
        @pl.when(jnp.any(mask))
        def _():
            best_ref[...] = jnp.where(mask, X_adv, best_ref[...])

        return (w_new, m_new, v_new, best_loss_new)

    init = (w0,
            jnp.zeros_like(X),
            jnp.zeros_like(X),
            jnp.full((TB, 1), 1e10, dtype=jnp.float32))

    lax.fori_loop(0, steps, step_fn, init, unroll=unroll)


def _round_up(x, m):
    return (x + m - 1) // m * m


def _vmem_budget_bytes():
    # Generation-aware VMEM cap: leave headroom under physical VMEM
    # (v5e/v6e: 128 MiB, v7x: 64 MiB per TensorCore).
    try:
        cap = int(pltpu.get_tpu_info().vmem_capacity_bytes)
    except Exception:
        cap = 64 * 1024 * 1024  # conservative (v7x)
    return min(cap * 3 // 4, 100 * 1024 * 1024)


def _estimate_vmem_bytes(tb, d, cc):
    # Double-buffered pipelined blocks (X in, best out, y) + resident W/W^T/bias
    # + loop-resident state/temps (~8 arrays of TB*D f32: w/m/v/X_adv/diff/grads)
    # + (TB,C) temporaries.
    blocks = 2 * (tb * d + tb * d + tb) * 4 + 2 * (2 * d * cc + cc) * 4
    resident = 8 * tb * d * 4 + 4 * tb * cc * 4
    return blocks + resident


def _choose_batch_tile(B, batch_tile, d, cc, budget):
    # Start from the requested tile: either the full batch or a multiple of 8.
    tb = B if B <= batch_tile else _round_up(min(batch_tile, B), 8)
    # Prefer >= 2 tiles so v7x's two TensorCores both get work (needs B >= 16).
    if B >= 16 and pl.cdiv(B, tb) < 2:
        tb = max(8, _round_up(pl.cdiv(B, 2), 8))
    # Shrink until the estimated resident set fits the VMEM budget.
    while tb > 8 and _estimate_vmem_bytes(tb, d, cc) > budget:
        tb = max(8, _round_up(tb // 2, 8))
    return tb


def cw_attack(X, y, Wm, bias, *, c=40.0, tau=20.0, lr=0.01, steps=10,
              batch_tile=256):
    X = jnp.asarray(X, jnp.float32)
    Wm = jnp.asarray(Wm, jnp.float32)
    X_orig = X
    B, D = X.shape
    C = Wm.shape[1]

    # Lane-dense feature dim: pad D to a multiple of 128 (zero weight rows keep
    # logits unchanged; padded feature columns stay exactly 0 throughout the
    # optimization since their gradient is identically 0).
    D_pad = _round_up(D, 128)
    if D_pad != D:
        X = jnp.pad(X, ((0, 0), (0, D_pad - D)))
        Wm = jnp.pad(Wm, ((0, D_pad - D), (0, 0)))

    y2 = y.reshape(B, 1).astype(jnp.int32)
    bias2 = bias.reshape(1, C).astype(jnp.float32)
    Wt = Wm.T  # pre-transposed once on the host for the backward matmul

    budget = _vmem_budget_bytes()
    TB = _choose_batch_tile(B, batch_tile, D_pad, C, budget)
    num_tiles = pl.cdiv(B, TB)

    # Per-step Adam step size with bias correction folded in, computed on host.
    t = jnp.arange(1, steps + 1, dtype=jnp.float32)
    lr_sched = (lr * jnp.sqrt(1.0 - ADAM_BETA2 ** t)
                / (1.0 - ADAM_BETA1 ** t)).astype(jnp.float32)      # (steps,)

    unroll = True if steps <= 16 else 2
    kernel = functools.partial(cw_kernel, c=float(c), tau=float(tau),
                               steps=int(steps), unroll=unroll)

    grid_spec = pltpu.PrefetchScalarGridSpec(
        num_scalar_prefetch=1,                 # lr_sched lands in SMEM
        grid=(num_tiles,),
        in_specs=[
            pl.BlockSpec((TB, D_pad), lambda i, sched: (i, 0)),   # X      (tiled)
            pl.BlockSpec((TB, 1), lambda i, sched: (i, 0)),       # y      (tiled)
            pl.BlockSpec((D_pad, C), lambda i, sched: (0, 0)),    # W      (resident)
            pl.BlockSpec((C, D_pad), lambda i, sched: (0, 0)),    # W^T    (resident)
            pl.BlockSpec((1, C), lambda i, sched: (0, 0)),        # bias   (resident)
        ],
        out_specs=pl.BlockSpec((TB, D_pad), lambda i, sched: (i, 0)),
    )

    best = pl.pallas_call(
        kernel,
        out_shape=jax.ShapeDtypeStruct((B, D_pad), jnp.float32),
        grid_spec=grid_spec,
        compiler_params=pltpu.CompilerParams(
            dimension_semantics=("parallel",),          # batch tiles are independent
            vmem_limit_bytes=int(budget),
        ),
    )(lr_sched, X, y2, Wm, Wt, bias2)

    if D_pad != D:
        best = best[:, :D]
    delta = best - X_orig     # trivial mem-bound op; kept outside the kernel
    return best, delta


if __name__ == "__main__":
    key = jax.random.PRNGKey(0)
    k_x, k_y, k_w, k_b = jax.random.split(key, 4)

    B, D, C = 8, 128, 16   # small (batch, features), C classes

    # Inputs strictly inside (-1, 1) so atanh is finite (clip_min/clip_max=-1/1).
    X = jax.random.uniform(k_x, (B, D), jnp.float32, minval=-0.9, maxval=0.9)
    y = jax.random.randint(k_y, (B,), 0, C, dtype=jnp.int32)

    # Deterministic synthetic "model" parameters (linear classifier).
    # TODO(synk): the PyTorch spec takes arbitrary `model`/`loss_fn` modules; only a
    # linear classifier + softmax cross-entropy is representable inside the kernel.
    Wm = 0.1 * jax.random.normal(k_w, (D, C), jnp.float32)
    bias = 0.01 * jax.random.normal(k_b, (C,), jnp.float32)

    best_X_adv, delta = cw_attack(X, y, Wm, bias,
                                  c=40.0, tau=20.0, lr=0.01, steps=10)
    jax.block_until_ready(best_X_adv)
    jax.block_until_ready(delta)
    print("KERNEL_OK")
</pallas_src>

<mosaic_0001>
module attributes {stable_mosaic.version = 11 : i64} {
  func.func @cw_kernel(%arg0: i32, %arg1: memref<10xf32, #tpu.memory_space<smem>>, %arg2: memref<8x128xf32, #tpu.memory_space<vmem>>, %arg3: memref<8x1xi32, #tpu.memory_space<vmem>>, %arg4: memref<128x16xf32, #tpu.memory_space<vmem>>, %arg5: memref<16x128xf32, #tpu.memory_space<vmem>>, %arg6: memref<1x16xf32, #tpu.memory_space<vmem>>, %arg7: memref<8x128xf32, #tpu.memory_space<vmem>>) attributes {dimension_semantics = [#tpu.dimension_semantics<parallel>], iteration_bounds = array<i64: 1>, scalar_prefetch = 1 : i64, scratch_operands = 0 : i64, tpu.core_type = #tpu.core_type<tc>, window_params = [{transform_indices = @transform_0, window_bounds = array<i64: 8, 128>}, {transform_indices = @transform_1, window_bounds = array<i64: 8, 1>}, {pipeline_mode = #tpu.pipeline_mode<synchronous>, transform_indices = @transform_2, window_bounds = array<i64: 128, 16>}, {pipeline_mode = #tpu.pipeline_mode<synchronous>, transform_indices = @transform_3, window_bounds = array<i64: 16, 128>}, {pipeline_mode = #tpu.pipeline_mode<synchronous>, transform_indices = @transform_4, window_bounds = array<i64: 1, 16>}, {transform_indices = @transform_5, window_bounds = array<i64: 8, 128>}]} {
    %c0 = arith.constant 0 : index
    %c0_0 = arith.constant 0 : index
    %0 = vector.load %arg2[%c0, %c0_0] : memref<8x128xf32, #tpu.memory_space<vmem>>, vector<8x128xf32>
    %c0_1 = arith.constant 0 : index
    %c0_2 = arith.constant 0 : index
    %1 = vector.load %arg3[%c0_1, %c0_2] : memref<8x1xi32, #tpu.memory_space<vmem>>, vector<8x1xi32>
    %c0_3 = arith.constant 0 : index
    %c0_4 = arith.constant 0 : index
    %2 = vector.load %arg4[%c0_3, %c0_4] : memref<128x16xf32, #tpu.memory_space<vmem>>, vector<128x16xf32>
    %c0_5 = arith.constant 0 : index
    %c0_6 = arith.constant 0 : index
    %3 = vector.load %arg5[%c0_5, %c0_6] : memref<16x128xf32, #tpu.memory_space<vmem>>, vector<16x128xf32>
    %c0_7 = arith.constant 0 : index
    %c0_8 = arith.constant 0 : index
    %4 = vector.load %arg6[%c0_7, %c0_8] : memref<1x16xf32, #tpu.memory_space<vmem>>, vector<1x16xf32>
    %5 = vector.shape_cast %4 : vector<1x16xf32> to vector<1x16xf32>
    %6 = vector.broadcast %5 : vector<1x16xf32> to vector<8x16xf32>
    %7 = tpu.iota {dimensions = array<i32: 1>} : vector<8x16xi32>
    %8 = vector.broadcast %1 : vector<8x1xi32> to vector<8x16xi32>
    %9 = arith.cmpi eq, %7, %8 : vector<8x16xi32>
    %10 = arith.extui %9 : vector<8x16xi1> to vector<8x16xi32>
    %11 = arith.sitofp %10 : vector<8x16xi32> to vector<8x16xf32>
    %cst = arith.constant dense<0xFF800000> : vector<8xf32>
    %12 = vector.multi_reduction <maximumf>, %0, %cst [1] : vector<8x128xf32> to vector<8xf32>
    %13 = vector.shape_cast %12 : vector<8xf32> to vector<8x1xf32>
    %cst_9 = arith.constant 1.000000e+01 : f32
    %14 = math.log %cst_9 : f32
    %cst_10 = arith.constant 2.000000e+01 : f32
    %15 = arith.divf %cst_10, %14 : f32
    %cst_11 = arith.constant 1.000000e+00 : f32
    %16 = vector.broadcast %cst_11 : f32 to vector<8x128xf32>
    %17 = arith.addf %16, %0 : vector<8x128xf32>
    %cst_12 = arith.constant 1.000000e+00 : f32
    %18 = vector.broadcast %cst_12 : f32 to vector<8x128xf32>
    %19 = arith.subf %18, %0 : vector<8x128xf32>
    %20 = arith.divf %17, %19 : vector<8x128xf32>
    %21 = math.log %20 : vector<8x128xf32>
    %cst_13 = arith.constant 5.000000e-01 : f32
    %22 = vector.broadcast %cst_13 : f32 to vector<8x128xf32>
    %23 = arith.mulf %22, %21 : vector<8x128xf32>
    %c0_14 = arith.constant 0 : index
    %c0_15 = arith.constant 0 : index
    %24 = vector.load %arg7[%c0_14, %c0_15] : memref<8x128xf32, #tpu.memory_space<vmem>>, vector<8x128xf32>
    tpu.vector_store %arg7[%c0_14, %c0_15], %0 {strides = array<i32>} : memref<8x128xf32, #tpu.memory_space<vmem>>, vector<8x128xf32>,
    %cst_16 = arith.constant 0.000000e+00 : f32
    %25 = vector.broadcast %cst_16 : f32 to vector<8x128xf32>
    %cst_17 = arith.constant 0.000000e+00 : f32
    %26 = vector.broadcast %cst_17 : f32 to vector<8x128xf32>
    %cst_18 = arith.constant 1.000000e+10 : f32
    %27 = vector.broadcast %cst_18 : f32 to vector<8x1xf32>
    %c0_i32 = arith.constant 0 : i32
    %28 = math.tanh %23 : vector<8x128xf32>
    %29 = arith.subf %28, %0 : vector<8x128xf32>
    %30 = arith.mulf %29, %29 : vector<8x128xf32>
    %cst_19 = arith.constant dense<0.000000e+00> : vector<8xf32>
    %31 = vector.multi_reduction <add>, %30, %cst_19 [1] : vector<8x128xf32> to vector<8xf32>
    %32 = vector.shape_cast %31 : vector<8xf32> to vector<8x1xf32>
    %cst_20 = arith.constant dense<0.000000e+00> : vector<8x16xf32>
    %33 = tpu.matmul %28, %2, %cst_20 {dimension_numbers = #tpu.dot_dimension_numbers<[1], [0], [0], [1], [0, 0, 1, 1], [], []>} : vector<8x128xf32>, vector<128x16xf32>, vector<8x16xf32> -> vector<8x16xf32>
    %34 = arith.addf %33, %6 : vector<8x16xf32>
    %cst_21 = arith.constant dense<0xFF800000> : vector<8xf32>
    %35 = vector.multi_reduction <maximumf>, %34, %cst_21 [1] : vector<8x16xf32> to vector<8xf32>
    %36 = vector.shape_cast %35 : vector<8xf32> to vector<8x1xf32>
    %37 = vector.broadcast %36 : vector<8x1xf32> to vector<8x16xf32>
    %38 = arith.subf %34, %37 : vector<8x16xf32>
    %39 = math.exp %38 : vector<8x16xf32>
    %cst_22 = arith.constant dense<0.000000e+00> : vector<8xf32>
    %40 = vector.multi_reduction <add>, %39, %cst_22 [1] : vector<8x16xf32> to vector<8xf32>
    %41 = vector.shape_cast %40 : vector<8xf32> to vector<8x1xf32>
    %42 = tpu.reciprocal %41 {approx = true} : vector<8x1xf32> -> vector<8x1xf32>
    %43 = vector.broadcast %42 : vector<8x1xf32> to vector<8x16xf32>
    %44 = arith.mulf %39, %43 : vector<8x16xf32>
    %45 = arith.subf %44, %11 : vector<8x16xf32>
    %cst_23 = arith.constant dense<0.000000e+00> : vector<8x128xf32>
    %46 = tpu.matmul %45, %3, %cst_23 {dimension_numbers = #tpu.dot_dimension_numbers<[1], [0], [0], [1], [0, 0, 1, 1], [], []>} : vector<8x16xf32>, vector<16x128xf32>, vector<8x128xf32> -> vector<8x128xf32>
    %cst_24 = arith.constant 2.000000e+01 : f32
    %47 = vector.broadcast %cst_24 : f32 to vector<8x128xf32>
    %48 = arith.mulf %47, %46 : vector<8x128xf32>
    %49 = arith.subf %29, %48 : vector<8x128xf32>
    %50 = arith.mulf %28, %28 : vector<8x128xf32>
    %cst_25 = arith.constant 1.000000e+00 : f32
    %51 = vector.broadcast %cst_25 : f32 to vector<8x128xf32>
    %52 = arith.subf %51, %50 : vector<8x128xf32>
    %53 = arith.mulf %49, %52 : vector<8x128xf32>
    %cst_26 = arith.constant 0.899999976 : f32
    %54 = vector.broadcast %cst_26 : f32 to vector<8x128xf32>
    %55 = arith.mulf %54, %25 : vector<8x128xf32>
    %cst_27 = arith.constant 1.000000e-01 : f32
    %56 = vector.broadcast %cst_27 : f32 to vector<8x128xf32>
    %57 = arith.mulf %56, %53 : vector<8x128xf32>
    %58 = arith.addf %55, %57 : vector<8x128xf32>
    %cst_28 = arith.constant 9.990000e-01 : f32
    %59 = vector.broadcast %cst_28 : f32 to vector<8x128xf32>
    %60 = arith.mulf %59, %26 : vector<8x128xf32>
    %cst_29 = arith.constant 1.000000e-03 : f32
    %61 = vector.broadcast %cst_29 : f32 to vector<8x128xf32>
    %62 = arith.mulf %61, %53 : vector<8x128xf32>
    %63 = arith.mulf %62, %53 : vector<8x128xf32>
    %64 = arith.addf %60, %63 : vector<8x128xf32>
    %65 = arith.index_cast %c0_i32 : i32 to index
    %66 = memref.load %arg1[%65] : memref<10xf32, #tpu.memory_space<smem>>
    %67 = vector.broadcast %66 : f32 to vector<8x128xf32>
    %68 = arith.mulf %67, %58 : vector<8x128xf32>
    %cst_30 = arith.constant 1.000000e-16 : f32
    %69 = vector.broadcast %cst_30 : f32 to vector<8x128xf32>
    %70 = arith.addf %64, %69 : vector<8x128xf32>
    %71 = math.rsqrt %70 : vector<8x128xf32>
    %72 = arith.mulf %68, %71 : vector<8x128xf32>
    %73 = arith.subf %23, %72 : vector<8x128xf32>
    %74 = vector.broadcast %36 : vector<8x1xf32> to vector<8x16xf32>
    %75 = arith.cmpf oeq, %34, %74 : vector<8x16xf32>
    %c16_i32 = arith.constant 16 : i32
    %76 = vector.broadcast %c16_i32 : i32 to vector<8x16xi32>
    %77 = arith.select %75, %7, %76 : vector<8x16xi1>, vector<8x16xi32>
    %cst_31 = arith.constant dense<2147483647> : vector<8xi32>
    %78 = vector.multi_reduction <minsi>, %77, %cst_31 [1] : vector<8x16xi32> to vector<8xi32>
    %79 = vector.shape_cast %78 : vector<8xi32> to vector<8x1xi32>
    %80 = arith.cmpi ne, %79, %1 : vector<8x1xi32>
    %cst_32 = arith.constant dense<0xFF800000> : vector<8xf32>
    %81 = vector.multi_reduction <maximumf>, %29, %cst_32 [1] : vector<8x128xf32> to vector<8xf32>
    %82 = vector.shape_cast %81 : vector<8xf32> to vector<8x1xf32>
    %83 = tpu.reciprocal %82 {approx = true} : vector<8x1xf32> -> vector<8x1xf32>
    %84 = arith.mulf %13, %83 : vector<8x1xf32>
    %85 = math.log %84 : vector<8x1xf32>
    %86 = vector.broadcast %15 : f32 to vector<8x1xf32>
    %87 = arith.mulf %86, %85 : vector<8x1xf32>
    %88 = arith.cmpf ogt, %27, %32 : vector<8x1xf32>
    %89 = arith.andi %80, %88 : vector<8x1xi1>
    %cst_33 = arith.constant 2.000000e+01 : f32
    %90 = vector.broadcast %cst_33 : f32 to vector<8x1xf32>
    %91 = arith.cmpf ogt, %87, %90 : vector<8x1xf32>
    %92 = arith.andi %89, %91 : vector<8x1xi1>
    %93 = arith.select %92, %32, %27 : vector<8x1xi1>, vector<8x1xf32>
    %cst_34 = arith.constant 1.000000e+00 : f32
    %cst_35 = arith.constant 0.000000e+00 : f32
    %94 = vector.broadcast %cst_34 : f32 to vector<8x1xf32>
    %95 = vector.broadcast %cst_35 : f32 to vector<8x1xf32>
    %96 = arith.select %92, %94, %95 : vector<8x1xi1>, vector<8x1xf32>
    %97 = vector.shape_cast %96 : vector<8x1xf32> to vector<1x8x1xf32>
    %cst_36 = arith.constant dense<0xFF800000> : vector<1xf32>
    %98 = vector.multi_reduction <maximumf>, %97, %cst_36 [1, 2] : vector<1x8x1xf32> to vector<1xf32>
    %99 = vector.shape_cast %98 : vector<1xf32> to vector<1x1x1xf32>
    %100 = vector.extract %99[0, 0, 0] : f32 from vector<1x1x1xf32>
    %cst_37 = arith.constant 0.000000e+00 : f32
    %101 = arith.cmpf ogt, %100, %cst_37 : f32
    %102 = arith.extui %101 : i1 to i32
    %c0_i32_38 = arith.constant 0 : i32
    %103 = arith.cmpi ne, %102, %c0_i32_38 : i32
    scf.if %103 {
      %c0_228 = arith.constant 0 : index
      %c0_229 = arith.constant 0 : index
      %788 = vector.load %arg7[%c0_228, %c0_229] : memref<8x128xf32, #tpu.memory_space<vmem>>, vector<8x128xf32>
      %789 = vector.shape_cast %92 : vector<8x1xi1> to vector<8x1xi1>
      %790 = vector.broadcast %789 : vector<8x1xi1> to vector<8x128xi1>
      %791 = arith.select %790, %28, %788 : vector<8x128xi1>, vector<8x128xf32>
      %c0_230 = arith.constant 0 : index
      %c0_231 = arith.constant 0 : index
      %792 = vector.load %arg7[%c0_230, %c0_231] : memref<8x128xf32, #tpu.memory_space<vmem>>, vector<8x128xf32>
      tpu.vector_store %arg7[%c0_230, %c0_231], %791 {strides = array<i32>} : memref<8x128xf32, #tpu.memory_space<vmem>>, vector<8x128xf32>,
    } else {
    }
    %c1_i32 = arith.constant 1 : i32
    %104 = math.tanh %73 : vector<8x128xf32>
    %105 = arith.subf %104, %0 : vector<8x128xf32>
    %106 = arith.mulf %105, %105 : vector<8x128xf32>
    %cst_39 = arith.constant dense<0.000000e+00> : vector<8xf32>
    %107 = vector.multi_reduction <add>, %106, %cst_39 [1] : vector<8x128xf32> to vector<8xf32>
    %108 = vector.shape_cast %107 : vector<8xf32> to vector<8x1xf32>
    %cst_40 = arith.constant dense<0.000000e+00> : vector<8x16xf32>
    %109 = tpu.matmul %104, %2, %cst_40 {dimension_numbers = #tpu.dot_dimension_numbers<[1], [0], [0], [1], [0, 0, 1, 1], [], []>} : vector<8x128xf32>, vector<128x16xf32>, vector<8x16xf32> -> vector<8x16xf32>
    %110 = arith.addf %109, %6 : vector<8x16xf32>
    %cst_41 = arith.constant dense<0xFF800000> : vector<8xf32>
    %111 = vector.multi_reduction <maximumf>, %110, %cst_41 [1] : vector<8x16xf32> to vector<8xf32>
    %112 = vector.shape_cast %111 : vector<8xf32> to vector<8x1xf32>
    %113 = vector.broadcast %112 : vector<8x1xf32> to vector<8x16xf32>
    %114 = arith.subf %110, %113 : vector<8x16xf32>
    %115 = math.exp %114 : vector<8x16xf32>
    %cst_42 = arith.constant dense<0.000000e+00> : vector<8xf32>
    %116 = vector.multi_reduction <add>, %115, %cst_42 [1] : vector<8x16xf32> to vector<8xf32>
    %117 = vector.shape_cast %116 : vector<8xf32> to vector<8x1xf32>
    %118 = tpu.reciprocal %117 {approx = true} : vector<8x1xf32> -> vector<8x1xf32>
    %119 = vector.broadcast %118 : vector<8x1xf32> to vector<8x16xf32>
    %120 = arith.mulf %115, %119 : vector<8x16xf32>
    %121 = arith.subf %120, %11 : vector<8x16xf32>
    %cst_43 = arith.constant dense<0.000000e+00> : vector<8x128xf32>
    %122 = tpu.matmul %121, %3, %cst_43 {dimension_numbers = #tpu.dot_dimension_numbers<[1], [0], [0], [1], [0, 0, 1, 1], [], []>} : vector<8x16xf32>, vector<16x128xf32>, vector<8x128xf32> -> vector<8x128xf32>
    %cst_44 = arith.constant 2.000000e+01 : f32
    %123 = vector.broadcast %cst_44 : f32 to vector<8x128xf32>
    %124 = arith.mulf %123, %122 : vector<8x128xf32>
    %125 = arith.subf %105, %124 : vector<8x128xf32>
    %126 = arith.mulf %104, %104 : vector<8x128xf32>
    %cst_45 = arith.constant 1.000000e+00 : f32
    %127 = vector.broadcast %cst_45 : f32 to vector<8x128xf32>
    %128 = arith.subf %127, %126 : vector<8x128xf32>
    %129 = arith.mulf %125, %128 : vector<8x128xf32>
    %cst_46 = arith.constant 0.899999976 : f32
    %130 = vector.broadcast %cst_46 : f32 to vector<8x128xf32>
    %131 = arith.mulf %130, %58 : vector<8x128xf32>
    %cst_47 = arith.constant 1.000000e-01 : f32
    %132 = vector.broadcast %cst_47 : f32 to vector<8x128xf32>
    %133 = arith.mulf %132, %129 : vector<8x128xf32>
    %134 = arith.addf %131, %133 : vector<8x128xf32>
    %cst_48 = arith.constant 9.990000e-01 : f32
    %135 = vector.broadcast %cst_48 : f32 to vector<8x128xf32>
    %136 = arith.mulf %135, %64 : vector<8x128xf32>
    %cst_49 = arith.constant 1.000000e-03 : f32
    %137 = vector.broadcast %cst_49 : f32 to vector<8x128xf32>
    %138 = arith.mulf %137, %129 : vector<8x128xf32>
    %139 = arith.mulf %138, %129 : vector<8x128xf32>
    %140 = arith.addf %136, %139 : vector<8x128xf32>
    %141 = arith.index_cast %c1_i32 : i32 to index
    %142 = memref.load %arg1[%141] : memref<10xf32, #tpu.memory_space<smem>>
    %143 = vector.broadcast %142 : f32 to vector<8x128xf32>
    %144 = arith.mulf %143, %134 : vector<8x128xf32>
    %cst_50 = arith.constant 1.000000e-16 : f32
    %145 = vector.broadcast %cst_50 : f32 to vector<8x128xf32>
    %146 = arith.addf %140, %145 : vector<8x128xf32>
    %147 = math.rsqrt %146 : vector<8x128xf32>
    %148 = arith.mulf %144, %147 : vector<8x128xf32>
    %149 = arith.subf %73, %148 : vector<8x128xf32>
    %150 = vector.broadcast %112 : vector<8x1xf32> to vector<8x16xf32>
    %151 = arith.cmpf oeq, %110, %150 : vector<8x16xf32>
    %c16_i32_51 = arith.constant 16 : i32
    %152 = vector.broadcast %c16_i32_51 : i32 to vector<8x16xi32>
    %153 = arith.select %151, %7, %152 : vector<8x16xi1>, vector<8x16xi32>
    %cst_52 = arith.constant dense<2147483647> : vector<8xi32>
    %154 = vector.multi_reduction <minsi>, %153, %cst_52 [1] : vector<8x16xi32> to vector<8xi32>
    %155 = vector.shape_cast %154 : vector<8xi32> to vector<8x1xi32>
    %156 = arith.cmpi ne, %155, %1 : vector<8x1xi32>
    %cst_53 = arith.constant dense<0xFF800000> : vector<8xf32>
    %157 = vector.multi_reduction <maximumf>, %105, %cst_53 [1] : vector<8x128xf32> to vector<8xf32>
    %158 = vector.shape_cast %157 : vector<8xf32> to vector<8x1xf32>
    %159 = tpu.reciprocal %158 {approx = true} : vector<8x1xf32> -> vector<8x1xf32>
    %160 = arith.mulf %13, %159 : vector<8x1xf32>
    %161 = math.log %160 : vector<8x1xf32>
    %162 = vector.broadcast %15 : f32 to vector<8x1xf32>
    %163 = arith.mulf %162, %161 : vector<8x1xf32>
    %164 = arith.cmpf ogt, %93, %108 : vector<8x1xf32>
    %165 = arith.andi %156, %164 : vector<8x1xi1>
    %cst_54 = arith.constant 2.000000e+01 : f32
    %166 = vector.broadcast %cst_54 : f32 to vector<8x1xf32>
    %167 = arith.cmpf ogt, %163, %166 : vector<8x1xf32>
    %168 = arith.andi %165, %167 : vector<8x1xi1>
    %169 = arith.select %168, %108, %93 : vector<8x1xi1>, vector<8x1xf32>
    %cst_55 = arith.constant 1.000000e+00 : f32
    %cst_56 = arith.constant 0.000000e+00 : f32
    %170 = vector.broadcast %cst_55 : f32 to vector<8x1xf32>
    %171 = vector.broadcast %cst_56 : f32 to vector<8x1xf32>
    %172 = arith.select %168, %170, %171 : vector<8x1xi1>, vector<8x1xf32>
    %173 = vector.shape_cast %172 : vector<8x1xf32> to vector<1x8x1xf32>
    %cst_57 = arith.constant dense<0xFF800000> : vector<1xf32>
    %174 = vector.multi_reduction <maximumf>, %173, %cst_57 [1, 2] : vector<1x8x1xf32> to vector<1xf32>
    %175 = vector.shape_cast %174 : vector<1xf32> to vector<1x1x1xf32>
    %176 = vector.extract %175[0, 0, 0] : f32 from vector<1x1x1xf32>
    %cst_58 = arith.constant 0.000000e+00 : f32
    %177 = arith.cmpf ogt, %176, %cst_58 : f32
    %178 = arith.extui %177 : i1 to i32
    %c0_i32_59 = arith.constant 0 : i32
    %179 = arith.cmpi ne, %178, %c0_i32_59 : i32
    scf.if %179 {
      %c0_228 = arith.constant 0 : index
      %c0_229 = arith.constant 0 : index
      %788 = vector.load %arg7[%c0_228, %c0_229] : memref<8x128xf32, #tpu.memory_space<vmem>>, vector<8x128xf32>
      %789 = vector.shape_cast %168 : vector<8x1xi1> to vector<8x1xi1>
      %790 = vector.broadcast %789 : vector<8x1xi1> to vector<8x128xi1>
      %791 = arith.select %790, %104, %788 : vector<8x128xi1>, vector<8x128xf32>
      %c0_230 = arith.constant 0 : index
      %c0_231 = arith.constant 0 : index
      %792 = vector.load %arg7[%c0_230, %c0_231] : memref<8x128xf32, #tpu.memory_space<vmem>>, vector<8x128xf32>
      tpu.vector_store %arg7[%c0_230, %c0_231], %791 {strides = array<i32>} : memref<8x128xf32, #tpu.memory_space<vmem>>, vector<8x128xf32>,
    } else {
    }
    %c2_i32 = arith.constant 2 : i32
    %180 = math.tanh %149 : vector<8x128xf32>
    %181 = arith.subf %180, %0 : vector<8x128xf32>
    %182 = arith.mulf %181, %181 : vector<8x128xf32>
    %cst_60 = arith.constant dense<0.000000e+00> : vector<8xf32>
    %183 = vector.multi_reduction <add>, %182, %cst_60 [1] : vector<8x128xf32> to vector<8xf32>
    %184 = vector.shape_cast %183 : vector<8xf32> to vector<8x1xf32>
    %cst_61 = arith.constant dense<0.000000e+00> : vector<8x16xf32>
    %185 = tpu.matmul %180, %2, %cst_61 {dimension_numbers = #tpu.dot_dimension_numbers<[1], [0], [0], [1], [0, 0, 1, 1], [], []>} : vector<8x128xf32>, vector<128x16xf32>, vector<8x16xf32> -> vector<8x16xf32>
    %186 = arith.addf %185, %6 : vector<8x16xf32>
    %cst_62 = arith.constant dense<0xFF800000> : vector<8xf32>
    %187 = vector.multi_reduction <maximumf>, %186, %cst_62 [1] : vector<8x16xf32> to vector<8xf32>
    %188 = vector.shape_cast %187 : vector<8xf32> to vector<8x1xf32>
    %189 = vector.broadcast %188 : vector<8x1xf32> to vector<8x16xf32>
    %190 = arith.subf %186, %189 : vector<8x16xf32>
    %191 = math.exp %190 : vector<8x16xf32>
    %cst_63 = arith.constant dense<0.000000e+00> : vector<8xf32>
    %192 = vector.multi_reduction <add>, %191, %cst_63 [1] : vector<8x16xf32> to vector<8xf32>
    %193 = vector.shape_cast %192 : vector<8xf32> to vector<8x1xf32>
    %194 = tpu.reciprocal %193 {approx = true} : vector<8x1xf32> -> vector<8x1xf32>
    %195 = vector.broadcast %194 : vector<8x1xf32> to vector<8x16xf32>
    %196 = arith.mulf %191, %195 : vector<8x16xf32>
    %197 = arith.subf %196, %11 : vector<8x16xf32>
    %cst_64 = arith.constant dense<0.000000e+00> : vector<8x128xf32>
    %198 = tpu.matmul %197, %3, %cst_64 {dimension_numbers = #tpu.dot_dimension_numbers<[1], [0], [0], [1], [0, 0, 1, 1], [], []>} : vector<8x16xf32>, vector<16x128xf32>, vector<8x128xf32> -> vector<8x128xf32>
    %cst_65 = arith.constant 2.000000e+01 : f32
    %199 = vector.broadcast %cst_65 : f32 to vector<8x128xf32>
    %200 = arith.mulf %199, %198 : vector<8x128xf32>
    %201 = arith.subf %181, %200 : vector<8x128xf32>
    %202 = arith.mulf %180, %180 : vector<8x128xf32>
    %cst_66 = arith.constant 1.000000e+00 : f32
    %203 = vector.broadcast %cst_66 : f32 to vector<8x128xf32>
    %204 = arith.subf %203, %202 : vector<8x128xf32>
    %205 = arith.mulf %201, %204 : vector<8x128xf32>
    %cst_67 = arith.constant 0.899999976 : f32
    %206 = vector.broadcast %cst_67 : f32 to vector<8x128xf32>
    %207 = arith.mulf %206, %134 : vector<8x128xf32>
    %cst_68 = arith.constant 1.000000e-01 : f32
    %208 = vector.broadcast %cst_68 : f32 to vector<8x128xf32>
    %209 = arith.mulf %208, %205 : vector<8x128xf32>
    %210 = arith.addf %207, %209 : vector<8x128xf32>
    %cst_69 = arith.constant 9.990000e-01 : f32
    %211 = vector.broadcast %cst_69 : f32 to vector<8x128xf32>
    %212 = arith.mulf %211, %140 : vector<8x128xf32>
    %cst_70 = arith.constant 1.000000e-03 : f32
    %213 = vector.broadcast %cst_70 : f32 to vector<8x128xf32>
    %214 = arith.mulf %213, %205 : vector<8x128xf32>
    %215 = arith.mulf %214, %205 : vector<8x128xf32>
    %216 = arith.addf %212, %215 : vector<8x128xf32>
    %217 = arith.index_cast %c2_i32 : i32 to index
    %218 = memref.load %arg1[%217] : memref<10xf32, #tpu.memory_space<smem>>
    %219 = vector.broadcast %218 : f32 to vector<8x128xf32>
    %220 = arith.mulf %219, %210 : vector<8x128xf32>
    %cst_71 = arith.constant 1.000000e-16 : f32
    %221 = vector.broadcast %cst_71 : f32 to vector<8x128xf32>
    %222 = arith.addf %216, %221 : vector<8x128xf32>
    %223 = math.rsqrt %222 : vector<8x128xf32>
    %224 = arith.mulf %220, %223 : vector<8x128xf32>
    %225 = arith.subf %149, %224 : vector<8x128xf32>
    %226 = vector.broadcast %188 : vector<8x1xf32> to vector<8x16xf32>
    %227 = arith.cmpf oeq, %186, %226 : vector<8x16xf32>
    %c16_i32_72 = arith.constant 16 : i32
    %228 = vector.broadcast %c16_i32_72 : i32 to vector<8x16xi32>
    %229 = arith.select %227, %7, %228 : vector<8x16xi1>, vector<8x16xi32>
    %cst_73 = arith.constant dense<2147483647> : vector<8xi32>
    %230 = vector.multi_reduction <minsi>, %229, %cst_73 [1] : vector<8x16xi32> to vector<8xi32>
    %231 = vector.shape_cast %230 : vector<8xi32> to vector<8x1xi32>
    %232 = arith.cmpi ne, %231, %1 : vector<8x1xi32>
    %cst_74 = arith.constant dense<0xFF800000> : vector<8xf32>
    %233 = vector.multi_reduction <maximumf>, %181, %cst_74 [1] : vector<8x128xf32> to vector<8xf32>
    %234 = vector.shape_cast %233 : vector<8xf32> to vector<8x1xf32>
    %235 = tpu.reciprocal %234 {approx = true} : vector<8x1xf32> -> vector<8x1xf32>
    %236 = arith.mulf %13, %235 : vector<8x1xf32>
    %237 = math.log %236 : vector<8x1xf32>
    %238 = vector.broadcast %15 : f32 to vector<8x1xf32>
    %239 = arith.mulf %238, %237 : vector<8x1xf32>
    %240 = arith.cmpf ogt, %169, %184 : vector<8x1xf32>
    %241 = arith.andi %232, %240 : vector<8x1xi1>
    %cst_75 = arith.constant 2.000000e+01 : f32
    %242 = vector.broadcast %cst_75 : f32 to vector<8x1xf32>
    %243 = arith.cmpf ogt, %239, %242 : vector<8x1xf32>
    %244 = arith.andi %241, %243 : vector<8x1xi1>
    %245 = arith.select %244, %184, %169 : vector<8x1xi1>, vector<8x1xf32>
    %cst_76 = arith.constant 1.000000e+00 : f32
    %cst_77 = arith.constant 0.000000e+00 : f32
    %246 = vector.broadcast %cst_76 : f32 to vector<8x1xf32>
    %247 = vector.broadcast %cst_77 : f32 to vector<8x1xf32>
    %248 = arith.select %244, %246, %247 : vector<8x1xi1>, vector<8x1xf32>
    %249 = vector.shape_cast %248 : vector<8x1xf32> to vector<1x8x1xf32>
    %cst_78 = arith.constant dense<0xFF800000> : vector<1xf32>
    %250 = vector.multi_reduction <maximumf>, %249, %cst_78 [1, 2] : vector<1x8x1xf32> to vector<1xf32>
    %251 = vector.shape_cast %250 : vector<1xf32> to vector<1x1x1xf32>
    %252 = vector.extract %251[0, 0, 0] : f32 from vector<1x1x1xf32>
    %cst_79 = arith.constant 0.000000e+00 : f32
    %253 = arith.cmpf ogt, %252, %cst_79 : f32
    %254 = arith.extui %253 : i1 to i32
    %c0_i32_80 = arith.constant 0 : i32
    %255 = arith.cmpi ne, %254, %c0_i32_80 : i32
    scf.if %255 {
      %c0_228 = arith.constant 0 : index
      %c0_229 = arith.constant 0 : index
      %788 = vector.load %arg7[%c0_228, %c0_229] : memref<8x128xf32, #tpu.memory_space<vmem>>, vector<8x128xf32>
      %789 = vector.shape_cast %244 : vector<8x1xi1> to vector<8x1xi1>
      %790 = vector.broadcast %789 : vector<8x1xi1> to vector<8x128xi1>
      %791 = arith.select %790, %180, %788 : vector<8x128xi1>, vector<8x128xf32>
      %c0_230 = arith.constant 0 : index
      %c0_231 = arith.constant 0 : index
      %792 = vector.load %arg7[%c0_230, %c0_231] : memref<8x128xf32, #tpu.memory_space<vmem>>, vector<8x128xf32>
      tpu.vector_store %arg7[%c0_230, %c0_231], %791 {strides = array<i32>} : memref<8x128xf32, #tpu.memory_space<vmem>>, vector<8x128xf32>,
    } else {
    }
    %c3_i32 = arith.constant 3 : i32
    %256 = math.tanh %225 : vector<8x128xf32>
    %257 = arith.subf %256, %0 : vector<8x128xf32>
    %258 = arith.mulf %257, %257 : vector<8x128xf32>
    %cst_81 = arith.constant dense<0.000000e+00> : vector<8xf32>
    %259 = vector.multi_reduction <add>, %258, %cst_81 [1] : vector<8x128xf32> to vector<8xf32>
    %260 = vector.shape_cast %259 : vector<8xf32> to vector<8x1xf32>
    %cst_82 = arith.constant dense<0.000000e+00> : vector<8x16xf32>
    %261 = tpu.matmul %256, %2, %cst_82 {dimension_numbers = #tpu.dot_dimension_numbers<[1], [0], [0], [1], [0, 0, 1, 1], [], []>} : vector<8x128xf32>, vector<128x16xf32>, vector<8x16xf32> -> vector<8x16xf32>
    %262 = arith.addf %261, %6 : vector<8x16xf32>
    %cst_83 = arith.constant dense<0xFF800000> : vector<8xf32>
    %263 = vector.multi_reduction <maximumf>, %262, %cst_83 [1] : vector<8x16xf32> to vector<8xf32>
    %264 = vector.shape_cast %263 : vector<8xf32> to vector<8x1xf32>
    %265 = vector.broadcast %264 : vector<8x1xf32> to vector<8x16xf32>
    %266 = arith.subf %262, %265 : vector<8x16xf32>
    %267 = math.exp %266 : vector<8x16xf32>
    %cst_84 = arith.constant dense<0.000000e+00> : vector<8xf32>
    %268 = vector.multi_reduction <add>, %267, %cst_84 [1] : vector<8x16xf32> to vector<8xf32>
    %269 = vector.shape_cast %268 : vector<8xf32> to vector<8x1xf32>
    %270 = tpu.reciprocal %269 {approx = true} : vector<8x1xf32> -> vector<8x1xf32>
    %271 = vector.broadcast %270 : vector<8x1xf32> to vector<8x16xf32>
    %272 = arith.mulf %267, %271 : vector<8x16xf32>
    %273 = arith.subf %272, %11 : vector<8x16xf32>
    %cst_85 = arith.constant dense<0.000000e+00> : vector<8x128xf32>
    %274 = tpu.matmul %273, %3, %cst_85 {dimension_numbers = #tpu.dot_dimension_numbers<[1], [0], [0], [1], [0, 0, 1, 1], [], []>} : vector<8x16xf32>, vector<16x128xf32>, vector<8x128xf32> -> vector<8x128xf32>
    %cst_86 = arith.constant 2.000000e+01 : f32
    %275 = vector.broadcast %cst_86 : f32 to vector<8x128xf32>
    %276 = arith.mulf %275, %274 : vector<8x128xf32>
    %277 = arith.subf %257, %276 : vector<8x128xf32>
    %278 = arith.mulf %256, %256 : vector<8x128xf32>
    %cst_87 = arith.constant 1.000000e+00 : f32
    %279 = vector.broadcast %cst_87 : f32 to vector<8x128xf32>
    %280 = arith.subf %279, %278 : vector<8x128xf32>
    %281 = arith.mulf %277, %280 : vector<8x128xf32>
    %cst_88 = arith.constant 0.899999976 : f32
    %282 = vector.broadcast %cst_88 : f32 to vector<8x128xf32>
    %283 = arith.mulf %282, %210 : vector<8x128xf32>
    %cst_89 = arith.constant 1.000000e-01 : f32
    %284 = vector.broadcast %cst_89 : f32 to vector<8x128xf32>
    %285 = arith.mulf %284, %281 : vector<8x128xf32>
    %286 = arith.addf %283, %285 : vector<8x128xf32>
    %cst_90 = arith.constant 9.990000e-01 : f32
    %287 = vector.broadcast %cst_90 : f32 to vector<8x128xf32>
    %288 = arith.mulf %287, %216 : vector<8x128xf32>
    %cst_91 = arith.constant 1.000000e-03 : f32
    %289 = vector.broadcast %cst_91 : f32 to vector<8x128xf32>
    %290 = arith.mulf %289, %281 : vector<8x128xf32>
    %291 = arith.mulf %290, %281 : vector<8x128xf32>
    %292 = arith.addf %288, %291 : vector<8x128xf32>
    %293 = arith.index_cast %c3_i32 : i32 to index
    %294 = memref.load %arg1[%293] : memref<10xf32, #tpu.memory_space<smem>>
    %295 = vector.broadcast %294 : f32 to vector<8x128xf32>
    %296 = arith.mulf %295, %286 : vector<8x128xf32>
    %cst_92 = arith.constant 1.000000e-16 : f32
    %297 = vector.broadcast %cst_92 : f32 to vector<8x128xf32>
    %298 = arith.addf %292, %297 : vector<8x128xf32>
    %299 = math.rsqrt %298 : vector<8x128xf32>
    %300 = arith.mulf %296, %299 : vector<8x128xf32>
    %301 = arith.subf %225, %300 : vector<8x128xf32>
    %302 = vector.broadcast %264 : vector<8x1xf32> to vector<8x16xf32>
    %303 = arith.cmpf oeq, %262, %302 : vector<8x16xf32>
    %c16_i32_93 = arith.constant 16 : i32
    %304 = vector.broadcast %c16_i32_93 : i32 to vector<8x16xi32>
    %305 = arith.select %303, %7, %304 : vector<8x16xi1>, vector<8x16xi32>
    %cst_94 = arith.constant dense<2147483647> : vector<8xi32>
    %306 = vector.multi_reduction <minsi>, %305, %cst_94 [1] : vector<8x16xi32> to vector<8xi32>
    %307 = vector.shape_cast %306 : vector<8xi32> to vector<8x1xi32>
    %308 = arith.cmpi ne, %307, %1 : vector<8x1xi32>
    %cst_95 = arith.constant dense<0xFF800000> : vector<8xf32>
    %309 = vector.multi_reduction <maximumf>, %257, %cst_95 [1] : vector<8x128xf32> to vector<8xf32>
    %310 = vector.shape_cast %309 : vector<8xf32> to vector<8x1xf32>
    %311 = tpu.reciprocal %310 {approx = true} : vector<8x1xf32> -> vector<8x1xf32>
    %312 = arith.mulf %13, %311 : vector<8x1xf32>
    %313 = math.log %312 : vector<8x1xf32>
    %314 = vector.broadcast %15 : f32 to vector<8x1xf32>
    %315 = arith.mulf %314, %313 : vector<8x1xf32>
    %316 = arith.cmpf ogt, %245, %260 : vector<8x1xf32>
    %317 = arith.andi %308, %316 : vector<8x1xi1>
    %cst_96 = arith.constant 2.000000e+01 : f32
    %318 = vector.broadcast %cst_96 : f32 to vector<8x1xf32>
    %319 = arith.cmpf ogt, %315, %318 : vector<8x1xf32>
    %320 = arith.andi %317, %319 : vector<8x1xi1>
    %321 = arith.select %320, %260, %245 : vector<8x1xi1>, vector<8x1xf32>
    %cst_97 = arith.constant 1.000000e+00 : f32
    %cst_98 = arith.constant 0.000000e+00 : f32
    %322 = vector.broadcast %cst_97 : f32 to vector<8x1xf32>
    %323 = vector.broadcast %cst_98 : f32 to vector<8x1xf32>
    %324 = arith.select %320, %322, %323 : vector<8x1xi1>, vector<8x1xf32>
    %325 = vector.shape_cast %324 : vector<8x1xf32> to vector<1x8x1xf32>
    %cst_99 = arith.constant dense<0xFF800000> : vector<1xf32>
    %326 = vector.multi_reduction <maximumf>, %325, %cst_99 [1, 2] : vector<1x8x1xf32> to vector<1xf32>
    %327 = vector.shape_cast %326 : vector<1xf32> to vector<1x1x1xf32>
    %328 = vector.extract %327[0, 0, 0] : f32 from vector<1x1x1xf32>
    %cst_100 = arith.constant 0.000000e+00 : f32
    %329 = arith.cmpf ogt, %328, %cst_100 : f32
    %330 = arith.extui %329 : i1 to i32
    %c0_i32_101 = arith.constant 0 : i32
    %331 = arith.cmpi ne, %330, %c0_i32_101 : i32
    scf.if %331 {
      %c0_228 = arith.constant 0 : index
      %c0_229 = arith.constant 0 : index
      %788 = vector.load %arg7[%c0_228, %c0_229] : memref<8x128xf32, #tpu.memory_space<vmem>>, vector<8x128xf32>
      %789 = vector.shape_cast %320 : vector<8x1xi1> to vector<8x1xi1>
      %790 = vector.broadcast %789 : vector<8x1xi1> to vector<8x128xi1>
      %791 = arith.select %790, %256, %788 : vector<8x128xi1>, vector<8x128xf32>
      %c0_230 = arith.constant 0 : index
      %c0_231 = arith.constant 0 : index
      %792 = vector.load %arg7[%c0_230, %c0_231] : memref<8x128xf32, #tpu.memory_space<vmem>>, vector<8x128xf32>
      tpu.vector_store %arg7[%c0_230, %c0_231], %791 {strides = array<i32>} : memref<8x128xf32, #tpu.memory_space<vmem>>, vector<8x128xf32>,
    } else {
    }
    %c4_i32 = arith.constant 4 : i32
    %332 = math.tanh %301 : vector<8x128xf32>
    %333 = arith.subf %332, %0 : vector<8x128xf32>
    %334 = arith.mulf %333, %333 : vector<8x128xf32>
    %cst_102 = arith.constant dense<0.000000e+00> : vector<8xf32>
    %335 = vector.multi_reduction <add>, %334, %cst_102 [1] : vector<8x128xf32> to vector<8xf32>
    %336 = vector.shape_cast %335 : vector<8xf32> to vector<8x1xf32>
    %cst_103 = arith.constant dense<0.000000e+00> : vector<8x16xf32>
    %337 = tpu.matmul %332, %2, %cst_103 {dimension_numbers = #tpu.dot_dimension_numbers<[1], [0], [0], [1], [0, 0, 1, 1], [], []>} : vector<8x128xf32>, vector<128x16xf32>, vector<8x16xf32> -> vector<8x16xf32>
    %338 = arith.addf %337, %6 : vector<8x16xf32>
    %cst_104 = arith.constant dense<0xFF800000> : vector<8xf32>
    %339 = vector.multi_reduction <maximumf>, %338, %cst_104 [1] : vector<8x16xf32> to vector<8xf32>
    %340 = vector.shape_cast %339 : vector<8xf32> to vector<8x1xf32>
    %341 = vector.broadcast %340 : vector<8x1xf32> to vector<8x16xf32>
    %342 = arith.subf %338, %341 : vector<8x16xf32>
    %343 = math.exp %342 : vector<8x16xf32>
    %cst_105 = arith.constant dense<0.000000e+00> : vector<8xf32>
    %344 = vector.multi_reduction <add>, %343, %cst_105 [1] : vector<8x16xf32> to vector<8xf32>
    %345 = vector.shape_cast %344 : vector<8xf32> to vector<8x1xf32>
    %346 = tpu.reciprocal %345 {approx = true} : vector<8x1xf32> -> vector<8x1xf32>
    %347 = vector.broadcast %346 : vector<8x1xf32> to vector<8x16xf32>
    %348 = arith.mulf %343, %347 : vector<8x16xf32>
    %349 = arith.subf %348, %11 : vector<8x16xf32>
    %cst_106 = arith.constant dense<0.000000e+00> : vector<8x128xf32>
    %350 = tpu.matmul %349, %3, %cst_106 {dimension_numbers = #tpu.dot_dimension_numbers<[1], [0], [0], [1], [0, 0, 1, 1], [], []>} : vector<8x16xf32>, vector<16x128xf32>, vector<8x128xf32> -> vector<8x128xf32>
    %cst_107 = arith.constant 2.000000e+01 : f32
    %351 = vector.broadcast %cst_107 : f32 to vector<8x128xf32>
    %352 = arith.mulf %351, %350 : vector<8x128xf32>
    %353 = arith.subf %333, %352 : vector<8x128xf32>
    %354 = arith.mulf %332, %332 : vector<8x128xf32>
    %cst_108 = arith.constant 1.000000e+00 : f32
    %355 = vector.broadcast %cst_108 : f32 to vector<8x128xf32>
    %356 = arith.subf %355, %354 : vector<8x128xf32>
    %357 = arith.mulf %353, %356 : vector<8x128xf32>
    %cst_109 = arith.constant 0.899999976 : f32
    %358 = vector.broadcast %cst_109 : f32 to vector<8x128xf32>
    %359 = arith.mulf %358, %286 : vector<8x128xf32>
    %cst_110 = arith.constant 1.000000e-01 : f32
    %360 = vector.broadcast %cst_110 : f32 to vector<8x128xf32>
    %361 = arith.mulf %360, %357 : vector<8x128xf32>
    %362 = arith.addf %359, %361 : vector<8x128xf32>
    %cst_111 = arith.constant 9.990000e-01 : f32
    %363 = vector.broadcast %cst_111 : f32 to vector<8x128xf32>
    %364 = arith.mulf %363, %292 : vector<8x128xf32>
    %cst_112 = arith.constant 1.000000e-03 : f32
    %365 = vector.broadcast %cst_112 : f32 to vector<8x128xf32>
    %366 = arith.mulf %365, %357 : vector<8x128xf32>
    %367 = arith.mulf %366, %357 : vector<8x128xf32>
    %368 = arith.addf %364, %367 : vector<8x128xf32>
    %369 = arith.index_cast %c4_i32 : i32 to index
    %370 = memref.load %arg1[%369] : memref<10xf32, #tpu.memory_space<smem>>
    %371 = vector.broadcast %370 : f32 to vector<8x128xf32>
    %372 = arith.mulf %371, %362 : vector<8x128xf32>
    %cst_113 = arith.constant 1.000000e-16 : f32
    %373 = vector.broadcast %cst_113 : f32 to vector<8x128xf32>
    %374 = arith.addf %368, %373 : vector<8x128xf32>
    %375 = math.rsqrt %374 : vector<8x128xf32>
    %376 = arith.mulf %372, %375 : vector<8x128xf32>
    %377 = arith.subf %301, %376 : vector<8x128xf32>
    %378 = vector.broadcast %340 : vector<8x1xf32> to vector<8x16xf32>
    %379 = arith.cmpf oeq, %338, %378 : vector<8x16xf32>
    %c16_i32_114 = arith.constant 16 : i32
    %380 = vector.broadcast %c16_i32_114 : i32 to vector<8x16xi32>
    %381 = arith.select %379, %7, %380 : vector<8x16xi1>, vector<8x16xi32>
    %cst_115 = arith.constant dense<2147483647> : vector<8xi32>
    %382 = vector.multi_reduction <minsi>, %381, %cst_115 [1] : vector<8x16xi32> to vector<8xi32>
    %383 = vector.shape_cast %382 : vector<8xi32> to vector<8x1xi32>
    %384 = arith.cmpi ne, %383, %1 : vector<8x1xi32>
    %cst_116 = arith.constant dense<0xFF800000> : vector<8xf32>
    %385 = vector.multi_reduction <maximumf>, %333, %cst_116 [1] : vector<8x128xf32> to vector<8xf32>
    %386 = vector.shape_cast %385 : vector<8xf32> to vector<8x1xf32>
    %387 = tpu.reciprocal %386 {approx = true} : vector<8x1xf32> -> vector<8x1xf32>
    %388 = arith.mulf %13, %387 : vector<8x1xf32>
    %389 = math.log %388 : vector<8x1xf32>
    %390 = vector.broadcast %15 : f32 to vector<8x1xf32>
    %391 = arith.mulf %390, %389 : vector<8x1xf32>
    %392 = arith.cmpf ogt, %321, %336 : vector<8x1xf32>
    %393 = arith.andi %384, %392 : vector<8x1xi1>
    %cst_117 = arith.constant 2.000000e+01 : f32
    %394 = vector.broadcast %cst_117 : f32 to vector<8x1xf32>
    %395 = arith.cmpf ogt, %391, %394 : vector<8x1xf32>
    %396 = arith.andi %393, %395 : vector<8x1xi1>
    %397 = arith.select %396, %336, %321 : vector<8x1xi1>, vector<8x1xf32>
    %cst_118 = arith.constant 1.000000e+00 : f32
    %cst_119 = arith.constant 0.000000e+00 : f32
    %398 = vector.broadcast %cst_118 : f32 to vector<8x1xf32>
    %399 = vector.broadcast %cst_119 : f32 to vector<8x1xf32>
    %400 = arith.select %396, %398, %399 : vector<8x1xi1>, vector<8x1xf32>
    %401 = vector.shape_cast %400 : vector<8x1xf32> to vector<1x8x1xf32>
    %cst_120 = arith.constant dense<0xFF800000> : vector<1xf32>
    %402 = vector.multi_reduction <maximumf>, %401, %cst_120 [1, 2] : vector<1x8x1xf32> to vector<1xf32>
    %403 = vector.shape_cast %402 : vector<1xf32> to vector<1x1x1xf32>
    %404 = vector.extract %403[0, 0, 0] : f32 from vector<1x1x1xf32>
    %cst_121 = arith.constant 0.000000e+00 : f32
    %405 = arith.cmpf ogt, %404, %cst_121 : f32
    %406 = arith.extui %405 : i1 to i32
    %c0_i32_122 = arith.constant 0 : i32
    %407 = arith.cmpi ne, %406, %c0_i32_122 : i32
    scf.if %407 {
      %c0_228 = arith.constant 0 : index
      %c0_229 = arith.constant 0 : index
      %788 = vector.load %arg7[%c0_228, %c0_229] : memref<8x128xf32, #tpu.memory_space<vmem>>, vector<8x128xf32>
      %789 = vector.shape_cast %396 : vector<8x1xi1> to vector<8x1xi1>
      %790 = vector.broadcast %789 : vector<8x1xi1> to vector<8x128xi1>
      %791 = arith.select %790, %332, %788 : vector<8x128xi1>, vector<8x128xf32>
      %c0_230 = arith.constant 0 : index
      %c0_231 = arith.constant 0 : index
      %792 = vector.load %arg7[%c0_230, %c0_231] : memref<8x128xf32, #tpu.memory_space<vmem>>, vector<8x128xf32>
      tpu.vector_store %arg7[%c0_230, %c0_231], %791 {strides = array<i32>} : memref<8x128xf32, #tpu.memory_space<vmem>>, vector<8x128xf32>,
    } else {
    }
    %c5_i32 = arith.constant 5 : i32
    %408 = math.tanh %377 : vector<8x128xf32>
    %409 = arith.subf %408, %0 : vector<8x128xf32>
    %410 = arith.mulf %409, %409 : vector<8x128xf32>
    %cst_123 = arith.constant dense<0.000000e+00> : vector<8xf32>
    %411 = vector.multi_reduction <add>, %410, %cst_123 [1] : vector<8x128xf32> to vector<8xf32>
    %412 = vector.shape_cast %411 : vector<8xf32> to vector<8x1xf32>
    %cst_124 = arith.constant dense<0.000000e+00> : vector<8x16xf32>
    %413 = tpu.matmul %408, %2, %cst_124 {dimension_numbers = #tpu.dot_dimension_numbers<[1], [0], [0], [1], [0, 0, 1, 1], [], []>} : vector<8x128xf32>, vector<128x16xf32>, vector<8x16xf32> -> vector<8x16xf32>
    %414 = arith.addf %413, %6 : vector<8x16xf32>
    %cst_125 = arith.constant dense<0xFF800000> : vector<8xf32>
    %415 = vector.multi_reduction <maximumf>, %414, %cst_125 [1] : vector<8x16xf32> to vector<8xf32>
    %416 = vector.shape_cast %415 : vector<8xf32> to vector<8x1xf32>
    %417 = vector.broadcast %416 : vector<8x1xf32> to vector<8x16xf32>
    %418 = arith.subf %414, %417 : vector<8x16xf32>
    %419 = math.exp %418 : vector<8x16xf32>
    %cst_126 = arith.constant dense<0.000000e+00> : vector<8xf32>
    %420 = vector.multi_reduction <add>, %419, %cst_126 [1] : vector<8x16xf32> to vector<8xf32>
    %421 = vector.shape_cast %420 : vector<8xf32> to vector<8x1xf32>
    %422 = tpu.reciprocal %421 {approx = true} : vector<8x1xf32> -> vector<8x1xf32>
    %423 = vector.broadcast %422 : vector<8x1xf32> to vector<8x16xf32>
    %424 = arith.mulf %419, %423 : vector<8x16xf32>
    %425 = arith.subf %424, %11 : vector<8x16xf32>
    %cst_127 = arith.constant dense<0.000000e+00> : vector<8x128xf32>
    %426 = tpu.matmul %425, %3, %cst_127 {dimension_numbers = #tpu.dot_dimension_numbers<[1], [0], [0], [1], [0, 0, 1, 1], [], []>} : vector<8x16xf32>, vector<16x128xf32>, vector<8x128xf32> -> vector<8x128xf32>
    %cst_128 = arith.constant 2.000000e+01 : f32
    %427 = vector.broadcast %cst_128 : f32 to vector<8x128xf32>
    %428 = arith.mulf %427, %426 : vector<8x128xf32>
    %429 = arith.subf %409, %428 : vector<8x128xf32>
    %430 = arith.mulf %408, %408 : vector<8x128xf32>
    %cst_129 = arith.constant 1.000000e+00 : f32
    %431 = vector.broadcast %cst_129 : f32 to vector<8x128xf32>
    %432 = arith.subf %431, %430 : vector<8x128xf32>
    %433 = arith.mulf %429, %432 : vector<8x128xf32>
    %cst_130 = arith.constant 0.899999976 : f32
    %434 = vector.broadcast %cst_130 : f32 to vector<8x128xf32>
    %435 = arith.mulf %434, %362 : vector<8x128xf32>
    %cst_131 = arith.constant 1.000000e-01 : f32
    %436 = vector.broadcast %cst_131 : f32 to vector<8x128xf32>
    %437 = arith.mulf %436, %433 : vector<8x128xf32>
    %438 = arith.addf %435, %437 : vector<8x128xf32>
    %cst_132 = arith.constant 9.990000e-01 : f32
    %439 = vector.broadcast %cst_132 : f32 to vector<8x128xf32>
    %440 = arith.mulf %439, %368 : vector<8x128xf32>
    %cst_133 = arith.constant 1.000000e-03 : f32
    %441 = vector.broadcast %cst_133 : f32 to vector<8x128xf32>
    %442 = arith.mulf %441, %433 : vector<8x128xf32>
    %443 = arith.mulf %442, %433 : vector<8x128xf32>
    %444 = arith.addf %440, %443 : vector<8x128xf32>
    %445 = arith.index_cast %c5_i32 : i32 to index
    %446 = memref.load %arg1[%445] : memref<10xf32, #tpu.memory_space<smem>>
    %447 = vector.broadcast %446 : f32 to vector<8x128xf32>
    %448 = arith.mulf %447, %438 : vector<8x128xf32>
    %cst_134 = arith.constant 1.000000e-16 : f32
    %449 = vector.broadcast %cst_134 : f32 to vector<8x128xf32>
    %450 = arith.addf %444, %449 : vector<8x128xf32>
    %451 = math.rsqrt %450 : vector<8x128xf32>
    %452 = arith.mulf %448, %451 : vector<8x128xf32>
    %453 = arith.subf %377, %452 : vector<8x128xf32>
    %454 = vector.broadcast %416 : vector<8x1xf32> to vector<8x16xf32>
    %455 = arith.cmpf oeq, %414, %454 : vector<8x16xf32>
    %c16_i32_135 = arith.constant 16 : i32
    %456 = vector.broadcast %c16_i32_135 : i32 to vector<8x16xi32>
    %457 = arith.select %455, %7, %456 : vector<8x16xi1>, vector<8x16xi32>
    %cst_136 = arith.constant dense<2147483647> : vector<8xi32>
    %458 = vector.multi_reduction <minsi>, %457, %cst_136 [1] : vector<8x16xi32> to vector<8xi32>
    %459 = vector.shape_cast %458 : vector<8xi32> to vector<8x1xi32>
    %460 = arith.cmpi ne, %459, %1 : vector<8x1xi32>
    %cst_137 = arith.constant dense<0xFF800000> : vector<8xf32>
    %461 = vector.multi_reduction <maximumf>, %409, %cst_137 [1] : vector<8x128xf32> to vector<8xf32>
    %462 = vector.shape_cast %461 : vector<8xf32> to vector<8x1xf32>
    %463 = tpu.reciprocal %462 {approx = true} : vector<8x1xf32> -> vector<8x1xf32>
    %464 = arith.mulf %13, %463 : vector<8x1xf32>
    %465 = math.log %464 : vector<8x1xf32>
    %466 = vector.broadcast %15 : f32 to vector<8x1xf32>
    %467 = arith.mulf %466, %465 : vector<8x1xf32>
    %468 = arith.cmpf ogt, %397, %412 : vector<8x1xf32>
    %469 = arith.andi %460, %468 : vector<8x1xi1>
    %cst_138 = arith.constant 2.000000e+01 : f32
    %470 = vector.broadcast %cst_138 : f32 to vector<8x1xf32>
    %471 = arith.cmpf ogt, %467, %470 : vector<8x1xf32>
    %472 = arith.andi %469, %471 : vector<8x1xi1>
    %473 = arith.select %472, %412, %397 : vector<8x1xi1>, vector<8x1xf32>
    %cst_139 = arith.constant 1.000000e+00 : f32
    %cst_140 = arith.constant 0.000000e+00 : f32
    %474 = vector.broadcast %cst_139 : f32 to vector<8x1xf32>
    %475 = vector.broadcast %cst_140 : f32 to vector<8x1xf32>
    %476 = arith.select %472, %474, %475 : vector<8x1xi1>, vector<8x1xf32>
    %477 = vector.shape_cast %476 : vector<8x1xf32> to vector<1x8x1xf32>
    %cst_141 = arith.constant dense<0xFF800000> : vector<1xf32>
    %478 = vector.multi_reduction <maximumf>, %477, %cst_141 [1, 2] : vector<1x8x1xf32> to vector<1xf32>
    %479 = vector.shape_cast %478 : vector<1xf32> to vector<1x1x1xf32>
    %480 = vector.extract %479[0, 0, 0] : f32 from vector<1x1x1xf32>
    %cst_142 = arith.constant 0.000000e+00 : f32
    %481 = arith.cmpf ogt, %480, %cst_142 : f32
    %482 = arith.extui %481 : i1 to i32
    %c0_i32_143 = arith.constant 0 : i32
    %483 = arith.cmpi ne, %482, %c0_i32_143 : i32
    scf.if %483 {
      %c0_228 = arith.constant 0 : index
      %c0_229 = arith.constant 0 : index
      %788 = vector.load %arg7[%c0_228, %c0_229] : memref<8x128xf32, #tpu.memory_space<vmem>>, vector<8x128xf32>
      %789 = vector.shape_cast %472 : vector<8x1xi1> to vector<8x1xi1>
      %790 = vector.broadcast %789 : vector<8x1xi1> to vector<8x128xi1>
      %791 = arith.select %790, %408, %788 : vector<8x128xi1>, vector<8x128xf32>
      %c0_230 = arith.constant 0 : index
      %c0_231 = arith.constant 0 : index
      %792 = vector.load %arg7[%c0_230, %c0_231] : memref<8x128xf32, #tpu.memory_space<vmem>>, vector<8x128xf32>
      tpu.vector_store %arg7[%c0_230, %c0_231], %791 {strides = array<i32>} : memref<8x128xf32, #tpu.memory_space<vmem>>, vector<8x128xf32>,
    } else {
    }
    %c6_i32 = arith.constant 6 : i32
    %484 = math.tanh %453 : vector<8x128xf32>
    %485 = arith.subf %484, %0 : vector<8x128xf32>
    %486 = arith.mulf %485, %485 : vector<8x128xf32>
    %cst_144 = arith.constant dense<0.000000e+00> : vector<8xf32>
    %487 = vector.multi_reduction <add>, %486, %cst_144 [1] : vector<8x128xf32> to vector<8xf32>
    %488 = vector.shape_cast %487 : vector<8xf32> to vector<8x1xf32>
    %cst_145 = arith.constant dense<0.000000e+00> : vector<8x16xf32>
    %489 = tpu.matmul %484, %2, %cst_145 {dimension_numbers = #tpu.dot_dimension_numbers<[1], [0], [0], [1], [0, 0, 1, 1], [], []>} : vector<8x128xf32>, vector<128x16xf32>, vector<8x16xf32> -> vector<8x16xf32>
    %490 = arith.addf %489, %6 : vector<8x16xf32>
    %cst_146 = arith.constant dense<0xFF800000> : vector<8xf32>
    %491 = vector.multi_reduction <maximumf>, %490, %cst_146 [1] : vector<8x16xf32> to vector<8xf32>
    %492 = vector.shape_cast %491 : vector<8xf32> to vector<8x1xf32>
    %493 = vector.broadcast %492 : vector<8x1xf32> to vector<8x16xf32>
    %494 = arith.subf %490, %493 : vector<8x16xf32>
    %495 = math.exp %494 : vector<8x16xf32>
    %cst_147 = arith.constant dense<0.000000e+00> : vector<8xf32>
    %496 = vector.multi_reduction <add>, %495, %cst_147 [1] : vector<8x16xf32> to vector<8xf32>
    %497 = vector.shape_cast %496 : vector<8xf32> to vector<8x1xf32>
    %498 = tpu.reciprocal %497 {approx = true} : vector<8x1xf32> -> vector<8x1xf32>
    %499 = vector.broadcast %498 : vector<8x1xf32> to vector<8x16xf32>
    %500 = arith.mulf %495, %499 : vector<8x16xf32>
    %501 = arith.subf %500, %11 : vector<8x16xf32>
    %cst_148 = arith.constant dense<0.000000e+00> : vector<8x128xf32>
    %502 = tpu.matmul %501, %3, %cst_148 {dimension_numbers = #tpu.dot_dimension_numbers<[1], [0], [0], [1], [0, 0, 1, 1], [], []>} : vector<8x16xf32>, vector<16x128xf32>, vector<8x128xf32> -> vector<8x128xf32>
    %cst_149 = arith.constant 2.000000e+01 : f32
    %503 = vector.broadcast %cst_149 : f32 to vector<8x128xf32>
    %504 = arith.mulf %503, %502 : vector<8x128xf32>
    %505 = arith.subf %485, %504 : vector<8x128xf32>
    %506 = arith.mulf %484, %484 : vector<8x128xf32>
    %cst_150 = arith.constant 1.000000e+00 : f32
    %507 = vector.broadcast %cst_150 : f32 to vector<8x128xf32>
    %508 = arith.subf %507, %506 : vector<8x128xf32>
    %509 = arith.mulf %505, %508 : vector<8x128xf32>
    %cst_151 = arith.constant 0.899999976 : f32
    %510 = vector.broadcast %cst_151 : f32 to vector<8x128xf32>
    %511 = arith.mulf %510, %438 : vector<8x128xf32>
    %cst_152 = arith.constant 1.000000e-01 : f32
    %512 = vector.broadcast %cst_152 : f32 to vector<8x128xf32>
    %513 = arith.mulf %512, %509 : vector<8x128xf32>
    %514 = arith.addf %511, %513 : vector<8x128xf32>
    %cst_153 = arith.constant 9.990000e-01 : f32
    %515 = vector.broadcast %cst_153 : f32 to vector<8x128xf32>
    %516 = arith.mulf %515, %444 : vector<8x128xf32>
    %cst_154 = arith.constant 1.000000e-03 : f32
    %517 = vector.broadcast %cst_154 : f32 to vector<8x128xf32>
    %518 = arith.mulf %517, %509 : vector<8x128xf32>
    %519 = arith.mulf %518, %509 : vector<8x128xf32>
    %520 = arith.addf %516, %519 : vector<8x128xf32>
    %521 = arith.index_cast %c6_i32 : i32 to index
    %522 = memref.load %arg1[%521] : memref<10xf32, #tpu.memory_space<smem>>
    %523 = vector.broadcast %522 : f32 to vector<8x128xf32>
    %524 = arith.mulf %523, %514 : vector<8x128xf32>
    %cst_155 = arith.constant 1.000000e-16 : f32
    %525 = vector.broadcast %cst_155 : f32 to vector<8x128xf32>
    %526 = arith.addf %520, %525 : vector<8x128xf32>
    %527 = math.rsqrt %526 : vector<8x128xf32>
    %528 = arith.mulf %524, %527 : vector<8x128xf32>
    %529 = arith.subf %453, %528 : vector<8x128xf32>
    %530 = vector.broadcast %492 : vector<8x1xf32> to vector<8x16xf32>
    %531 = arith.cmpf oeq, %490, %530 : vector<8x16xf32>
    %c16_i32_156 = arith.constant 16 : i32
    %532 = vector.broadcast %c16_i32_156 : i32 to vector<8x16xi32>
    %533 = arith.select %531, %7, %532 : vector<8x16xi1>, vector<8x16xi32>
    %cst_157 = arith.constant dense<2147483647> : vector<8xi32>
    %534 = vector.multi_reduction <minsi>, %533, %cst_157 [1] : vector<8x16xi32> to vector<8xi32>
    %535 = vector.shape_cast %534 : vector<8xi32> to vector<8x1xi32>
    %536 = arith.cmpi ne, %535, %1 : vector<8x1xi32>
    %cst_158 = arith.constant dense<0xFF800000> : vector<8xf32>
    %537 = vector.multi_reduction <maximumf>, %485, %cst_158 [1] : vector<8x128xf32> to vector<8xf32>
    %538 = vector.shape_cast %537 : vector<8xf32> to vector<8x1xf32>
    %539 = tpu.reciprocal %538 {approx = true} : vector<8x1xf32> -> vector<8x1xf32>
    %540 = arith.mulf %13, %539 : vector<8x1xf32>
    %541 = math.log %540 : vector<8x1xf32>
    %542 = vector.broadcast %15 : f32 to vector<8x1xf32>
    %543 = arith.mulf %542, %541 : vector<8x1xf32>
    %544 = arith.cmpf ogt, %473, %488 : vector<8x1xf32>
    %545 = arith.andi %536, %544 : vector<8x1xi1>
    %cst_159 = arith.constant 2.000000e+01 : f32
    %546 = vector.broadcast %cst_159 : f32 to vector<8x1xf32>
    %547 = arith.cmpf ogt, %543, %546 : vector<8x1xf32>
    %548 = arith.andi %545, %547 : vector<8x1xi1>
    %549 = arith.select %548, %488, %473 : vector<8x1xi1>, vector<8x1xf32>
    %cst_160 = arith.constant 1.000000e+00 : f32
    %cst_161 = arith.constant 0.000000e+00 : f32
    %550 = vector.broadcast %cst_160 : f32 to vector<8x1xf32>
    %551 = vector.broadcast %cst_161 : f32 to vector<8x1xf32>
    %552 = arith.select %548, %550, %551 : vector<8x1xi1>, vector<8x1xf32>
    %553 = vector.shape_cast %552 : vector<8x1xf32> to vector<1x8x1xf32>
    %cst_162 = arith.constant dense<0xFF800000> : vector<1xf32>
    %554 = vector.multi_reduction <maximumf>, %553, %cst_162 [1, 2] : vector<1x8x1xf32> to vector<1xf32>
    %555 = vector.shape_cast %554 : vector<1xf32> to vector<1x1x1xf32>
    %556 = vector.extract %555[0, 0, 0] : f32 from vector<1x1x1xf32>
    %cst_163 = arith.constant 0.000000e+00 : f32
    %557 = arith.cmpf ogt, %556, %cst_163 : f32
    %558 = arith.extui %557 : i1 to i32
    %c0_i32_164 = arith.constant 0 : i32
    %559 = arith.cmpi ne, %558, %c0_i32_164 : i32
    scf.if %559 {
      %c0_228 = arith.constant 0 : index
      %c0_229 = arith.constant 0 : index
      %788 = vector.load %arg7[%c0_228, %c0_229] : memref<8x128xf32, #tpu.memory_space<vmem>>, vector<8x128xf32>
      %789 = vector.shape_cast %548 : vector<8x1xi1> to vector<8x1xi1>
      %790 = vector.broadcast %789 : vector<8x1xi1> to vector<8x128xi1>
      %791 = arith.select %790, %484, %788 : vector<8x128xi1>, vector<8x128xf32>
      %c0_230 = arith.constant 0 : index
      %c0_231 = arith.constant 0 : index
      %792 = vector.load %arg7[%c0_230, %c0_231] : memref<8x128xf32, #tpu.memory_space<vmem>>, vector<8x128xf32>
      tpu.vector_store %arg7[%c0_230, %c0_231], %791 {strides = array<i32>} : memref<8x128xf32, #tpu.memory_space<vmem>>, vector<8x128xf32>,
    } else {
    }
    %c7_i32 = arith.constant 7 : i32
    %560 = math.tanh %529 : vector<8x128xf32>
    %561 = arith.subf %560, %0 : vector<8x128xf32>
    %562 = arith.mulf %561, %561 : vector<8x128xf32>
    %cst_165 = arith.constant dense<0.000000e+00> : vector<8xf32>
    %563 = vector.multi_reduction <add>, %562, %cst_165 [1] : vector<8x128xf32> to vector<8xf32>
    %564 = vector.shape_cast %563 : vector<8xf32> to vector<8x1xf32>
    %cst_166 = arith.constant dense<0.000000e+00> : vector<8x16xf32>
    %565 = tpu.matmul %560, %2, %cst_166 {dimension_numbers = #tpu.dot_dimension_numbers<[1], [0], [0], [1], [0, 0, 1, 1], [], []>} : vector<8x128xf32>, vector<128x16xf32>, vector<8x16xf32> -> vector<8x16xf32>
    %566 = arith.addf %565, %6 : vector<8x16xf32>
    %cst_167 = arith.constant dense<0xFF800000> : vector<8xf32>
    %567 = vector.multi_reduction <maximumf>, %566, %cst_167 [1] : vector<8x16xf32> to vector<8xf32>
    %568 = vector.shape_cast %567 : vector<8xf32> to vector<8x1xf32>
    %569 = vector.broadcast %568 : vector<8x1xf32> to vector<8x16xf32>
    %570 = arith.subf %566, %569 : vector<8x16xf32>
    %571 = math.exp %570 : vector<8x16xf32>
    %cst_168 = arith.constant dense<0.000000e+00> : vector<8xf32>
    %572 = vector.multi_reduction <add>, %571, %cst_168 [1] : vector<8x16xf32> to vector<8xf32>
    %573 = vector.shape_cast %572 : vector<8xf32> to vector<8x1xf32>
    %574 = tpu.reciprocal %573 {approx = true} : vector<8x1xf32> -> vector<8x1xf32>
    %575 = vector.broadcast %574 : vector<8x1xf32> to vector<8x16xf32>
    %576 = arith.mulf %571, %575 : vector<8x16xf32>
    %577 = arith.subf %576, %11 : vector<8x16xf32>
    %cst_169 = arith.constant dense<0.000000e+00> : vector<8x128xf32>
    %578 = tpu.matmul %577, %3, %cst_169 {dimension_numbers = #tpu.dot_dimension_numbers<[1], [0], [0], [1], [0, 0, 1, 1], [], []>} : vector<8x16xf32>, vector<16x128xf32>, vector<8x128xf32> -> vector<8x128xf32>
    %cst_170 = arith.constant 2.000000e+01 : f32
    %579 = vector.broadcast %cst_170 : f32 to vector<8x128xf32>
    %580 = arith.mulf %579, %578 : vector<8x128xf32>
    %581 = arith.subf %561, %580 : vector<8x128xf32>
    %582 = arith.mulf %560, %560 : vector<8x128xf32>
    %cst_171 = arith.constant 1.000000e+00 : f32
    %583 = vector.broadcast %cst_171 : f32 to vector<8x128xf32>
    %584 = arith.subf %583, %582 : vector<8x128xf32>
    %585 = arith.mulf %581, %584 : vector<8x128xf32>
    %cst_172 = arith.constant 0.899999976 : f32
    %586 = vector.broadcast %cst_172 : f32 to vector<8x128xf32>
    %587 = arith.mulf %586, %514 : vector<8x128xf32>
    %cst_173 = arith.constant 1.000000e-01 : f32
    %588 = vector.broadcast %cst_173 : f32 to vector<8x128xf32>
    %589 = arith.mulf %588, %585 : vector<8x128xf32>
    %590 = arith.addf %587, %589 : vector<8x128xf32>
    %cst_174 = arith.constant 9.990000e-01 : f32
    %591 = vector.broadcast %cst_174 : f32 to vector<8x128xf32>
    %592 = arith.mulf %591, %520 : vector<8x128xf32>
    %cst_175 = arith.constant 1.000000e-03 : f32
    %593 = vector.broadcast %cst_175 : f32 to vector<8x128xf32>
    %594 = arith.mulf %593, %585 : vector<8x128xf32>
    %595 = arith.mulf %594, %585 : vector<8x128xf32>
    %596 = arith.addf %592, %595 : vector<8x128xf32>
    %597 = arith.index_cast %c7_i32 : i32 to index
    %598 = memref.load %arg1[%597] : memref<10xf32, #tpu.memory_space<smem>>
    %599 = vector.broadcast %598 : f32 to vector<8x128xf32>
    %600 = arith.mulf %599, %590 : vector<8x128xf32>
    %cst_176 = arith.constant 1.000000e-16 : f32
    %601 = vector.broadcast %cst_176 : f32 to vector<8x128xf32>
    %602 = arith.addf %596, %601 : vector<8x128xf32>
    %603 = math.rsqrt %602 : vector<8x128xf32>
    %604 = arith.mulf %600, %603 : vector<8x128xf32>
    %605 = arith.subf %529, %604 : vector<8x128xf32>
    %606 = vector.broadcast %568 : vector<8x1xf32> to vector<8x16xf32>
    %607 = arith.cmpf oeq, %566, %606 : vector<8x16xf32>
    %c16_i32_177 = arith.constant 16 : i32
    %608 = vector.broadcast %c16_i32_177 : i32 to vector<8x16xi32>
    %609 = arith.select %607, %7, %608 : vector<8x16xi1>, vector<8x16xi32>
    %cst_178 = arith.constant dense<2147483647> : vector<8xi32>
    %610 = vector.multi_reduction <minsi>, %609, %cst_178 [1] : vector<8x16xi32> to vector<8xi32>
    %611 = vector.shape_cast %610 : vector<8xi32> to vector<8x1xi32>
    %612 = arith.cmpi ne, %611, %1 : vector<8x1xi32>
    %cst_179 = arith.constant dense<0xFF800000> : vector<8xf32>
    %613 = vector.multi_reduction <maximumf>, %561, %cst_179 [1] : vector<8x128xf32> to vector<8xf32>
    %614 = vector.shape_cast %613 : vector<8xf32> to vector<8x1xf32>
    %615 = tpu.reciprocal %614 {approx = true} : vector<8x1xf32> -> vector<8x1xf32>
    %616 = arith.mulf %13, %615 : vector<8x1xf32>
    %617 = math.log %616 : vector<8x1xf32>
    %618 = vector.broadcast %15 : f32 to vector<8x1xf32>
    %619 = arith.mulf %618, %617 : vector<8x1xf32>
    %620 = arith.cmpf ogt, %549, %564 : vector<8x1xf32>
    %621 = arith.andi %612, %620 : vector<8x1xi1>
    %cst_180 = arith.constant 2.000000e+01 : f32
    %622 = vector.broadcast %cst_180 : f32 to vector<8x1xf32>
    %623 = arith.cmpf ogt, %619, %622 : vector<8x1xf32>
    %624 = arith.andi %621, %623 : vector<8x1xi1>
    %625 = arith.select %624, %564, %549 : vector<8x1xi1>, vector<8x1xf32>
    %cst_181 = arith.constant 1.000000e+00 : f32
    %cst_182 = arith.constant 0.000000e+00 : f32
    %626 = vector.broadcast %cst_181 : f32 to vector<8x1xf32>
    %627 = vector.broadcast %cst_182 : f32 to vector<8x1xf32>
    %628 = arith.select %624, %626, %627 : vector<8x1xi1>, vector<8x1xf32>
    %629 = vector.shape_cast %628 : vector<8x1xf32> to vector<1x8x1xf32>
    %cst_183 = arith.constant dense<0xFF800000> : vector<1xf32>
    %630 = vector.multi_reduction <maximumf>, %629, %cst_183 [1, 2] : vector<1x8x1xf32> to vector<1xf32>
    %631 = vector.shape_cast %630 : vector<1xf32> to vector<1x1x1xf32>
    %632 = vector.extract %631[0, 0, 0] : f32 from vector<1x1x1xf32>
    %cst_184 = arith.constant 0.000000e+00 : f32
    %633 = arith.cmpf ogt, %632, %cst_184 : f32
    %634 = arith.extui %633 : i1 to i32
    %c0_i32_185 = arith.constant 0 : i32
    %635 = arith.cmpi ne, %634, %c0_i32_185 : i32
    scf.if %635 {
      %c0_228 = arith.constant 0 : index
      %c0_229 = arith.constant 0 : index
      %788 = vector.load %arg7[%c0_228, %c0_229] : memref<8x128xf32, #tpu.memory_space<vmem>>, vector<8x128xf32>
      %789 = vector.shape_cast %624 : vector<8x1xi1> to vector<8x1xi1>
      %790 = vector.broadcast %789 : vector<8x1xi1> to vector<8x128xi1>
      %791 = arith.select %790, %560, %788 : vector<8x128xi1>, vector<8x128xf32>
      %c0_230 = arith.constant 0 : index
      %c0_231 = arith.constant 0 : index
      %792 = vector.load %arg7[%c0_230, %c0_231] : memref<8x128xf32, #tpu.memory_space<vmem>>, vector<8x128xf32>
      tpu.vector_store %arg7[%c0_230, %c0_231], %791 {strides = array<i32>} : memref<8x128xf32, #tpu.memory_space<vmem>>, vector<8x128xf32>,
    } else {
    }
    %c8_i32 = arith.constant 8 : i32
    %636 = math.tanh %605 : vector<8x128xf32>
    %637 = arith.subf %636, %0 : vector<8x128xf32>
    %638 = arith.mulf %637, %637 : vector<8x128xf32>
    %cst_186 = arith.constant dense<0.000000e+00> : vector<8xf32>
    %639 = vector.multi_reduction <add>, %638, %cst_186 [1] : vector<8x128xf32> to vector<8xf32>
    %640 = vector.shape_cast %639 : vector<8xf32> to vector<8x1xf32>
    %cst_187 = arith.constant dense<0.000000e+00> : vector<8x16xf32>
    %641 = tpu.matmul %636, %2, %cst_187 {dimension_numbers = #tpu.dot_dimension_numbers<[1], [0], [0], [1], [0, 0, 1, 1], [], []>} : vector<8x128xf32>, vector<128x16xf32>, vector<8x16xf32> -> vector<8x16xf32>
    %642 = arith.addf %641, %6 : vector<8x16xf32>
    %cst_188 = arith.constant dense<0xFF800000> : vector<8xf32>
    %643 = vector.multi_reduction <maximumf>, %642, %cst_188 [1] : vector<8x16xf32> to vector<8xf32>
    %644 = vector.shape_cast %643 : vector<8xf32> to vector<8x1xf32>
    %645 = vector.broadcast %644 : vector<8x1xf32> to vector<8x16xf32>
    %646 = arith.subf %642, %645 : vector<8x16xf32>
    %647 = math.exp %646 : vector<8x16xf32>
    %cst_189 = arith.constant dense<0.000000e+00> : vector<8xf32>
    %648 = vector.multi_reduction <add>, %647, %cst_189 [1] : vector<8x16xf32> to vector<8xf32>
    %649 = vector.shape_cast %648 : vector<8xf32> to vector<8x1xf32>
    %650 = tpu.reciprocal %649 {approx = true} : vector<8x1xf32> -> vector<8x1xf32>
    %651 = vector.broadcast %650 : vector<8x1xf32> to vector<8x16xf32>
    %652 = arith.mulf %647, %651 : vector<8x16xf32>
    %653 = arith.subf %652, %11 : vector<8x16xf32>
    %cst_190 = arith.constant dense<0.000000e+00> : vector<8x128xf32>
    %654 = tpu.matmul %653, %3, %cst_190 {dimension_numbers = #tpu.dot_dimension_numbers<[1], [0], [0], [1], [0, 0, 1, 1], [], []>} : vector<8x16xf32>, vector<16x128xf32>, vector<8x128xf32> -> vector<8x128xf32>
    %cst_191 = arith.constant 2.000000e+01 : f32
    %655 = vector.broadcast %cst_191 : f32 to vector<8x128xf32>
    %656 = arith.mulf %655, %654 : vector<8x128xf32>
    %657 = arith.subf %637, %656 : vector<8x128xf32>
    %658 = arith.mulf %636, %636 : vector<8x128xf32>
    %cst_192 = arith.constant 1.000000e+00 : f32
    %659 = vector.broadcast %cst_192 : f32 to vector<8x128xf32>
    %660 = arith.subf %659, %658 : vector<8x128xf32>
    %661 = arith.mulf %657, %660 : vector<8x128xf32>
    %cst_193 = arith.constant 0.899999976 : f32
    %662 = vector.broadcast %cst_193 : f32 to vector<8x128xf32>
    %663 = arith.mulf %662, %590 : vector<8x128xf32>
    %cst_194 = arith.constant 1.000000e-01 : f32
    %664 = vector.broadcast %cst_194 : f32 to vector<8x128xf32>
    %665 = arith.mulf %664, %661 : vector<8x128xf32>
    %666 = arith.addf %663, %665 : vector<8x128xf32>
    %cst_195 = arith.constant 9.990000e-01 : f32
    %667 = vector.broadcast %cst_195 : f32 to vector<8x128xf32>
    %668 = arith.mulf %667, %596 : vector<8x128xf32>
    %cst_196 = arith.constant 1.000000e-03 : f32
    %669 = vector.broadcast %cst_196 : f32 to vector<8x128xf32>
    %670 = arith.mulf %669, %661 : vector<8x128xf32>
    %671 = arith.mulf %670, %661 : vector<8x128xf32>
    %672 = arith.addf %668, %671 : vector<8x128xf32>
    %673 = arith.index_cast %c8_i32 : i32 to index
    %674 = memref.load %arg1[%673] : memref<10xf32, #tpu.memory_space<smem>>
    %675 = vector.broadcast %674 : f32 to vector<8x128xf32>
    %676 = arith.mulf %675, %666 : vector<8x128xf32>
    %cst_197 = arith.constant 1.000000e-16 : f32
    %677 = vector.broadcast %cst_197 : f32 to vector<8x128xf32>
    %678 = arith.addf %672, %677 : vector<8x128xf32>
    %679 = math.rsqrt %678 : vector<8x128xf32>
    %680 = arith.mulf %676, %679 : vector<8x128xf32>
    %681 = arith.subf %605, %680 : vector<8x128xf32>
    %682 = vector.broadcast %644 : vector<8x1xf32> to vector<8x16xf32>
    %683 = arith.cmpf oeq, %642, %682 : vector<8x16xf32>
    %c16_i32_198 = arith.constant 16 : i32
    %684 = vector.broadcast %c16_i32_198 : i32 to vector<8x16xi32>
    %685 = arith.select %683, %7, %684 : vector<8x16xi1>, vector<8x16xi32>
    %cst_199 = arith.constant dense<2147483647> : vector<8xi32>
    %686 = vector.multi_reduction <minsi>, %685, %cst_199 [1] : vector<8x16xi32> to vector<8xi32>
    %687 = vector.shape_cast %686 : vector<8xi32> to vector<8x1xi32>
    %688 = arith.cmpi ne, %687, %1 : vector<8x1xi32>
    %cst_200 = arith.constant dense<0xFF800000> : vector<8xf32>
    %689 = vector.multi_reduction <maximumf>, %637, %cst_200 [1] : vector<8x128xf32> to vector<8xf32>
    %690 = vector.shape_cast %689 : vector<8xf32> to vector<8x1xf32>
    %691 = tpu.reciprocal %690 {approx = true} : vector<8x1xf32> -> vector<8x1xf32>
    %692 = arith.mulf %13, %691 : vector<8x1xf32>
    %693 = math.log %692 : vector<8x1xf32>
    %694 = vector.broadcast %15 : f32 to vector<8x1xf32>
    %695 = arith.mulf %694, %693 : vector<8x1xf32>
    %696 = arith.cmpf ogt, %625, %640 : vector<8x1xf32>
    %697 = arith.andi %688, %696 : vector<8x1xi1>
    %cst_201 = arith.constant 2.000000e+01 : f32
    %698 = vector.broadcast %cst_201 : f32 to vector<8x1xf32>
    %699 = arith.cmpf ogt, %695, %698 : vector<8x1xf32>
    %700 = arith.andi %697, %699 : vector<8x1xi1>
    %701 = arith.select %700, %640, %625 : vector<8x1xi1>, vector<8x1xf32>
    %cst_202 = arith.constant 1.000000e+00 : f32
    %cst_203 = arith.constant 0.000000e+00 : f32
    %702 = vector.broadcast %cst_202 : f32 to vector<8x1xf32>
    %703 = vector.broadcast %cst_203 : f32 to vector<8x1xf32>
    %704 = arith.select %700, %702, %703 : vector<8x1xi1>, vector<8x1xf32>
    %705 = vector.shape_cast %704 : vector<8x1xf32> to vector<1x8x1xf32>
    %cst_204 = arith.constant dense<0xFF800000> : vector<1xf32>
    %706 = vector.multi_reduction <maximumf>, %705, %cst_204 [1, 2] : vector<1x8x1xf32> to vector<1xf32>
    %707 = vector.shape_cast %706 : vector<1xf32> to vector<1x1x1xf32>
    %708 = vector.extract %707[0, 0, 0] : f32 from vector<1x1x1xf32>
    %cst_205 = arith.constant 0.000000e+00 : f32
    %709 = arith.cmpf ogt, %708, %cst_205 : f32
    %710 = arith.extui %709 : i1 to i32
    %c0_i32_206 = arith.constant 0 : i32
    %711 = arith.cmpi ne, %710, %c0_i32_206 : i32
    scf.if %711 {
      %c0_228 = arith.constant 0 : index
      %c0_229 = arith.constant 0 : index
      %788 = vector.load %arg7[%c0_228, %c0_229] : memref<8x128xf32, #tpu.memory_space<vmem>>, vector<8x128xf32>
      %789 = vector.shape_cast %700 : vector<8x1xi1> to vector<8x1xi1>
      %790 = vector.broadcast %789 : vector<8x1xi1> to vector<8x128xi1>
      %791 = arith.select %790, %636, %788 : vector<8x128xi1>, vector<8x128xf32>
      %c0_230 = arith.constant 0 : index
      %c0_231 = arith.constant 0 : index
      %792 = vector.load %arg7[%c0_230, %c0_231] : memref<8x128xf32, #tpu.memory_space<vmem>>, vector<8x128xf32>
      tpu.vector_store %arg7[%c0_230, %c0_231], %791 {strides = array<i32>} : memref<8x128xf32, #tpu.memory_space<vmem>>, vector<8x128xf32>,
    } else {
    }
    %c9_i32 = arith.constant 9 : i32
    %712 = math.tanh %681 : vector<8x128xf32>
    %713 = arith.subf %712, %0 : vector<8x128xf32>
    %714 = arith.mulf %713, %713 : vector<8x128xf32>
    %cst_207 = arith.constant dense<0.000000e+00> : vector<8xf32>
    %715 = vector.multi_reduction <add>, %714, %cst_207 [1] : vector<8x128xf32> to vector<8xf32>
    %716 = vector.shape_cast %715 : vector<8xf32> to vector<8x1xf32>
    %cst_208 = arith.constant dense<0.000000e+00> : vector<8x16xf32>
    %717 = tpu.matmul %712, %2, %cst_208 {dimension_numbers = #tpu.dot_dimension_numbers<[1], [0], [0], [1], [0, 0, 1, 1], [], []>} : vector<8x128xf32>, vector<128x16xf32>, vector<8x16xf32> -> vector<8x16xf32>
    %718 = arith.addf %717, %6 : vector<8x16xf32>
    %cst_209 = arith.constant dense<0xFF800000> : vector<8xf32>
    %719 = vector.multi_reduction <maximumf>, %718, %cst_209 [1] : vector<8x16xf32> to vector<8xf32>
    %720 = vector.shape_cast %719 : vector<8xf32> to vector<8x1xf32>
    %721 = vector.broadcast %720 : vector<8x1xf32> to vector<8x16xf32>
    %722 = arith.subf %718, %721 : vector<8x16xf32>
    %723 = math.exp %722 : vector<8x16xf32>
    %cst_210 = arith.constant dense<0.000000e+00> : vector<8xf32>
    %724 = vector.multi_reduction <add>, %723, %cst_210 [1] : vector<8x16xf32> to vector<8xf32>
    %725 = vector.shape_cast %724 : vector<8xf32> to vector<8x1xf32>
    %726 = tpu.reciprocal %725 {approx = true} : vector<8x1xf32> -> vector<8x1xf32>
    %727 = vector.broadcast %726 : vector<8x1xf32> to vector<8x16xf32>
    %728 = arith.mulf %723, %727 : vector<8x16xf32>
    %729 = arith.subf %728, %11 : vector<8x16xf32>
    %cst_211 = arith.constant dense<0.000000e+00> : vector<8x128xf32>
    %730 = tpu.matmul %729, %3, %cst_211 {dimension_numbers = #tpu.dot_dimension_numbers<[1], [0], [0], [1], [0, 0, 1, 1], [], []>} : vector<8x16xf32>, vector<16x128xf32>, vector<8x128xf32> -> vector<8x128xf32>
    %cst_212 = arith.constant 2.000000e+01 : f32
    %731 = vector.broadcast %cst_212 : f32 to vector<8x128xf32>
    %732 = arith.mulf %731, %730 : vector<8x128xf32>
    %733 = arith.subf %713, %732 : vector<8x128xf32>
    %734 = arith.mulf %712, %712 : vector<8x128xf32>
    %cst_213 = arith.constant 1.000000e+00 : f32
    %735 = vector.broadcast %cst_213 : f32 to vector<8x128xf32>
    %736 = arith.subf %735, %734 : vector<8x128xf32>
    %737 = arith.mulf %733, %736 : vector<8x128xf32>
    %cst_214 = arith.constant 0.899999976 : f32
    %738 = vector.broadcast %cst_214 : f32 to vector<8x128xf32>
    %739 = arith.mulf %738, %666 : vector<8x128xf32>
    %cst_215 = arith.constant 1.000000e-01 : f32
    %740 = vector.broadcast %cst_215 : f32 to vector<8x128xf32>
    %741 = arith.mulf %740, %737 : vector<8x128xf32>
    %742 = arith.addf %739, %741 : vector<8x128xf32>
    %cst_216 = arith.constant 9.990000e-01 : f32
    %743 = vector.broadcast %cst_216 : f32 to vector<8x128xf32>
    %744 = arith.mulf %743, %672 : vector<8x128xf32>
    %cst_217 = arith.constant 1.000000e-03 : f32
    %745 = vector.broadcast %cst_217 : f32 to vector<8x128xf32>
    %746 = arith.mulf %745, %737 : vector<8x128xf32>
    %747 = arith.mulf %746, %737 : vector<8x128xf32>
    %748 = arith.addf %744, %747 : vector<8x128xf32>
    %749 = arith.index_cast %c9_i32 : i32 to index
    %750 = memref.load %arg1[%749] : memref<10xf32, #tpu.memory_space<smem>>
    %751 = vector.broadcast %750 : f32 to vector<8x128xf32>
    %752 = arith.mulf %751, %742 : vector<8x128xf32>
    %cst_218 = arith.constant 1.000000e-16 : f32
    %753 = vector.broadcast %cst_218 : f32 to vector<8x128xf32>
    %754 = arith.addf %748, %753 : vector<8x128xf32>
    %755 = math.rsqrt %754 : vector<8x128xf32>
    %756 = arith.mulf %752, %755 : vector<8x128xf32>
    %757 = arith.subf %681, %756 : vector<8x128xf32>
    %758 = vector.broadcast %720 : vector<8x1xf32> to vector<8x16xf32>
    %759 = arith.cmpf oeq, %718, %758 : vector<8x16xf32>
    %c16_i32_219 = arith.constant 16 : i32
    %760 = vector.broadcast %c16_i32_219 : i32 to vector<8x16xi32>
    %761 = arith.select %759, %7, %760 : vector<8x16xi1>, vector<8x16xi32>
    %cst_220 = arith.constant dense<2147483647> : vector<8xi32>
    %762 = vector.multi_reduction <minsi>, %761, %cst_220 [1] : vector<8x16xi32> to vector<8xi32>
    %763 = vector.shape_cast %762 : vector<8xi32> to vector<8x1xi32>
    %764 = arith.cmpi ne, %763, %1 : vector<8x1xi32>
    %cst_221 = arith.constant dense<0xFF800000> : vector<8xf32>
    %765 = vector.multi_reduction <maximumf>, %713, %cst_221 [1] : vector<8x128xf32> to vector<8xf32>
    %766 = vector.shape_cast %765 : vector<8xf32> to vector<8x1xf32>
    %767 = tpu.reciprocal %766 {approx = true} : vector<8x1xf32> -> vector<8x1xf32>
    %768 = arith.mulf %13, %767 : vector<8x1xf32>
    %769 = math.log %768 : vector<8x1xf32>
    %770 = vector.broadcast %15 : f32 to vector<8x1xf32>
    %771 = arith.mulf %770, %769 : vector<8x1xf32>
    %772 = arith.cmpf ogt, %701, %716 : vector<8x1xf32>
    %773 = arith.andi %764, %772 : vector<8x1xi1>
    %cst_222 = arith.constant 2.000000e+01 : f32
    %774 = vector.broadcast %cst_222 : f32 to vector<8x1xf32>
    %775 = arith.cmpf ogt, %771, %774 : vector<8x1xf32>
    %776 = arith.andi %773, %775 : vector<8x1xi1>
    %777 = arith.select %776, %716, %701 : vector<8x1xi1>, vector<8x1xf32>
    %cst_223 = arith.constant 1.000000e+00 : f32
    %cst_224 = arith.constant 0.000000e+00 : f32
    %778 = vector.broadcast %cst_223 : f32 to vector<8x1xf32>
    %779 = vector.broadcast %cst_224 : f32 to vector<8x1xf32>
    %780 = arith.select %776, %778, %779 : vector<8x1xi1>, vector<8x1xf32>
    %781 = vector.shape_cast %780 : vector<8x1xf32> to vector<1x8x1xf32>
    %cst_225 = arith.constant dense<0xFF800000> : vector<1xf32>
    %782 = vector.multi_reduction <maximumf>, %781, %cst_225 [1, 2] : vector<1x8x1xf32> to vector<1xf32>
    %783 = vector.shape_cast %782 : vector<1xf32> to vector<1x1x1xf32>
    %784 = vector.extract %783[0, 0, 0] : f32 from vector<1x1x1xf32>
    %cst_226 = arith.constant 0.000000e+00 : f32
    %785 = arith.cmpf ogt, %784, %cst_226 : f32
    %786 = arith.extui %785 : i1 to i32
    %c0_i32_227 = arith.constant 0 : i32
    %787 = arith.cmpi ne, %786, %c0_i32_227 : i32
    scf.if %787 {
      %c0_228 = arith.constant 0 : index
      %c0_229 = arith.constant 0 : index
      %788 = vector.load %arg7[%c0_228, %c0_229] : memref<8x128xf32, #tpu.memory_space<vmem>>, vector<8x128xf32>
      %789 = vector.shape_cast %776 : vector<8x1xi1> to vector<8x1xi1>
      %790 = vector.broadcast %789 : vector<8x1xi1> to vector<8x128xi1>
      %791 = arith.select %790, %712, %788 : vector<8x128xi1>, vector<8x128xf32>
      %c0_230 = arith.constant 0 : index
      %c0_231 = arith.constant 0 : index
      %792 = vector.load %arg7[%c0_230, %c0_231] : memref<8x128xf32, #tpu.memory_space<vmem>>, vector<8x128xf32>
      tpu.vector_store %arg7[%c0_230, %c0_231], %791 {strides = array<i32>} : memref<8x128xf32, #tpu.memory_space<vmem>>, vector<8x128xf32>,
    } else {
    }
    %c10_i32 = arith.constant 10 : i32
    return
  }
  func.func @transform_0(%arg0: i32, %arg1: memref<10xf32, #tpu.memory_space<smem>>) -> (i32, i32) {
    %c0_i32 = arith.constant 0 : i32
    %c0_i32_0 = arith.constant 0 : i32
    return %arg0, %c0_i32 : i32, i32
  }
  func.func @transform_1(%arg0: i32, %arg1: memref<10xf32, #tpu.memory_space<smem>>) -> (i32, i32) {
    %c0_i32 = arith.constant 0 : i32
    %c0_i32_0 = arith.constant 0 : i32
    return %arg0, %c0_i32 : i32, i32
  }
  func.func @transform_2(%arg0: i32, %arg1: memref<10xf32, #tpu.memory_space<smem>>) -> (i32, i32) {
    %c0_i32 = arith.constant 0 : i32
    %c0_i32_0 = arith.constant 0 : i32
    %c0_i32_1 = arith.constant 0 : i32
    return %c0_i32, %c0_i32_0 : i32, i32
  }
  func.func @transform_3(%arg0: i32, %arg1: memref<10xf32, #tpu.memory_space<smem>>) -> (i32, i32) {
    %c0_i32 = arith.constant 0 : i32
    %c0_i32_0 = arith.constant 0 : i32
    %c0_i32_1 = arith.constant 0 : i32
    return %c0_i32, %c0_i32_0 : i32, i32
  }
  func.func @transform_4(%arg0: i32, %arg1: memref<10xf32, #tpu.memory_space<smem>>) -> (i32, i32) {
    %c0_i32 = arith.constant 0 : i32
    %c0_i32_0 = arith.constant 0 : i32
    %c0_i32_1 = arith.constant 0 : i32
    return %c0_i32, %c0_i32_0 : i32, i32
  }
  func.func @transform_5(%arg0: i32, %arg1: memref<10xf32, #tpu.memory_space<smem>>) -> (i32, i32) {
    %c0_i32 = arith.constant 0 : i32
    %c0_i32_0 = arith.constant 0 : i32
    return %arg0, %c0_i32 : i32, i32
  }
}

</mosaic_0001>

<bundles_post_ra>
// kernel: tpu_custom_call.1
= control target key start
LH: loop header
LB: loop body
LE: loop exit
PB: predicated region body
PF: predicated region fallthrough
CT: control target
= control target key end

     0   :  { %s1674_s24 = smov [#allocation3]   ;;  %s2455_s0 = inlined_call_operand.vmem [shape: f32[10], index: 0, kind: input, shape index: {}]   ;;  %s2456_s1 = inlined_call_operand.vmem [shape: f32[8,128], index: 1, kind: input, shape index: {}]   ;;  %s2457_s2 = inlined_call_operand.vmem [shape: s32[8,1], index: 2, kind: input, shape index: {}]   ;;  %s2458_s3 = inlined_call_operand.vmem [shape: f32[128,16], index: 3, kind: input, shape index: {}]   ;;  %s2459_s4 = inlined_call_operand.vmem [shape: f32[16,128], index: 4, kind: input, shape index: {}]   ;;  %s2460_s5 = inlined_call_operand.vmem [shape: f32[1,16], index: 5, kind: input, shape index: {}]   ;;  %s2461_s6 = inlined_call_operand.hbm [shape: f32[8,128], index: 6, kind: output, shape index: {}]  }
   0x1   :  { %s12_s23 = sshll.u32 %s2455_s0, 4  ;;  %s13_s23 = int_to_ptr.vmem [resolvable:$true] %s12_s23 }
   0x2   :  { %15 = dma.vmem_to_smem %s13_s23, 16, %s1674_s24, [#allocation2] }
   0x3   :  { %1670 = dma.done.wait [#allocation2], 16 }
   0x4   :  { %1671 = vsyncadd [#allocation2], 4294967280 }
   0x5   :  { %18 = sfence }
   0x6   :  { %19 = vsyncpa [#allocation5], 0  ;;  %v1729_v0 = vld [vmem:[%s2458_s3 + $0x78] sm:$0xff]  ;;  %v1734_v1 = vld [vmem:[%s2458_s3 + $0x70] sm:$0xff]  ;;  %v1675_v35 = vmov 0   ;;  %vm110_vm4 = vcmask 130048   ;;  %v54_v41 = vlaneseq }
   0x7   :  { %90 = vmatpush.msra.mxu0 %v1729_v0  ;;  %v1740_v2 = vld [vmem:[%s2458_s3 + $0x68] sm:$0xff]  ;;  %v1746_v3 = vld [vmem:[%s2458_s3 + $0x60] sm:$0xff]  ;;  %v1757_v5 = vld [vmem:[%s2458_s3 + $0x58] sm:$0xff]  ;;  %1503 = vset.pattern.permute.xlu1 %v1675_v35  ;;  %v1676_v63 = vmov 0.0   ;;  %vm203_vm12 = vcmask 7168  }
   0x8   :  { %v1752_v4 = vld [vmem:[%s2456_s1] sm:$0xff]  ;;  %v1765_v7 = vld [vmem:[%s2458_s3 + $0x50] sm:$0xff]  ;;  %v1771_v8 = vld [vmem:[%s2458_s3 + $0x48] sm:$0xff]  ;;  %1504 = vset.pattern.permute.xlu0 %v1675_v35  ;;  %v1855_v42 = vand.u32 127, %v54_v41 }
   0x9   :  { %91 = vmatpush.msra.mxu0 %v1734_v1  ;;  %v65_v6 = vsub.f32 1.0, %v1752_v4  ;;  %84 = vst [vmem:[#allocation4] sm:$0xff] %v1752_v4  ;;  %v1777_v9 = vld [vmem:[%s2458_s3 + $0x40] sm:$0xff]  ;;  %v1783_v11 = vld [vmem:[%s2458_s3 + $0x38] sm:$0xff]  ;;  %v1789_v13 = vld [vmem:[%s2458_s3 + $0x30] sm:$0xff]  ;;  %v64_v21 = vadd.f32 1.0, %v1752_v4 }
   0xa   :  { %v1795_v17 = vld [vmem:[%s2458_s3 + $0x28] sm:$0xff]  ;;  %v1801_v19 = vld [vmem:[%s2458_s3 + $0x20] sm:$0xff]  ;;  %v1808_v23 = vld [vmem:[%s2458_s3 + $0x18] sm:$0xff] }
   0xb   :  { %92 = vmatpush.msra.mxu0 %v1740_v2  ;;  %1506 = vrcp.f32 %v65_v6  ;;  %v77_v14 = vand.u32 2147483648, %v65_v6  ;;  %vm71_vm0 = vweird.f32 %v65_v6  ;;  %v75_v16 = vand.u32 2147483647, %v65_v6  ;;  %v1814_v25 = vld [vmem:[%s2458_s3 + $0x10] sm:$0xff]  ;;  %v1820_v28 = vld [vmem:[%s2458_s3 + $0x8] sm:$0xff]  ;;  %v1826_v29 = vld [vmem:[%s2458_s3] sm:$0xff] }
   0xc   :  { %v1839_v34 = vld [vmem:[%s2457_s2] sm:$0xff]  ;;  %v1865_v53 = vld [vmem:[%s2459_s4 + $0x8] sm:$0xff] }
   0xd   :  { %93 = vmatpush.msra.mxu0 %v1746_v3  ;;  %v78_v20 = vor.u32 1.1754944e-38, %v77_v14  ;;  %vm76_vm3 = vcmp.eq.f32.partialorder %v75_v16, 8.507059e+37  ;;  %57 = vperm.xlu1 %1503, %v1839_v34   ;;  %v1845_v36 = vld [vmem:[%s2460_s5] ss:$0 sm:$0xff] }
   0xe   :  { %v1870_v54 = vld [vmem:[%s2459_s4] sm:$0xff]  ;;  %140 = vmatpush.msra.mxu1 %v1865_v53  ;;  %s156_s4 = sld [smem:[#allocation3]] }
   0xf   :  { %94 = vmatpush.msra.mxu0 %v1757_v5 }
  0x10   :  { %141 = vmatpush.msra.mxu1 %v1870_v54 }
  0x11   :  { %95 = vmatpush.msra.mxu0 %v1765_v7  ;;  %v1507_v10 = vpop.eup %1506 }
  0x12   :  { %v67_v12 = vmul.f32 %v1507_v10, %v65_v6  ;;  %vm72_vm1 = vweird.f32 %v1507_v10 }
  0x13   :  { %96 = vmatpush.msra.mxu0 %v1771_v8  ;;  %vm73_vm2 = vmor %vm71_vm0, %vm72_vm1 }
  0x14   :  { %v68_v15 = vsub.f32 1.0, %v67_v12 }
  0x15   :  { %97 = vmatpush.msra.mxu0 %v1777_v9 }
  0x16   :  { %v69_v18 = vmul.f32 %v1507_v10, %v68_v15 }
  0x17   :  { %98 = vmatpush.msra.mxu0 %v1783_v11 }
  0x18   :  { %v70_v22 = vadd.f32 %v1507_v10, %v69_v18 }
  0x19   :  { %99 = vmatpush.msra.mxu0 %v1789_v13 }
  0x1a   :  { %v74_v24 = vsel %vm73_vm2, %v1507_v10, %v70_v22 }
  0x1b   :  { %100 = vmatpush.msra.mxu0 %v1795_v17  ;;  %v79_v26 = vsel %vm76_vm3, %v78_v20, %v74_v24 }
  0x1c   :  { %v80_v27 = vmul.f32 %v79_v26, %v64_v21 }
  0x1d   :  { %101 = vmatpush.msra.mxu0 %v1801_v19 }
  0x1e   :  { %1508 = vlog2.f32 %v80_v27 }
  0x1f   :  { %102 = vmatpush.msra.mxu0 %v1808_v23 }
  0x21   :  { %103 = vmatpush.msra.mxu0 %v1814_v25 }
  0x23   :  { %104 = vmatpush.msra.mxu0 %v1820_v28 }
  0x24   :  { %v1509_v30 = vpop.eup %1508 }
  0x25   :  { %105 = vmatpush.msra.mxu0 %v1826_v29  ;;  %v82_v31 = vmul.f32 0.6931472, %v1509_v30 }
  0x27   :  { %v1830_v32 = vmul.f32 0.5, %v82_v31 }
  0x29   :  { %1510 = vtanh.f32 %v1830_v32 }
  0x2f   :  { %v1833_v33 = vpop.eup %1510 }
  0x30   :  { %106 = vmatmul.f32.vlgmr.msra.gmra.mxu0 %v1833_v33  ;;  %v1851_v40 = vsub.f32 %v1833_v33, %v1752_v4  ;;  %v148_v41 = vmul.f32 %v1833_v33, %v1833_v33 }
  0x32   :  { %190 = vmax.xlane.f32.xlu2 %v1851_v40  ;;  %v87_v52 = vmul.f32 %v1851_v40, %v1851_v40 }
  0x3a   :  { %62 = vmax.xlane.f32.xlu2 %v1752_v4 }
  0x42   :  { %88 = vadd.xlane.f32.xlu2 %v87_v52 }
  0x7f   :  { %v58_v55 = vpop.permute.xlu1 %57 }
  0x80   :  { %vm59_vm7 = vcmp.eq.s32.totalorder %v1855_v42, %v58_v55 }
  0x81   :  { %v1876_v6 = vsel %vm59_vm7, 1.0, %v1676_v63 }
  0xa5   :  { %v191_v12 = vpop.xlane.xlu2 %190 }
  0xad   :  { %v107_v37 = vpop.f32.mrf.mxu0  ;;  %v1880_v15 = vpop.xlane.xlu2 %62 }
  0xae   :  { %v108_v38 = vadd.f32 %v1845_v36, %v107_v37 }
  0xb0   :  { %v111_v39 = vsel %vm110_vm4, %v108_v38, -inf }
  0xb1   :  { %112 = vmax.xlane.f32.xlu0 %v111_v39 }
  0xb5   :  { %v89_v26 = vpop.xlane.xlu2 %88 }
  0xb6   :  { %vm1452_vm8 = vcmp.lt.f32.partialorder %v89_v26, 1e+10 }
 0x124   :  { %v113_v43 = vpop.xlane.xlu0 %112 }
 0x125   :  { %v114_v44 = vsub.f32 %v108_v38, %v113_v43  ;;  %vm172_vm5 = vcmp.eq.f32.partialorder %v108_v38, %v113_v43 }
 0x126   :  { %v173_v45 = vsel %vm172_vm5, %v1855_v42, 16 }
 0x127   :  { %v115_v46 = vmul.f32 1.442695, %v114_v44  ;;  %v174_v47 = vsel %vm110_vm4, %v173_v45, 2147483647  ;;  %v149_v45 = vsub.f32 1.0, %v148_v41 }
 0x128   :  { %v176_v48 = vshra.s32 %v174_v47, 16  ;;  %v175_v56 = vand.u32 65535, %v174_v47 }
 0x129   :  { %1512 = vpow2.f32 %v115_v46 }
 0x12a   :  { %v178_v49 = vcvt.s32.f32 %v176_v48  ;;  %v177_v58 = vcvt.s32.f32 %v175_v56 }
 0x12c   :  { %179 = vmin.xlane.f32.xlu1 %v178_v49 }
 0x12f   :  { %v1513_v50 = vpop.eup %1512 }
 0x130   :  { %v117_v51 = vsel %vm110_vm4, %v1513_v50, 0.0 }
 0x131   :  { %118 = vadd.xlane.f32.xlu0 %v117_v51 }
 0x19f   :  { %v180_v57 = vpop.xlane.xlu1 %179 }
 0x1a0   :  { %vm181_vm6 = vcmp.eq.f32.partialorder %v178_v49, %v180_v57  ;;  %v186_v21 = vcvt.f32.s32 %v180_v57 }
 0x1a1   :  { %v182_v59 = vsel %vm181_vm6, %v177_v58, inf  ;;  %v157_v58 = vstv %s156_s4 }
 0x1a2   :  { %183 = vmin.xlane.f32.xlu0 %v182_v59  ;;  %v187_v27 = vshll.u32 %v186_v21, 16 }
 0x1a4   :  { %v119_v60 = vpop.xlane.xlu0 %118 }
 0x1a5   :  { %1514 = vrcp.f32 %v119_v60 }
 0x1a6   :  { %1516 = vrcp.f32 %v191_v12 }
 0x1ab   :  { %v1515_v61 = vpop.eup %1514 }
 0x1ac   :  { %v121_v62 = vmul.f32 %v1515_v61, %v1513_v50  ;;  %v1517_v14 = vpop.eup %1516 }
 0x1ad   :  { %v193_v16 = vmul.f32 %v1517_v14, %v1880_v15 }
 0x1ae   :  { %v122_v10 = vsub.f32 %v121_v62, %v1876_v6 }
 0x1af   :  { %1518 = vlog2.f32 %v193_v16 }
 0x1b0   :  { %1451 = vmatmul.msk.f32.vlgmr.msra.gmra.mxu1 %vm110_vm4, %v122_v10 }
 0x1b5   :  { %v1519_v18 = vpop.eup %1518 }
 0x1b6   :  { %v195_v20 = vmul.f32 0.6931472, %v1519_v18 }
 0x1b8   :  { %v196_v24 = vmul.f32 8.685889, %v195_v20 }
 0x1ba   :  { %vm199_vm9 = vcmp.gt.f32.partialorder %v196_v24, 20.0 }
 0x215   :  { %v184_v22 = vpop.xlane.xlu0 %183 }
 0x216   :  { %v185_v30 = vcvt.f32.s32 %v184_v22 }
 0x218   :  { %v188_v31 = vadd.s32 %v187_v27, %v185_v30 }
 0x21a   :  { %vm189_vm10 = vcmp.ne.s32.totalorder %v188_v31, %v1839_v34 }
 0x21b   :  { %vm198_vm11 = vmand %vm189_vm10, %vm1452_vm8 }
 0x21c   :  { %vm1884_vm13 = vmand %vm198_vm11, %vm199_vm9 }
 0x21d   :  { %v1890_v37 = vsel %vm1884_vm13, %v89_v26, 1e+10  ;;  %v202_v38 = vsel %vm1884_vm13, 1.0, %v1676_v63 }
 0x21e   :  { %v204_v39 = vsel %vm203_vm12, %v202_v38, -inf }
 0x21f   :  { %205 = vmax.xlane.f32.xlu0 %v204_v39 }
 0x22d   :  { %v143_v43 = vpop.f32.mrf.mxu1 }
 0x22e   :  { %v146_v44 = vmul.f32 20.0, %v143_v43 }
 0x230   :  { %v147_v46 = vsub.f32 %v1851_v40, %v146_v44 }
 0x232   :  { %v150_v47 = vmul.f32 %v149_v45, %v147_v46 }
 0x234   :  { %v153_v48 = vmul.f32 0.001, %v150_v47  ;;  %v1902_v57 = vmul.f32 0.1, %v150_v47 }
 0x236   :  { %v1899_v49 = vmul.f32 %v153_v48, %v150_v47  ;;  %v158_v40 = vmul.f32 %v157_v58, %v1902_v57 }
 0x238   :  { %v159_v50 = vadd.f32 1e-16, %v1899_v49 }
 0x23a   :  { %1520 = vrsqrt.f32 %v159_v50  ;;  %vm166_vm15 = vweird.f32 %v159_v50 }
 0x240   :  { %v1521_v51 = vpop.eup %1520 }
 0x241   :  { %v161_v52 = vmul.f32 %v1521_v51, %v159_v50  ;;  %vm167_vm14 = vweird.f32 %v1521_v51 }
 0x242   :  { %vm168_vm0 = vmor %vm166_vm15, %vm167_vm14 }
 0x243   :  { %v162_v55 = vmul.f32 %v1521_v51, %v161_v52 }
 0x245   :  { %v163_v56 = vmul.f32 0.5, %v162_v55 }
 0x247   :  { %v164_v59 = vsub.f32 1.5, %v163_v56 }
 0x249   :  { %v165_v60 = vmul.f32 %v1521_v51, %v164_v59 }
 0x24b   :  { %v169_v61 = vsel %vm168_vm0, %v1521_v51, %v165_v60 }
 0x24c   :  { %v170_v62 = vmul.f32 %v169_v61, %v158_v40 }
 0x24e   :  { %v1906_v10 = vsub.f32 %v1830_v32, %v170_v62 }
 0x292   :  { %v206_v12 = vpop.xlane.xlu0 %205 }
 0x293   :  { %v207_v14 = vrot.slane %v206_v12, 4 }
 0x295   :  { %v208_v16 = vmax.f32 %v206_v12, %v207_v14 }
 0x297   :  { %v209_v18 = vrot.slane %v208_v16, 2 }
 0x299   :  { %v210_v20 = vmax.f32 %v208_v16, %v209_v18 }
 0x29b   :  { %v211_v21 = vrot.slane %v210_v20, 1 }
 0x29d   :  { %v212_v22 = vmax.f32 %v210_v20, %v211_v21 }
 0x29f   :  { %1469 = vpush %v212_v22 }
 0x2d0   :  { %s1470_s13 = spop %1469 }
 0x2d1   :  { %p214_p0 = scmp.gt.f32.partialorder %s1470_s13, 0.0 }
 0x2d2   :  { %v1677_v24 = vmov (%p214_p0), 0   ;;  %v218_v27 = vld [vmem:[#allocation4] sm:$0xff] (%p214_p0) }
 0x2d3   :  { %217 = sbr.rel (!%p214_p0) target bundleno = 842 (0x34a), region = 25  ;;  %1522 = vset.pattern.permute.xlu0 (%p214_p0), %v1677_v24  ;;  %v219_v26 = vsel (%p214_p0), %vm1884_vm13, 1, %v1677_v24 }
 0x2d4   :  { %221 = vperm.xlu0 (%p214_p0), %1522, %v219_v26  }
 0x346   :  { %v222_v32 = vpop.permute.xlu0 %221 }
 0x347   :  { %vm223_vm1 = vcmp.eq.s32.totalorder %v222_v32, 1 }
 0x348   :  { %v224_v30 = vsel %vm223_vm1, %v1833_v33, %v218_v27 }
 0x349   :  { %225 = vst [vmem:[#allocation4] sm:$0xff] %v224_v30 }
 0x34a PF:  { %231 = vmatpush.msra.mxu2 %v1729_v0  ;;  %1523 = vtanh.f32 %v1906_v10  ;;  %s1454_s1 = sld [smem:[#allocation3 + $0x1]] }
 0x34c   :  { %232 = vmatpush.msra.mxu2 %v1734_v1 }
 0x34e   :  { %233 = vmatpush.msra.mxu2 %v1740_v2 }
 0x350   :  { %234 = vmatpush.msra.mxu2 %v1746_v3  ;;  %v1926_v33 = vpop.eup %1523 }
 0x351   :  { %v227_v51 = vsub.f32 %v1926_v33, %v1752_v4 }
 0x352   :  { %235 = vmatpush.msra.mxu2 %v1757_v5 }
 0x353   :  { %v228_v60 = vmul.f32 %v227_v51, %v227_v51 }
 0x354   :  { %236 = vmatpush.msra.mxu2 %v1765_v7 }
 0x356   :  { %237 = vmatpush.msra.mxu2 %v1771_v8 }
 0x358   :  { %238 = vmatpush.msra.mxu2 %v1777_v9 }
 0x35a   :  { %239 = vmatpush.msra.mxu2 %v1783_v11 }
 0x35c   :  { %240 = vmatpush.msra.mxu2 %v1789_v13 }
 0x35e   :  { %241 = vmatpush.msra.mxu2 %v1795_v17 }
 0x360   :  { %242 = vmatpush.msra.mxu2 %v1801_v19 }
 0x362   :  { %243 = vmatpush.msra.mxu2 %v1808_v23 }
 0x364   :  { %244 = vmatpush.msra.mxu2 %v1814_v25 }
 0x366   :  { %245 = vmatpush.msra.mxu2 %v1820_v28 }
 0x368   :  { %246 = vmatpush.msra.mxu2 %v1826_v29 }
 0x369   :  { %247 = vmatmul.f32.vlgmr.msra.gmra.mxu2 %v1926_v33 }
 0x36a   :  { %280 = vmatpush.msrb.mxu2 %v1865_v53 }
 0x36c   :  { %281 = vmatpush.msrb.mxu2 %v1870_v54 }
 0x3ec   :  { %v248_v31 = vpop.f32.mrf.mxu2 }
 0x3ed   :  { %v249_v35 = vadd.f32 %v1845_v36, %v248_v31 }
 0x3ef   :  { %v251_v38 = vsel %vm110_vm4, %v249_v35, -inf }
 0x3f0   :  { %252 = vmax.xlane.f32.xlu0 %v251_v38 }
 0x463   :  { %v253_v39 = vpop.xlane.xlu0 %252 }
 0x464   :  { %v254_v41 = vsub.f32 %v249_v35, %v253_v39  ;;  %vm314_vm2 = vcmp.eq.f32.partialorder %v249_v35, %v253_v39 }
 0x465   :  { %v315_v43 = vsel %vm314_vm2, %v1855_v42, 16 }
 0x466   :  { %v255_v44 = vmul.f32 1.442695, %v254_v41  ;;  %v316_v45 = vsel %vm110_vm4, %v315_v43, 2147483647  ;;  %v288_v41 = vmul.f32 %v1926_v33, %v1926_v33 }
 0x467   :  { %v318_v46 = vshra.s32 %v316_v45, 16  ;;  %v317_v52 = vand.u32 65535, %v316_v45 }
 0x468   :  { %1525 = vpow2.f32 %v255_v44  ;;  %v289_v45 = vsub.f32 1.0, %v288_v41 }
 0x469   :  { %v320_v47 = vcvt.s32.f32 %v318_v46  ;;  %v319_v56 = vcvt.s32.f32 %v317_v52 }
 0x46b   :  { %321 = vmin.xlane.f32.xlu1 %v320_v47 }
 0x46e   :  { %v1526_v48 = vpop.eup %1525 }
 0x46f   :  { %v257_v50 = vsel %vm110_vm4, %v1526_v48, 0.0 }
 0x470   :  { %258 = vadd.xlane.f32.xlu0 %v257_v50 }
 0x473   :  { %332 = vmax.xlane.f32.xlu1 %v227_v51 }
 0x4de   :  { %v322_v55 = vpop.xlane.xlu1 %321 }
 0x4df   :  { %vm323_vm3 = vcmp.eq.f32.partialorder %v320_v47, %v322_v55  ;;  %v328_v20 = vcvt.f32.s32 %v322_v55 }
 0x4e0   :  { %v324_v58 = vsel %vm323_vm3, %v319_v56, inf }
 0x4e1   :  { %325 = vmin.xlane.f32.xlu2 %v324_v58  ;;  %v329_v26 = vshll.u32 %v328_v20, 16 }
 0x4e3   :  { %v259_v59 = vpop.xlane.xlu0 %258 }
 0x4e4   :  { %1527 = vrcp.f32 %v259_v59  ;;  %v291_v59 = vmul.f32 0.9, %v1902_v57 }
 0x4e6   :  { %v333_v12 = vpop.xlane.xlu1 %332 }
 0x4e7   :  { %1529 = vrcp.f32 %v333_v12 }
 0x4e9   :  { %229 = vadd.xlane.f32.xlu2 %v228_v60 }
 0x4ea   :  { %v1528_v40 = vpop.eup %1527 }
 0x4eb   :  { %v261_v61 = vmul.f32 %v1528_v40, %v1526_v48  ;;  %v294_v48 = vmul.f32 0.999, %v1899_v49 }
 0x4ed   :  { %v262_v62 = vsub.f32 %v261_v61, %v1876_v6  ;;  %v1530_v14 = vpop.eup %1529 }
 0x4ee   :  { %v335_v16 = vmul.f32 %v1530_v14, %v1880_v15 }
 0x4ef   :  { %1453 = vmatmul.msk.f32.vlgmr.msrb.gmra.mxu2 %vm110_vm4, %v262_v62 }
 0x4f0   :  { %1531 = vlog2.f32 %v335_v16 }
 0x4f6   :  { %v1532_v18 = vpop.eup %1531 }
 0x4f7   :  { %v337_v22 = vmul.f32 0.6931472, %v1532_v18 }
 0x4f9   :  { %v338_v27 = vmul.f32 8.685889, %v337_v22 }
 0x4fb   :  { %vm341_vm5 = vcmp.gt.f32.partialorder %v338_v27, 20.0 }
 0x554   :  { %v326_v21 = vpop.xlane.xlu2 %325 }
 0x555   :  { %v327_v24 = vcvt.f32.s32 %v326_v21 }
 0x557   :  { %v330_v32 = vadd.s32 %v329_v26, %v327_v24 }
 0x559   :  { %vm331_vm6 = vcmp.ne.s32.totalorder %v330_v32, %v1839_v34 }
 0x55c   :  { %v230_v30 = vpop.xlane.xlu2 %229 }
 0x55d   :  { %vm339_vm7 = vcmp.gt.f32.partialorder %v1890_v37, %v230_v30 }
 0x55e   :  { %vm340_vm8 = vmand %vm331_vm6, %vm339_vm7 }
 0x55f   :  { %vm1945_vm9 = vmand %vm340_vm8, %vm341_vm5 }
 0x560   :  { %v1952_v35 = vsel %vm1945_vm9, %v230_v30, %v1890_v37  ;;  %v344_v38 = vsel %vm1945_vm9, 1.0, %v1676_v63 }
 0x561   :  { %v345_v39 = vsel %vm203_vm12, %v344_v38, -inf }
 0x562   :  { %346 = vmax.xlane.f32.xlu0 %v345_v39 }
 0x572   :  { %v283_v43 = vpop.f32.mrf.mxu2 }
 0x573   :  { %v286_v44 = vmul.f32 20.0, %v283_v43 }
 0x575   :  { %v287_v46 = vsub.f32 %v227_v51, %v286_v44  ;;  %v299_v51 = vstv %s1454_s1 }
 0x577   :  { %v290_v47 = vmul.f32 %v289_v45, %v287_v46 }
 0x579   :  { %v295_v50 = vmul.f32 0.001, %v290_v47  ;;  %v292_v60 = vmul.f32 0.1, %v290_v47 }
 0x57b   :  { %v296_v37 = vmul.f32 %v295_v50, %v290_v47  ;;  %v1965_v62 = vadd.f32 %v292_v60, %v291_v59 }
 0x57d   :  { %v1961_v52 = vadd.f32 %v296_v37, %v294_v48  ;;  %v300_v14 = vmul.f32 %v299_v51, %v1965_v62 }
 0x57f   :  { %v301_v55 = vadd.f32 1e-16, %v1961_v52 }
 0x581   :  { %1533 = vrsqrt.f32 %v301_v55  ;;  %vm308_vm11 = vweird.f32 %v301_v55 }
 0x587   :  { %v1534_v56 = vpop.eup %1533 }
 0x588   :  { %v303_v58 = vmul.f32 %v1534_v56, %v301_v55  ;;  %vm309_vm10 = vweird.f32 %v1534_v56 }
 0x589   :  { %vm310_vm13 = vmor %vm308_vm11, %vm309_vm10 }
 0x58a   :  { %v304_v40 = vmul.f32 %v1534_v56, %v303_v58 }
 0x58c   :  { %v305_v61 = vmul.f32 0.5, %v304_v40 }
 0x58e   :  { %v306_v12 = vsub.f32 1.5, %v305_v61 }
 0x590   :  { %v307_v49 = vmul.f32 %v1534_v56, %v306_v12 }
 0x592   :  { %v311_v16 = vsel %vm310_vm13, %v1534_v56, %v307_v49 }
 0x593   :  { %v312_v18 = vmul.f32 %v311_v16, %v300_v14 }
 0x595   :  { %v1969_v20 = vsub.f32 %v1906_v10, %v312_v18 }
 0x5d5   :  { %v347_v21 = vpop.xlane.xlu0 %346 }
 0x5d6   :  { %v348_v57 = vrot.slane %v347_v21, 4 }
 0x5d8   :  { %v349_v22 = vmax.f32 %v347_v21, %v348_v57 }
 0x5da   :  { %v350_v24 = vrot.slane %v349_v22, 2 }
 0x5dc   :  { %v351_v26 = vmax.f32 %v349_v22, %v350_v24 }
 0x5de   :  { %v352_v27 = vrot.slane %v351_v26, 1 }
 0x5e0   :  { %v353_v32 = vmax.f32 %v351_v26, %v352_v27 }
 0x5e2   :  { %1471 = vpush %v353_v32 }
 0x613   :  { %s1472_s14 = spop %1471 }
 0x614   :  { %p355_p1 = scmp.gt.f32.partialorder %s1472_s14, 0.0 }
 0x615   :  { %v1678_v30 = vmov (%p355_p1), 0   ;;  %v359_v39 = vld [vmem:[#allocation4] sm:$0xff] (%p355_p1) }
 0x616   :  { %358 = sbr.rel (!%p355_p1) target bundleno = 1677 (0x68d), region = 29  ;;  %1535 = vset.pattern.permute.xlu0 (%p355_p1), %v1678_v30  ;;  %v360_v38 = vsel (%p355_p1), %vm1945_vm9, 1, %v1678_v30 }
 0x617   :  { %362 = vperm.xlu0 (%p355_p1), %1535, %v360_v38  }
 0x689   :  { %v363_v10 = vpop.permute.xlu0 %362 }
 0x68a   :  { %vm364_vm14 = vcmp.eq.s32.totalorder %v363_v10, 1 }
 0x68b   :  { %v365_v41 = vsel %vm364_vm14, %v1926_v33, %v359_v39 }
 0x68c   :  { %366 = vst [vmem:[#allocation4] sm:$0xff] %v365_v41 }
 0x68d PF:  { %372 = vmatpush.msrb.mxu1 %v1729_v0  ;;  %421 = vmatpush.msra.mxu3 %v1865_v53  ;;  %1536 = vtanh.f32 %v1969_v20  ;;  %s1456_s15 = sld [smem:[#allocation3 + $0x2]] }
 0x68f   :  { %373 = vmatpush.msrb.mxu1 %v1734_v1  ;;  %422 = vmatpush.msra.mxu3 %v1870_v54 }
 0x691   :  { %374 = vmatpush.msrb.mxu1 %v1740_v2 }
 0x693   :  { %375 = vmatpush.msrb.mxu1 %v1746_v3  ;;  %v1991_v33 = vpop.eup %1536 }
 0x694   :  { %v368_v59 = vsub.f32 %v1991_v33, %v1752_v4 }
 0x695   :  { %376 = vmatpush.msrb.mxu1 %v1757_v5 }
 0x696   :  { %v369_v49 = vmul.f32 %v368_v59, %v368_v59 }
 0x697   :  { %377 = vmatpush.msrb.mxu1 %v1765_v7 }
 0x699   :  { %378 = vmatpush.msrb.mxu1 %v1771_v8 }
 0x69b   :  { %379 = vmatpush.msrb.mxu1 %v1777_v9 }
 0x69d   :  { %380 = vmatpush.msrb.mxu1 %v1783_v11 }
 0x69f   :  { %381 = vmatpush.msrb.mxu1 %v1789_v13 }
 0x6a1   :  { %382 = vmatpush.msrb.mxu1 %v1795_v17 }
 0x6a3   :  { %383 = vmatpush.msrb.mxu1 %v1801_v19 }
 0x6a5   :  { %384 = vmatpush.msrb.mxu1 %v1808_v23 }
 0x6a7   :  { %385 = vmatpush.msrb.mxu1 %v1814_v25 }
 0x6a9   :  { %386 = vmatpush.msrb.mxu1 %v1820_v28 }
 0x6ab   :  { %387 = vmatpush.msrb.mxu1 %v1826_v29 }
 0x6ac   :  { %388 = vmatmul.f32.vlgmr.msrb.gmra.mxu1 %v1991_v33 }
 0x729   :  { %v389_v31 = vpop.f32.mrf.mxu1 }
 0x72a   :  { %v390_v43 = vadd.f32 %v1845_v36, %v389_v31 }
 0x72c   :  { %v392_v44 = vsel %vm110_vm4, %v390_v43, -inf }
 0x72d   :  { %393 = vmax.xlane.f32.xlu0 %v392_v44 }
 0x7a0   :  { %v394_v45 = vpop.xlane.xlu0 %393 }
 0x7a1   :  { %v395_v46 = vsub.f32 %v390_v43, %v394_v45  ;;  %vm455_vm15 = vcmp.eq.f32.partialorder %v390_v43, %v394_v45 }
 0x7a2   :  { %v456_v47 = vsel %vm455_vm15, %v1855_v42, 16 }
 0x7a3   :  { %v396_v48 = vmul.f32 1.442695, %v395_v46  ;;  %v457_v50 = vsel %vm110_vm4, %v456_v47, 2147483647  ;;  %v429_v46 = vmul.f32 %v1991_v33, %v1991_v33 }
 0x7a4   :  { %v459_v37 = vshra.s32 %v457_v50, 16  ;;  %v458_v60 = vand.u32 65535, %v457_v50 }
 0x7a5   :  { %1538 = vpow2.f32 %v396_v48  ;;  %v430_v50 = vsub.f32 1.0, %v429_v46 }
 0x7a6   :  { %v461_v55 = vcvt.s32.f32 %v459_v37  ;;  %v460_v61 = vcvt.s32.f32 %v458_v60 }
 0x7a8   :  { %462 = vmin.xlane.f32.xlu1 %v461_v55 }
 0x7ab   :  { %v1539_v56 = vpop.eup %1538 }
 0x7ac   :  { %v398_v58 = vsel %vm110_vm4, %v1539_v56, 0.0 }
 0x7ad   :  { %399 = vadd.xlane.f32.xlu0 %v398_v58 }
 0x7b0   :  { %473 = vmax.xlane.f32.xlu1 %v368_v59 }
 0x81b   :  { %v463_v40 = vpop.xlane.xlu1 %462 }
 0x81c   :  { %vm464_vm0 = vcmp.eq.f32.partialorder %v461_v55, %v463_v40  ;;  %v469_v26 = vcvt.f32.s32 %v463_v40 }
 0x81d   :  { %v465_v51 = vsel %vm464_vm0, %v460_v61, inf }
 0x81e   :  { %466 = vmin.xlane.f32.xlu2 %v465_v51  ;;  %v470_v38 = vshll.u32 %v469_v26, 16 }
 0x820   :  { %v400_v12 = vpop.xlane.xlu0 %399 }
 0x821   :  { %1540 = vrcp.f32 %v400_v12  ;;  %v432_v12 = vmul.f32 0.9, %v1965_v62 }
 0x823   :  { %v474_v21 = vpop.xlane.xlu1 %473 }
 0x824   :  { %1542 = vrcp.f32 %v474_v21 }
 0x826   :  { %370 = vadd.xlane.f32.xlu2 %v369_v49 }
 0x827   :  { %v1541_v14 = vpop.eup %1540 }
 0x828   :  { %v402_v16 = vmul.f32 %v1541_v14, %v1539_v56  ;;  %v435_v56 = vmul.f32 0.999, %v1961_v52 }
 0x82a   :  { %v403_v18 = vsub.f32 %v402_v16, %v1876_v6  ;;  %v1543_v57 = vpop.eup %1542 }
 0x82b   :  { %v476_v22 = vmul.f32 %v1543_v57, %v1880_v15 }
 0x82c   :  { %1455 = vmatmul.msk.f32.vlgmr.msra.gmra.mxu3 %vm110_vm4, %v403_v18 }
 0x82d   :  { %1544 = vlog2.f32 %v476_v22 }
 0x833   :  { %v1545_v24 = vpop.eup %1544 }
 0x834   :  { %v478_v32 = vmul.f32 0.6931472, %v1545_v24 }
 0x836   :  { %v479_v39 = vmul.f32 8.685889, %v478_v32 }
 0x838   :  { %vm482_vm1 = vcmp.gt.f32.partialorder %v479_v39, 20.0 }
 0x891   :  { %v467_v27 = vpop.xlane.xlu2 %466 }
 0x892   :  { %v468_v30 = vcvt.f32.s32 %v467_v27 }
 0x894   :  { %v471_v10 = vadd.s32 %v470_v38, %v468_v30 }
 0x896   :  { %vm472_vm2 = vcmp.ne.s32.totalorder %v471_v10, %v1839_v34 }
 0x899   :  { %v371_v41 = vpop.xlane.xlu2 %370 }
 0x89a   :  { %vm480_vm3 = vcmp.gt.f32.partialorder %v1952_v35, %v371_v41 }
 0x89b   :  { %vm481_vm5 = vmand %vm472_vm2, %vm480_vm3 }
 0x89c   :  { %vm2008_vm6 = vmand %vm481_vm5, %vm482_vm1 }
 0x89d   :  { %v2015_v43 = vsel %vm2008_vm6, %v371_v41, %v1952_v35  ;;  %v485_v44 = vsel %vm2008_vm6, 1.0, %v1676_v63 }
 0x89e   :  { %v486_v45 = vsel %vm203_vm12, %v485_v44, -inf }
 0x89f   :  { %487 = vmax.xlane.f32.xlu0 %v486_v45 }
 0x8af   :  { %v424_v47 = vpop.f32.mrf.mxu3 }
 0x8b0   :  { %v427_v48 = vmul.f32 20.0, %v424_v47 }
 0x8b2   :  { %v428_v37 = vsub.f32 %v368_v59, %v427_v48  ;;  %v440_v59 = vstv %s1456_s15 }
 0x8b4   :  { %v431_v55 = vmul.f32 %v430_v50, %v428_v37 }
 0x8b6   :  { %v436_v58 = vmul.f32 0.001, %v431_v55  ;;  %v433_v49 = vmul.f32 0.1, %v431_v55 }
 0x8b8   :  { %v437_v35 = vmul.f32 %v436_v58, %v431_v55  ;;  %v2028_v18 = vadd.f32 %v433_v49, %v432_v12 }
 0x8ba   :  { %v2024_v60 = vadd.f32 %v437_v35, %v435_v56  ;;  %v441_v57 = vmul.f32 %v440_v59, %v2028_v18 }
 0x8bc   :  { %v442_v40 = vadd.f32 1e-16, %v2024_v60 }
 0x8be   :  { %1546 = vrsqrt.f32 %v442_v40  ;;  %vm449_vm8 = vweird.f32 %v442_v40 }
 0x8c4   :  { %v1547_v61 = vpop.eup %1546 }
 0x8c5   :  { %v444_v51 = vmul.f32 %v1547_v61, %v442_v40  ;;  %vm450_vm7 = vweird.f32 %v1547_v61 }
 0x8c6   :  { %vm451_vm9 = vmor %vm449_vm8, %vm450_vm7 }
 0x8c7   :  { %v445_v14 = vmul.f32 %v1547_v61, %v444_v51 }
 0x8c9   :  { %v446_v16 = vmul.f32 0.5, %v445_v14 }
 0x8cb   :  { %v447_v21 = vsub.f32 1.5, %v446_v16 }
 0x8cd   :  { %v448_v52 = vmul.f32 %v1547_v61, %v447_v21 }
 0x8cf   :  { %v452_v22 = vsel %vm451_vm9, %v1547_v61, %v448_v52 }
 0x8d0   :  { %v453_v24 = vmul.f32 %v452_v22, %v441_v57 }
 0x8d2   :  { %v2032_v26 = vsub.f32 %v1969_v20, %v453_v24 }
 0x912   :  { %v488_v27 = vpop.xlane.xlu0 %487 }
 0x913   :  { %v489_v62 = vrot.slane %v488_v27, 4 }
 0x915   :  { %v490_v32 = vmax.f32 %v488_v27, %v489_v62 }
 0x917   :  { %v491_v30 = vrot.slane %v490_v32, 2 }
 0x919   :  { %v492_v38 = vmax.f32 %v490_v32, %v491_v30 }
 0x91b   :  { %v493_v39 = vrot.slane %v492_v38, 1 }
 0x91d   :  { %v494_v10 = vmax.f32 %v492_v38, %v493_v39 }
 0x91f   :  { %1473 = vpush %v494_v10 }
 0x950   :  { %s1474_s16 = spop %1473 }
 0x951   :  { %p496_p2 = scmp.gt.f32.partialorder %s1474_s16, 0.0 }
 0x952   :  { %v1679_v41 = vmov (%p496_p2), 0   ;;  %v500_v45 = vld [vmem:[#allocation4] sm:$0xff] (%p496_p2) }
 0x953   :  { %499 = sbr.rel (!%p496_p2) target bundleno = 2506 (0x9ca), region = 33  ;;  %1548 = vset.pattern.permute.xlu0 (%p496_p2), %v1679_v41  ;;  %v501_v44 = vsel (%p496_p2), %vm2008_vm6, 1, %v1679_v41 }
 0x954   :  { %503 = vperm.xlu0 (%p496_p2), %1548, %v501_v44  }
 0x9c6   :  { %v504_v20 = vpop.permute.xlu0 %503 }
 0x9c7   :  { %vm505_vm10 = vcmp.eq.s32.totalorder %v504_v20, 1 }
 0x9c8   :  { %v506_v46 = vsel %vm505_vm10, %v1991_v33, %v500_v45 }
 0x9c9   :  { %507 = vst [vmem:[#allocation4] sm:$0xff] %v506_v46 }
 0x9ca PF:  { %513 = vmatpush.msrb.mxu3 %v1729_v0  ;;  %562 = vmatpush.msra.mxu2 %v1865_v53  ;;  %1549 = vtanh.f32 %v2032_v26  ;;  %s1458_s17 = sld [smem:[#allocation3 + $0x3]] }
 0x9cc   :  { %514 = vmatpush.msrb.mxu3 %v1734_v1  ;;  %563 = vmatpush.msra.mxu2 %v1870_v54 }
 0x9ce   :  { %515 = vmatpush.msrb.mxu3 %v1740_v2 }
 0x9d0   :  { %516 = vmatpush.msrb.mxu3 %v1746_v3  ;;  %v2054_v33 = vpop.eup %1549 }
 0x9d1   :  { %v509_v12 = vsub.f32 %v2054_v33, %v1752_v4 }
 0x9d2   :  { %517 = vmatpush.msrb.mxu3 %v1757_v5 }
 0x9d3   :  { %v510_v52 = vmul.f32 %v509_v12, %v509_v12 }
 0x9d4   :  { %518 = vmatpush.msrb.mxu3 %v1765_v7 }
 0x9d6   :  { %519 = vmatpush.msrb.mxu3 %v1771_v8 }
 0x9d8   :  { %520 = vmatpush.msrb.mxu3 %v1777_v9 }
 0x9da   :  { %521 = vmatpush.msrb.mxu3 %v1783_v11 }
 0x9dc   :  { %522 = vmatpush.msrb.mxu3 %v1789_v13 }
 0x9de   :  { %523 = vmatpush.msrb.mxu3 %v1795_v17 }
 0x9e0   :  { %524 = vmatpush.msrb.mxu3 %v1801_v19 }
 0x9e2   :  { %525 = vmatpush.msrb.mxu3 %v1808_v23 }
 0x9e4   :  { %526 = vmatpush.msrb.mxu3 %v1814_v25 }
 0x9e6   :  { %527 = vmatpush.msrb.mxu3 %v1820_v28 }
 0x9e8   :  { %528 = vmatpush.msrb.mxu3 %v1826_v29 }
 0x9e9   :  { %529 = vmatmul.f32.vlgmr.msrb.gmra.mxu3 %v2054_v33 }
 0xa6c   :  { %v530_v31 = vpop.f32.mrf.mxu3 }
 0xa6d   :  { %v531_v47 = vadd.f32 %v1845_v36, %v530_v31 }
 0xa6f   :  { %v533_v48 = vsel %vm110_vm4, %v531_v47, -inf }
 0xa70   :  { %534 = vmax.xlane.f32.xlu0 %v533_v48 }
 0xae3   :  { %v535_v50 = vpop.xlane.xlu0 %534 }
 0xae4   :  { %v536_v37 = vsub.f32 %v531_v47, %v535_v50  ;;  %vm596_vm11 = vcmp.eq.f32.partialorder %v531_v47, %v535_v50 }
 0xae5   :  { %v597_v55 = vsel %vm596_vm11, %v1855_v42, 16 }
 0xae6   :  { %v537_v56 = vmul.f32 1.442695, %v536_v37  ;;  %v598_v58 = vsel %vm110_vm4, %v597_v55, 2147483647  ;;  %v570_v37 = vmul.f32 %v2054_v33, %v2054_v33 }
 0xae7   :  { %v600_v35 = vshra.s32 %v598_v58, 16  ;;  %v599_v49 = vand.u32 65535, %v598_v58 }
 0xae8   :  { %1551 = vpow2.f32 %v537_v56  ;;  %v571_v58 = vsub.f32 1.0, %v570_v37 }
 0xae9   :  { %v602_v40 = vcvt.s32.f32 %v600_v35  ;;  %v601_v16 = vcvt.s32.f32 %v599_v49 }
 0xaeb   :  { %603 = vmin.xlane.f32.xlu1 %v602_v40 }
 0xaee   :  { %v1552_v61 = vpop.eup %1551 }
 0xaef   :  { %v539_v51 = vsel %vm110_vm4, %v1552_v61, 0.0 }
 0xaf0   :  { %540 = vadd.xlane.f32.xlu0 %v539_v51 }
 0xaf3   :  { %614 = vmax.xlane.f32.xlu1 %v509_v12 }
 0xb5e   :  { %v604_v14 = vpop.xlane.xlu1 %603 }
 0xb5f   :  { %vm605_vm13 = vcmp.eq.f32.partialorder %v602_v40, %v604_v14  ;;  %v610_v38 = vcvt.f32.s32 %v604_v14 }
 0xb60   :  { %v606_v59 = vsel %vm605_vm13, %v601_v16, inf }
 0xb61   :  { %607 = vmin.xlane.f32.xlu2 %v606_v59  ;;  %v611_v44 = vshll.u32 %v610_v38, 16 }
 0xb63   :  { %v541_v21 = vpop.xlane.xlu0 %540 }
 0xb64   :  { %1553 = vrcp.f32 %v541_v21  ;;  %v573_v21 = vmul.f32 0.9, %v2028_v18 }
 0xb66   :  { %v615_v27 = vpop.xlane.xlu1 %614 }
 0xb67   :  { %1555 = vrcp.f32 %v615_v27 }
 0xb69   :  { %511 = vadd.xlane.f32.xlu2 %v510_v52 }
 0xb6a   :  { %v1554_v57 = vpop.eup %1553 }
 0xb6b   :  { %v543_v22 = vmul.f32 %v1554_v57, %v1552_v61  ;;  %v576_v61 = vmul.f32 0.999, %v2024_v60 }
 0xb6d   :  { %v544_v24 = vsub.f32 %v543_v22, %v1876_v6  ;;  %v1556_v62 = vpop.eup %1555 }
 0xb6e   :  { %v617_v32 = vmul.f32 %v1556_v62, %v1880_v15 }
 0xb6f   :  { %1457 = vmatmul.msk.f32.vlgmr.msra.gmra.mxu2 %vm110_vm4, %v544_v24 }
 0xb70   :  { %1557 = vlog2.f32 %v617_v32 }
 0xb76   :  { %v1558_v30 = vpop.eup %1557 }
 0xb77   :  { %v619_v10 = vmul.f32 0.6931472, %v1558_v30 }
 0xb79   :  { %v620_v45 = vmul.f32 8.685889, %v619_v10 }
 0xb7b   :  { %vm623_vm14 = vcmp.gt.f32.partialorder %v620_v45, 20.0 }
 0xbd4   :  { %v608_v39 = vpop.xlane.xlu2 %607 }
 0xbd5   :  { %v609_v41 = vcvt.f32.s32 %v608_v39 }
 0xbd7   :  { %v612_v20 = vadd.s32 %v611_v44, %v609_v41 }
 0xbd9   :  { %vm613_vm15 = vcmp.ne.s32.totalorder %v612_v20, %v1839_v34 }
 0xbdc   :  { %v512_v46 = vpop.xlane.xlu2 %511 }
 0xbdd   :  { %vm621_vm0 = vcmp.gt.f32.partialorder %v2015_v43, %v512_v46 }
 0xbde   :  { %vm622_vm1 = vmand %vm613_vm15, %vm621_vm0 }
 0xbdf   :  { %vm2071_vm2 = vmand %vm622_vm1, %vm623_vm14 }
 0xbe0   :  { %v2078_v47 = vsel %vm2071_vm2, %v512_v46, %v2015_v43  ;;  %v626_v48 = vsel %vm2071_vm2, 1.0, %v1676_v63 }
 0xbe1   :  { %v627_v50 = vsel %vm203_vm12, %v626_v48, -inf }
 0xbe2   :  { %628 = vmax.xlane.f32.xlu0 %v627_v50 }
 0xbf2   :  { %v565_v55 = vpop.f32.mrf.mxu2 }
 0xbf3   :  { %v568_v56 = vmul.f32 20.0, %v565_v55 }
 0xbf5   :  { %v569_v35 = vsub.f32 %v509_v12, %v568_v56  ;;  %v581_v12 = vstv %s1458_s17 }
 0xbf7   :  { %v572_v40 = vmul.f32 %v571_v58, %v569_v35 }
 0xbf9   :  { %v577_v51 = vmul.f32 0.001, %v572_v40  ;;  %v574_v52 = vmul.f32 0.1, %v572_v40 }
 0xbfb   :  { %v578_v43 = vmul.f32 %v577_v51, %v572_v40  ;;  %v2091_v24 = vadd.f32 %v574_v52, %v573_v21 }
 0xbfd   :  { %v2087_v49 = vadd.f32 %v578_v43, %v576_v61  ;;  %v582_v62 = vmul.f32 %v581_v12, %v2091_v24 }
 0xbff   :  { %v583_v14 = vadd.f32 1e-16, %v2087_v49 }
 0xc01   :  { %1559 = vrsqrt.f32 %v583_v14  ;;  %vm590_vm5 = vweird.f32 %v583_v14 }
 0xc07   :  { %v1560_v16 = vpop.eup %1559 }
 0xc08   :  { %v585_v59 = vmul.f32 %v1560_v16, %v583_v14  ;;  %vm591_vm3 = vweird.f32 %v1560_v16 }
 0xc09   :  { %vm592_vm6 = vmor %vm590_vm5, %vm591_vm3 }
 0xc0a   :  { %v586_v57 = vmul.f32 %v1560_v16, %v585_v59 }
 0xc0c   :  { %v587_v22 = vmul.f32 0.5, %v586_v57 }
 0xc0e   :  { %v588_v27 = vsub.f32 1.5, %v587_v22 }
 0xc10   :  { %v589_v60 = vmul.f32 %v1560_v16, %v588_v27 }
 0xc12   :  { %v593_v32 = vsel %vm592_vm6, %v1560_v16, %v589_v60 }
 0xc13   :  { %v594_v30 = vmul.f32 %v593_v32, %v582_v62 }
 0xc15   :  { %v2095_v38 = vsub.f32 %v2032_v26, %v594_v30 }
 0xc55   :  { %v629_v39 = vpop.xlane.xlu0 %628 }
 0xc56   :  { %v630_v18 = vrot.slane %v629_v39, 4 }
 0xc58   :  { %v631_v10 = vmax.f32 %v629_v39, %v630_v18 }
 0xc5a   :  { %v632_v41 = vrot.slane %v631_v10, 2 }
 0xc5c   :  { %v633_v44 = vmax.f32 %v631_v10, %v632_v41 }
 0xc5e   :  { %v634_v45 = vrot.slane %v633_v44, 1 }
 0xc60   :  { %v635_v20 = vmax.f32 %v633_v44, %v634_v45 }
 0xc62   :  { %1475 = vpush %v635_v20 }
 0xc93   :  { %s1476_s18 = spop %1475 }
 0xc94   :  { %p637_p3 = scmp.gt.f32.partialorder %s1476_s18, 0.0 }
 0xc95   :  { %v1680_v46 = vmov (%p637_p3), 0   ;;  %v641_v50 = vld [vmem:[#allocation4] sm:$0xff] (%p637_p3) }
 0xc96   :  { %640 = sbr.rel (!%p637_p3) target bundleno = 3341 (0xd0d), region = 37  ;;  %1561 = vset.pattern.permute.xlu0 (%p637_p3), %v1680_v46  ;;  %v642_v48 = vsel (%p637_p3), %vm2071_vm2, 1, %v1680_v46 }
 0xc97   :  { %644 = vperm.xlu0 (%p637_p3), %1561, %v642_v48  }
 0xd09   :  { %v645_v26 = vpop.permute.xlu0 %644 }
 0xd0a   :  { %vm646_vm7 = vcmp.eq.s32.totalorder %v645_v26, 1 }
 0xd0b   :  { %v647_v37 = vsel %vm646_vm7, %v2054_v33, %v641_v50 }
 0xd0c   :  { %648 = vst [vmem:[#allocation4] sm:$0xff] %v647_v37 }
 0xd0d PF:  { %654 = vmatpush.msrb.mxu2 %v1729_v0  ;;  %703 = vmatpush.msra.mxu1 %v1865_v53  ;;  %1562 = vtanh.f32 %v2095_v38  ;;  %s1460_s19 = sld [smem:[#allocation3 + $0x4]] }
 0xd0f   :  { %655 = vmatpush.msrb.mxu2 %v1734_v1  ;;  %704 = vmatpush.msra.mxu1 %v1870_v54 }
 0xd11   :  { %656 = vmatpush.msrb.mxu2 %v1740_v2 }
 0xd13   :  { %657 = vmatpush.msrb.mxu2 %v1746_v3  ;;  %v2117_v33 = vpop.eup %1562 }
 0xd14   :  { %v650_v21 = vsub.f32 %v2117_v33, %v1752_v4 }
 0xd15   :  { %658 = vmatpush.msrb.mxu2 %v1757_v5 }
 0xd16   :  { %v651_v60 = vmul.f32 %v650_v21, %v650_v21 }
 0xd17   :  { %659 = vmatpush.msrb.mxu2 %v1765_v7 }
 0xd19   :  { %660 = vmatpush.msrb.mxu2 %v1771_v8 }
 0xd1b   :  { %661 = vmatpush.msrb.mxu2 %v1777_v9 }
 0xd1d   :  { %662 = vmatpush.msrb.mxu2 %v1783_v11 }
 0xd1f   :  { %663 = vmatpush.msrb.mxu2 %v1789_v13 }
 0xd21   :  { %664 = vmatpush.msrb.mxu2 %v1795_v17 }
 0xd23   :  { %665 = vmatpush.msrb.mxu2 %v1801_v19 }
 0xd25   :  { %666 = vmatpush.msrb.mxu2 %v1808_v23 }
 0xd27   :  { %667 = vmatpush.msrb.mxu2 %v1814_v25 }
 0xd29   :  { %668 = vmatpush.msrb.mxu2 %v1820_v28 }
 0xd2b   :  { %669 = vmatpush.msrb.mxu2 %v1826_v29 }
 0xd2c   :  { %670 = vmatmul.f32.vlgmr.msrb.gmra.mxu2 %v2117_v33 }
 0xdaf   :  { %v671_v31 = vpop.f32.mrf.mxu2 }
 0xdb0   :  { %v672_v55 = vadd.f32 %v1845_v36, %v671_v31 }
 0xdb2   :  { %v674_v56 = vsel %vm110_vm4, %v672_v55, -inf }
 0xdb3   :  { %675 = vmax.xlane.f32.xlu0 %v674_v56 }
 0xe26   :  { %v676_v58 = vpop.xlane.xlu0 %675 }
 0xe27   :  { %v677_v35 = vsub.f32 %v672_v55, %v676_v58  ;;  %vm737_vm8 = vcmp.eq.f32.partialorder %v672_v55, %v676_v58 }
 0xe28   :  { %v738_v40 = vsel %vm737_vm8, %v1855_v42, 16 }
 0xe29   :  { %v678_v61 = vmul.f32 1.442695, %v677_v35  ;;  %v739_v51 = vsel %vm110_vm4, %v738_v40, 2147483647  ;;  %v711_v35 = vmul.f32 %v2117_v33, %v2117_v33 }
 0xe2a   :  { %v741_v43 = vshra.s32 %v739_v51, 16  ;;  %v740_v52 = vand.u32 65535, %v739_v51 }
 0xe2b   :  { %1564 = vpow2.f32 %v678_v61  ;;  %v712_v51 = vsub.f32 1.0, %v711_v35 }
 0xe2c   :  { %v743_v14 = vcvt.s32.f32 %v741_v43  ;;  %v742_v22 = vcvt.s32.f32 %v740_v52 }
 0xe2e   :  { %744 = vmin.xlane.f32.xlu1 %v743_v14 }
 0xe31   :  { %v1565_v16 = vpop.eup %1564 }
 0xe32   :  { %v680_v59 = vsel %vm110_vm4, %v1565_v16, 0.0 }
 0xe33   :  { %681 = vadd.xlane.f32.xlu0 %v680_v59 }
 0xe36   :  { %755 = vmax.xlane.f32.xlu1 %v650_v21 }
 0xea1   :  { %v745_v57 = vpop.xlane.xlu1 %744 }
 0xea2   :  { %vm746_vm9 = vcmp.eq.f32.partialorder %v743_v14, %v745_v57  ;;  %v751_v44 = vcvt.f32.s32 %v745_v57 }
 0xea3   :  { %v747_v12 = vsel %vm746_vm9, %v742_v22, inf }
 0xea4   :  { %748 = vmin.xlane.f32.xlu2 %v747_v12  ;;  %v752_v48 = vshll.u32 %v751_v44, 16 }
 0xea6   :  { %v682_v27 = vpop.xlane.xlu0 %681 }
 0xea7   :  { %1566 = vrcp.f32 %v682_v27  ;;  %v714_v27 = vmul.f32 0.9, %v2091_v24 }
 0xea9   :  { %v756_v39 = vpop.xlane.xlu1 %755 }
 0xeaa   :  { %1568 = vrcp.f32 %v756_v39 }
 0xeac   :  { %652 = vadd.xlane.f32.xlu2 %v651_v60 }
 0xead   :  { %v1567_v62 = vpop.eup %1566 }
 0xeae   :  { %v684_v32 = vmul.f32 %v1567_v62, %v1565_v16  ;;  %v717_v16 = vmul.f32 0.999, %v2087_v49 }
 0xeb0   :  { %v685_v30 = vsub.f32 %v684_v32, %v1876_v6  ;;  %v1569_v18 = vpop.eup %1568 }
 0xeb1   :  { %v758_v10 = vmul.f32 %v1569_v18, %v1880_v15 }
 0xeb2   :  { %1459 = vmatmul.msk.f32.vlgmr.msra.gmra.mxu1 %vm110_vm4, %v685_v30 }
 0xeb3   :  { %1570 = vlog2.f32 %v758_v10 }
 0xeb9   :  { %v1571_v41 = vpop.eup %1570 }
 0xeba   :  { %v760_v20 = vmul.f32 0.6931472, %v1571_v41 }
 0xebc   :  { %v761_v50 = vmul.f32 8.685889, %v760_v20 }
 0xebe   :  { %vm764_vm10 = vcmp.gt.f32.partialorder %v761_v50, 20.0 }
 0xf17   :  { %v749_v45 = vpop.xlane.xlu2 %748 }
 0xf18   :  { %v750_v46 = vcvt.f32.s32 %v749_v45 }
 0xf1a   :  { %v753_v26 = vadd.s32 %v752_v48, %v750_v46 }
 0xf1c   :  { %vm754_vm11 = vcmp.ne.s32.totalorder %v753_v26, %v1839_v34 }
 0xf1f   :  { %v653_v37 = vpop.xlane.xlu2 %652 }
 0xf20   :  { %vm762_vm13 = vcmp.gt.f32.partialorder %v2078_v47, %v653_v37 }
 0xf21   :  { %vm763_vm14 = vmand %vm754_vm11, %vm762_vm13 }
 0xf22   :  { %vm2134_vm15 = vmand %vm763_vm14, %vm764_vm10 }
 0xf23   :  { %v2141_v55 = vsel %vm2134_vm15, %v653_v37, %v2078_v47  ;;  %v767_v56 = vsel %vm2134_vm15, 1.0, %v1676_v63 }
 0xf24   :  { %v768_v58 = vsel %vm203_vm12, %v767_v56, -inf }
 0xf25   :  { %769 = vmax.xlane.f32.xlu0 %v768_v58 }
 0xf2f   :  { %v706_v40 = vpop.f32.mrf.mxu1 }
 0xf30   :  { %v709_v61 = vmul.f32 20.0, %v706_v40 }
 0xf32   :  { %v710_v43 = vsub.f32 %v650_v21, %v709_v61  ;;  %v722_v21 = vstv %s1460_s19 }
 0xf34   :  { %v713_v14 = vmul.f32 %v712_v51, %v710_v43 }
 0xf36   :  { %v718_v59 = vmul.f32 0.001, %v713_v14  ;;  %v715_v60 = vmul.f32 0.1, %v713_v14 }
 0xf38   :  { %v719_v47 = vmul.f32 %v718_v59, %v713_v14  ;;  %v2154_v30 = vadd.f32 %v715_v60, %v714_v27 }
 0xf3a   :  { %v2150_v52 = vadd.f32 %v719_v47, %v717_v16  ;;  %v723_v18 = vmul.f32 %v722_v21, %v2154_v30 }
 0xf3c   :  { %v724_v57 = vadd.f32 1e-16, %v2150_v52 }
 0xf3e   :  { %1572 = vrsqrt.f32 %v724_v57  ;;  %vm731_vm1 = vweird.f32 %v724_v57 }
 0xf44   :  { %v1573_v22 = vpop.eup %1572 }
 0xf45   :  { %v726_v12 = vmul.f32 %v1573_v22, %v724_v57  ;;  %vm732_vm0 = vweird.f32 %v1573_v22 }
 0xf46   :  { %vm733_vm2 = vmor %vm731_vm1, %vm732_vm0 }
 0xf47   :  { %v727_v62 = vmul.f32 %v1573_v22, %v726_v12 }
 0xf49   :  { %v728_v32 = vmul.f32 0.5, %v727_v62 }
 0xf4b   :  { %v729_v39 = vsub.f32 1.5, %v728_v32 }
 0xf4d   :  { %v730_v49 = vmul.f32 %v1573_v22, %v729_v39 }
 0xf4f   :  { %v734_v10 = vsel %vm733_vm2, %v1573_v22, %v730_v49 }
 0xf50   :  { %v735_v41 = vmul.f32 %v734_v10, %v723_v18 }
 0xf52   :  { %v2158_v44 = vsub.f32 %v2095_v38, %v735_v41 }
 0xf98   :  { %v770_v45 = vpop.xlane.xlu0 %769 }
 0xf99   :  { %v771_v24 = vrot.slane %v770_v45, 4 }
 0xf9b   :  { %v772_v20 = vmax.f32 %v770_v45, %v771_v24 }
 0xf9d   :  { %v773_v46 = vrot.slane %v772_v20, 2 }
 0xf9f   :  { %v774_v48 = vmax.f32 %v772_v20, %v773_v46 }
 0xfa1   :  { %v775_v50 = vrot.slane %v774_v48, 1 }
 0xfa3   :  { %v776_v26 = vmax.f32 %v774_v48, %v775_v50 }
 0xfa5   :  { %1477 = vpush %v776_v26 }
 0xfd6   :  { %s1478_s20 = spop %1477 }
 0xfd7   :  { %p778_p4 = scmp.gt.f32.partialorder %s1478_s20, 0.0 }
 0xfd8   :  { %v1681_v37 = vmov (%p778_p4), 0   ;;  %v782_v58 = vld [vmem:[#allocation4] sm:$0xff] (%p778_p4) }
 0xfd9   :  { %781 = sbr.rel (!%p778_p4) target bundleno = 4176 (0x1050), region = 41  ;;  %1574 = vset.pattern.permute.xlu0 (%p778_p4), %v1681_v37  ;;  %v783_v56 = vsel (%p778_p4), %vm2134_vm15, 1, %v1681_v37 }
 0xfda   :  { %785 = vperm.xlu0 (%p778_p4), %1574, %v783_v56  }
0x104c   :  { %v786_v38 = vpop.permute.xlu0 %785 }
0x104d   :  { %vm787_vm3 = vcmp.eq.s32.totalorder %v786_v38, 1 }
0x104e   :  { %v788_v35 = vsel %vm787_vm3, %v2117_v33, %v782_v58 }
0x104f   :  { %789 = vst [vmem:[#allocation4] sm:$0xff] %v788_v35 }
0x1050 PF:  { %795 = vmatpush.msrb.mxu0 %v1729_v0  ;;  %844 = vmatpush.msrb.mxu1 %v1865_v53  ;;  %1575 = vtanh.f32 %v2158_v44  ;;  %s1462_s21 = sld [smem:[#allocation3 + $0x5]] }
0x1052   :  { %796 = vmatpush.msrb.mxu0 %v1734_v1  ;;  %845 = vmatpush.msrb.mxu1 %v1870_v54 }
0x1054   :  { %797 = vmatpush.msrb.mxu0 %v1740_v2 }
0x1056   :  { %798 = vmatpush.msrb.mxu0 %v1746_v3  ;;  %v2180_v33 = vpop.eup %1575 }
0x1057   :  { %v791_v27 = vsub.f32 %v2180_v33, %v1752_v4 }
0x1058   :  { %799 = vmatpush.msrb.mxu0 %v1757_v5 }
0x1059   :  { %v792_v49 = vmul.f32 %v791_v27, %v791_v27 }
0x105a   :  { %800 = vmatpush.msrb.mxu0 %v1765_v7 }
0x105c   :  { %801 = vmatpush.msrb.mxu0 %v1771_v8 }
0x105e   :  { %802 = vmatpush.msrb.mxu0 %v1777_v9 }
0x1060   :  { %803 = vmatpush.msrb.mxu0 %v1783_v11 }
0x1062   :  { %804 = vmatpush.msrb.mxu0 %v1789_v13 }
0x1064   :  { %805 = vmatpush.msrb.mxu0 %v1795_v17 }
0x1066   :  { %806 = vmatpush.msrb.mxu0 %v1801_v19 }
0x1068   :  { %807 = vmatpush.msrb.mxu0 %v1808_v23 }
0x106a   :  { %808 = vmatpush.msrb.mxu0 %v1814_v25 }
0x106c   :  { %809 = vmatpush.msrb.mxu0 %v1820_v28 }
0x106e   :  { %810 = vmatpush.msrb.mxu0 %v1826_v29 }
0x106f   :  { %811 = vmatmul.f32.vlgmr.msrb.gmra.mxu0 %v2180_v33 }
0x10ec   :  { %v812_v31 = vpop.f32.mrf.mxu0 }
0x10ed   :  { %v813_v40 = vadd.f32 %v1845_v36, %v812_v31 }
0x10ef   :  { %v815_v61 = vsel %vm110_vm4, %v813_v40, -inf }
0x10f0   :  { %816 = vmax.xlane.f32.xlu0 %v815_v61 }
0x1163   :  { %v817_v51 = vpop.xlane.xlu0 %816 }
0x1164   :  { %v818_v43 = vsub.f32 %v813_v40, %v817_v51  ;;  %vm878_vm5 = vcmp.eq.f32.partialorder %v813_v40, %v817_v51 }
0x1165   :  { %v879_v14 = vsel %vm878_vm5, %v1855_v42, 16 }
0x1166   :  { %v819_v16 = vmul.f32 1.442695, %v818_v43  ;;  %v880_v59 = vsel %vm110_vm4, %v879_v14, 2147483647  ;;  %v852_v43 = vmul.f32 %v2180_v33, %v2180_v33 }
0x1167   :  { %v882_v47 = vshra.s32 %v880_v59, 16  ;;  %v881_v60 = vand.u32 65535, %v880_v59 }
0x1168   :  { %1577 = vpow2.f32 %v819_v16  ;;  %v853_v59 = vsub.f32 1.0, %v852_v43 }
0x1169   :  { %v884_v57 = vcvt.s32.f32 %v882_v47  ;;  %v883_v32 = vcvt.s32.f32 %v881_v60 }
0x116b   :  { %885 = vmin.xlane.f32.xlu1 %v884_v57 }
0x116e   :  { %v1578_v22 = vpop.eup %1577 }
0x116f   :  { %v821_v12 = vsel %vm110_vm4, %v1578_v22, 0.0 }
0x1170   :  { %822 = vadd.xlane.f32.xlu0 %v821_v12 }
0x1173   :  { %896 = vmax.xlane.f32.xlu1 %v791_v27 }
0x11de   :  { %v886_v62 = vpop.xlane.xlu1 %885 }
0x11df   :  { %vm887_vm6 = vcmp.eq.f32.partialorder %v884_v57, %v886_v62  ;;  %v892_v48 = vcvt.f32.s32 %v886_v62 }
0x11e0   :  { %v888_v21 = vsel %vm887_vm6, %v883_v32, inf }
0x11e1   :  { %889 = vmin.xlane.f32.xlu2 %v888_v21  ;;  %v893_v56 = vshll.u32 %v892_v48, 16 }
0x11e3   :  { %v823_v39 = vpop.xlane.xlu0 %822 }
0x11e4   :  { %1579 = vrcp.f32 %v823_v39  ;;  %v855_v39 = vmul.f32 0.9, %v2154_v30 }
0x11e6   :  { %v897_v45 = vpop.xlane.xlu1 %896 }
0x11e7   :  { %1581 = vrcp.f32 %v897_v45 }
0x11e9   :  { %793 = vadd.xlane.f32.xlu2 %v792_v49 }
0x11ea   :  { %v1580_v18 = vpop.eup %1579 }
0x11eb   :  { %v825_v10 = vmul.f32 %v1580_v18, %v1578_v22  ;;  %v858_v22 = vmul.f32 0.999, %v2150_v52 }
0x11ed   :  { %v826_v41 = vsub.f32 %v825_v10, %v1876_v6  ;;  %v1582_v24 = vpop.eup %1581 }
0x11ee   :  { %v899_v20 = vmul.f32 %v1582_v24, %v1880_v15 }
0x11ef   :  { %1461 = vmatmul.msk.f32.vlgmr.msrb.gmra.mxu1 %vm110_vm4, %v826_v41 }
0x11f0   :  { %1583 = vlog2.f32 %v899_v20 }
0x11f6   :  { %v1584_v46 = vpop.eup %1583 }
0x11f7   :  { %v901_v26 = vmul.f32 0.6931472, %v1584_v46 }
0x11f9   :  { %v902_v58 = vmul.f32 8.685889, %v901_v26 }
0x11fb   :  { %vm905_vm7 = vcmp.gt.f32.partialorder %v902_v58, 20.0 }
0x1254   :  { %v890_v50 = vpop.xlane.xlu2 %889 }
0x1255   :  { %v891_v37 = vcvt.f32.s32 %v890_v50 }
0x1257   :  { %v894_v38 = vadd.s32 %v893_v56, %v891_v37 }
0x1259   :  { %vm895_vm8 = vcmp.ne.s32.totalorder %v894_v38, %v1839_v34 }
0x125c   :  { %v794_v35 = vpop.xlane.xlu2 %793 }
0x125d   :  { %vm903_vm9 = vcmp.gt.f32.partialorder %v2141_v55, %v794_v35 }
0x125e   :  { %vm904_vm10 = vmand %vm895_vm8, %vm903_vm9 }
0x125f   :  { %vm2197_vm11 = vmand %vm904_vm10, %vm905_vm7 }
0x1260   :  { %v2204_v40 = vsel %vm2197_vm11, %v794_v35, %v2141_v55  ;;  %v908_v61 = vsel %vm2197_vm11, 1.0, %v1676_v63 }
0x1261   :  { %v909_v51 = vsel %vm203_vm12, %v908_v61, -inf }
0x1262   :  { %910 = vmax.xlane.f32.xlu0 %v909_v51 }
0x126c   :  { %v847_v14 = vpop.f32.mrf.mxu1 }
0x126d   :  { %v850_v16 = vmul.f32 20.0, %v847_v14 }
0x126f   :  { %v851_v47 = vsub.f32 %v791_v27, %v850_v16  ;;  %v863_v27 = vstv %s1462_s21 }
0x1271   :  { %v854_v57 = vmul.f32 %v853_v59, %v851_v47 }
0x1273   :  { %v859_v12 = vmul.f32 0.001, %v854_v57  ;;  %v856_v49 = vmul.f32 0.1, %v854_v57 }
0x1275   :  { %v860_v55 = vmul.f32 %v859_v12, %v854_v57  ;;  %v2217_v41 = vadd.f32 %v856_v49, %v855_v39 }
0x1277   :  { %v2213_v60 = vadd.f32 %v860_v55, %v858_v22  ;;  %v864_v24 = vmul.f32 %v863_v27, %v2217_v41 }
0x1279   :  { %v865_v62 = vadd.f32 1e-16, %v2213_v60 }
0x127b   :  { %1585 = vrsqrt.f32 %v865_v62  ;;  %vm872_vm14 = vweird.f32 %v865_v62 }
0x1281   :  { %v1586_v32 = vpop.eup %1585 }
0x1282   :  { %v867_v21 = vmul.f32 %v1586_v32, %v865_v62  ;;  %vm873_vm13 = vweird.f32 %v1586_v32 }
0x1283   :  { %vm874_vm15 = vmor %vm872_vm14, %vm873_vm13 }
0x1284   :  { %v868_v18 = vmul.f32 %v1586_v32, %v867_v21 }
0x1286   :  { %v869_v10 = vmul.f32 0.5, %v868_v18 }
0x1288   :  { %v870_v45 = vsub.f32 1.5, %v869_v10 }
0x128a   :  { %v871_v52 = vmul.f32 %v1586_v32, %v870_v45 }
0x128c   :  { %v875_v20 = vsel %vm874_vm15, %v1586_v32, %v871_v52 }
0x128d   :  { %v876_v46 = vmul.f32 %v875_v20, %v864_v24 }
0x128f   :  { %v2221_v48 = vsub.f32 %v2158_v44, %v876_v46 }
0x12d5   :  { %v911_v50 = vpop.xlane.xlu0 %910 }
0x12d6   :  { %v912_v30 = vrot.slane %v911_v50, 4 }
0x12d8   :  { %v913_v26 = vmax.f32 %v911_v50, %v912_v30 }
0x12da   :  { %v914_v37 = vrot.slane %v913_v26, 2 }
0x12dc   :  { %v915_v56 = vmax.f32 %v913_v26, %v914_v37 }
0x12de   :  { %v916_v58 = vrot.slane %v915_v56, 1 }
0x12e0   :  { %v917_v38 = vmax.f32 %v915_v56, %v916_v58 }
0x12e2   :  { %1479 = vpush %v917_v38 }
0x1313   :  { %s1480_s22 = spop %1479 }
0x1314   :  { %p919_p5 = scmp.gt.f32.partialorder %s1480_s22, 0.0 }
0x1315   :  { %v1682_v35 = vmov (%p919_p5), 0   ;;  %v923_v51 = vld [vmem:[#allocation4] sm:$0xff] (%p919_p5) }
0x1316   :  { %922 = sbr.rel (!%p919_p5) target bundleno = 5005 (0x138d), region = 45  ;;  %1587 = vset.pattern.permute.xlu0 (%p919_p5), %v1682_v35  ;;  %v924_v61 = vsel (%p919_p5), %vm2197_vm11, 1, %v1682_v35 }
0x1317   :  { %926 = vperm.xlu0 (%p919_p5), %1587, %v924_v61  }
0x1389   :  { %v927_v44 = vpop.permute.xlu0 %926 }
0x138a   :  { %vm928_vm0 = vcmp.eq.s32.totalorder %v927_v44, 1 }
0x138b   :  { %v929_v43 = vsel %vm928_vm0, %v2180_v33, %v923_v51 }
0x138c   :  { %930 = vst [vmem:[#allocation4] sm:$0xff] %v929_v43 }
0x138d PF:  { %936 = vmatpush.msra.mxu3 %v1729_v0  ;;  %985 = vmatpush.msra.mxu1 %v1865_v53  ;;  %1588 = vtanh.f32 %v2221_v48  ;;  %s1464_s23 = sld [smem:[#allocation3 + $0x6]] }
0x138f   :  { %937 = vmatpush.msra.mxu3 %v1734_v1  ;;  %986 = vmatpush.msra.mxu1 %v1870_v54 }
0x1391   :  { %938 = vmatpush.msra.mxu3 %v1740_v2 }
0x1393   :  { %939 = vmatpush.msra.mxu3 %v1746_v3  ;;  %v2243_v33 = vpop.eup %1588 }
0x1394   :  { %v932_v39 = vsub.f32 %v2243_v33, %v1752_v4 }
0x1395   :  { %940 = vmatpush.msra.mxu3 %v1757_v5 }
0x1396   :  { %v933_v52 = vmul.f32 %v932_v39, %v932_v39 }
0x1397   :  { %941 = vmatpush.msra.mxu3 %v1765_v7 }
0x1399   :  { %942 = vmatpush.msra.mxu3 %v1771_v8 }
0x139b   :  { %943 = vmatpush.msra.mxu3 %v1777_v9 }
0x139d   :  { %944 = vmatpush.msra.mxu3 %v1783_v11 }
0x139f   :  { %945 = vmatpush.msra.mxu3 %v1789_v13 }
0x13a1   :  { %946 = vmatpush.msra.mxu3 %v1795_v17 }
0x13a3   :  { %947 = vmatpush.msra.mxu3 %v1801_v19 }
0x13a5   :  { %948 = vmatpush.msra.mxu3 %v1808_v23 }
0x13a7   :  { %949 = vmatpush.msra.mxu3 %v1814_v25 }
0x13a9   :  { %950 = vmatpush.msra.mxu3 %v1820_v28 }
0x13ab   :  { %951 = vmatpush.msra.mxu3 %v1826_v29 }
0x13ac   :  { %952 = vmatmul.f32.vlgmr.msra.gmra.mxu3 %v2243_v33 }
0x142f   :  { %v953_v31 = vpop.f32.mrf.mxu3 }
0x1430   :  { %v954_v14 = vadd.f32 %v1845_v36, %v953_v31 }
0x1432   :  { %v956_v16 = vsel %vm110_vm4, %v954_v14, -inf }
0x1433   :  { %957 = vmax.xlane.f32.xlu0 %v956_v16 }
0x14a6   :  { %v958_v59 = vpop.xlane.xlu0 %957 }
0x14a7   :  { %v959_v47 = vsub.f32 %v954_v14, %v958_v59  ;;  %vm1019_vm1 = vcmp.eq.f32.partialorder %v954_v14, %v958_v59 }
0x14a8   :  { %v1020_v57 = vsel %vm1019_vm1, %v1855_v42, 16 }
0x14a9   :  { %v960_v22 = vmul.f32 1.442695, %v959_v47  ;;  %v1021_v12 = vsel %vm110_vm4, %v1020_v57, 2147483647  ;;  %v993_v47 = vmul.f32 %v2243_v33, %v2243_v33 }
0x14aa   :  { %v1023_v55 = vshra.s32 %v1021_v12, 16  ;;  %v1022_v49 = vand.u32 65535, %v1021_v12 }
0x14ab   :  { %1590 = vpow2.f32 %v960_v22  ;;  %v994_v12 = vsub.f32 1.0, %v993_v47 }
0x14ac   :  { %v1025_v62 = vcvt.s32.f32 %v1023_v55  ;;  %v1024_v10 = vcvt.s32.f32 %v1022_v49 }
0x14ae   :  { %1026 = vmin.xlane.f32.xlu1 %v1025_v62 }
0x14b1   :  { %v1591_v32 = vpop.eup %1590 }
0x14b2   :  { %v962_v21 = vsel %vm110_vm4, %v1591_v32, 0.0 }
0x14b3   :  { %963 = vadd.xlane.f32.xlu0 %v962_v21 }
0x14b6   :  { %1037 = vmax.xlane.f32.xlu1 %v932_v39 }
0x1521   :  { %v1027_v18 = vpop.xlane.xlu1 %1026 }
0x1522   :  { %vm1028_vm2 = vcmp.eq.f32.partialorder %v1025_v62, %v1027_v18  ;;  %v1033_v56 = vcvt.f32.s32 %v1027_v18 }
0x1523   :  { %v1029_v27 = vsel %vm1028_vm2, %v1024_v10, inf }
0x1524   :  { %1030 = vmin.xlane.f32.xlu2 %v1029_v27  ;;  %v1034_v61 = vshll.u32 %v1033_v56, 16 }
0x1526   :  { %v964_v45 = vpop.xlane.xlu0 %963 }
0x1527   :  { %1592 = vrcp.f32 %v964_v45  ;;  %v996_v45 = vmul.f32 0.9, %v2217_v41 }
0x1529   :  { %v1038_v50 = vpop.xlane.xlu1 %1037 }
0x152a   :  { %1594 = vrcp.f32 %v1038_v50 }
0x152c   :  { %934 = vadd.xlane.f32.xlu2 %v933_v52 }
0x152d   :  { %v1593_v24 = vpop.eup %1592 }
0x152e   :  { %v966_v20 = vmul.f32 %v1593_v24, %v1591_v32  ;;  %v999_v32 = vmul.f32 0.999, %v2213_v60 }
0x1530   :  { %v967_v46 = vsub.f32 %v966_v20, %v1876_v6  ;;  %v1595_v30 = vpop.eup %1594 }
0x1531   :  { %v1040_v26 = vmul.f32 %v1595_v30, %v1880_v15 }
0x1532   :  { %1463 = vmatmul.msk.f32.vlgmr.msra.gmra.mxu1 %vm110_vm4, %v967_v46 }
0x1533   :  { %1596 = vlog2.f32 %v1040_v26 }
0x1539   :  { %v1597_v37 = vpop.eup %1596 }
0x153a   :  { %v1042_v38 = vmul.f32 0.6931472, %v1597_v37 }
0x153c   :  { %v1043_v51 = vmul.f32 8.685889, %v1042_v38 }
0x153e   :  { %vm1046_vm3 = vcmp.gt.f32.partialorder %v1043_v51, 20.0 }
0x1597   :  { %v1031_v58 = vpop.xlane.xlu2 %1030 }
0x1598   :  { %v1032_v35 = vcvt.f32.s32 %v1031_v58 }
0x159a   :  { %v1035_v44 = vadd.s32 %v1034_v61, %v1032_v35 }
0x159c   :  { %vm1036_vm5 = vcmp.ne.s32.totalorder %v1035_v44, %v1839_v34 }
0x159f   :  { %v935_v43 = vpop.xlane.xlu2 %934 }
0x15a0   :  { %vm1044_vm6 = vcmp.gt.f32.partialorder %v2204_v40, %v935_v43 }
0x15a1   :  { %vm1045_vm7 = vmand %vm1036_vm5, %vm1044_vm6 }
0x15a2   :  { %vm2260_vm8 = vmand %vm1045_vm7, %vm1046_vm3 }
0x15a3   :  { %v2267_v14 = vsel %vm2260_vm8, %v935_v43, %v2204_v40  ;;  %v1049_v16 = vsel %vm2260_vm8, 1.0, %v1676_v63 }
0x15a4   :  { %v1050_v59 = vsel %vm203_vm12, %v1049_v16, -inf }
0x15a5   :  { %1051 = vmax.xlane.f32.xlu0 %v1050_v59 }
0x15af   :  { %v988_v57 = vpop.f32.mrf.mxu1 }
0x15b0   :  { %v991_v22 = vmul.f32 20.0, %v988_v57 }
0x15b2   :  { %v992_v55 = vsub.f32 %v932_v39, %v991_v22  ;;  %v1004_v39 = vstv %s1464_s23 }
0x15b4   :  { %v995_v62 = vmul.f32 %v994_v12, %v992_v55 }
0x15b6   :  { %v1000_v21 = vmul.f32 0.001, %v995_v62  ;;  %v997_v52 = vmul.f32 0.1, %v995_v62 }
0x15b8   :  { %v1001_v40 = vmul.f32 %v1000_v21, %v995_v62  ;;  %v2280_v46 = vadd.f32 %v997_v52, %v996_v45 }
0x15ba   :  { %v2276_v49 = vadd.f32 %v1001_v40, %v999_v32  ;;  %v1005_v30 = vmul.f32 %v1004_v39, %v2280_v46 }
0x15bc   :  { %v1006_v18 = vadd.f32 1e-16, %v2276_v49 }
0x15be   :  { %1598 = vrsqrt.f32 %v1006_v18  ;;  %vm1013_vm10 = vweird.f32 %v1006_v18 }
0x15c4   :  { %v1599_v10 = vpop.eup %1598 }
0x15c5   :  { %v1008_v27 = vmul.f32 %v1599_v10, %v1006_v18  ;;  %vm1014_vm9 = vweird.f32 %v1599_v10 }
0x15c6   :  { %vm1015_vm11 = vmor %vm1013_vm10, %vm1014_vm9 }
0x15c7   :  { %v1009_v24 = vmul.f32 %v1599_v10, %v1008_v27 }
0x15c9   :  { %v1010_v20 = vmul.f32 0.5, %v1009_v24 }
0x15cb   :  { %v1011_v50 = vsub.f32 1.5, %v1010_v20 }
0x15cd   :  { %v1012_v60 = vmul.f32 %v1599_v10, %v1011_v50 }
0x15cf   :  { %v1016_v26 = vsel %vm1015_vm11, %v1599_v10, %v1012_v60 }
0x15d0   :  { %v1017_v37 = vmul.f32 %v1016_v26, %v1005_v30 }
0x15d2   :  { %v2284_v56 = vsub.f32 %v2221_v48, %v1017_v37 }
0x1618   :  { %v1052_v58 = vpop.xlane.xlu0 %1051 }
0x1619   :  { %v1053_v41 = vrot.slane %v1052_v58, 4 }
0x161b   :  { %v1054_v38 = vmax.f32 %v1052_v58, %v1053_v41 }
0x161d   :  { %v1055_v35 = vrot.slane %v1054_v38, 2 }
0x161f   :  { %v1056_v61 = vmax.f32 %v1054_v38, %v1055_v35 }
0x1621   :  { %v1057_v51 = vrot.slane %v1056_v61, 1 }
0x1623   :  { %v1058_v44 = vmax.f32 %v1056_v61, %v1057_v51 }
0x1625   :  { %1481 = vpush %v1058_v44 }
0x1656   :  { %s1482_s24 = spop %1481 }
0x1657   :  { %p1060_p6 = scmp.gt.f32.partialorder %s1482_s24, 0.0 }
0x1658   :  { %v1683_v43 = vmov (%p1060_p6), 0   ;;  %v1064_v59 = vld [vmem:[#allocation4] sm:$0xff] (%p1060_p6) }
0x1659   :  { %1063 = sbr.rel (!%p1060_p6) target bundleno = 5840 (0x16d0), region = 49  ;;  %1600 = vset.pattern.permute.xlu0 (%p1060_p6), %v1683_v43  ;;  %v1065_v16 = vsel (%p1060_p6), %vm2260_vm8, 1, %v1683_v43 }
0x165a   :  { %1067 = vperm.xlu0 (%p1060_p6), %1600, %v1065_v16  }
0x16cc   :  { %v1068_v48 = vpop.permute.xlu0 %1067 }
0x16cd   :  { %vm1069_vm13 = vcmp.eq.s32.totalorder %v1068_v48, 1 }
0x16ce   :  { %v1070_v47 = vsel %vm1069_vm13, %v2243_v33, %v1064_v59 }
0x16cf   :  { %1071 = vst [vmem:[#allocation4] sm:$0xff] %v1070_v47 }
0x16d0 PF:  { %1077 = vmatpush.msrb.mxu1 %v1729_v0  ;;  %1126 = vmatpush.msra.mxu2 %v1865_v53  ;;  %1601 = vtanh.f32 %v2284_v56  ;;  %s1466_s25 = sld [smem:[#allocation3 + $0x7]] }
0x16d2   :  { %1078 = vmatpush.msrb.mxu1 %v1734_v1  ;;  %1127 = vmatpush.msra.mxu2 %v1870_v54 }
0x16d4   :  { %1079 = vmatpush.msrb.mxu1 %v1740_v2 }
0x16d6   :  { %1080 = vmatpush.msrb.mxu1 %v1746_v3  ;;  %v2306_v33 = vpop.eup %1601 }
0x16d7   :  { %v1073_v45 = vsub.f32 %v2306_v33, %v1752_v4 }
0x16d8   :  { %1081 = vmatpush.msrb.mxu1 %v1757_v5 }
0x16d9   :  { %v1074_v60 = vmul.f32 %v1073_v45, %v1073_v45 }
0x16da   :  { %1082 = vmatpush.msrb.mxu1 %v1765_v7 }
0x16dc   :  { %1083 = vmatpush.msrb.mxu1 %v1771_v8 }
0x16de   :  { %1084 = vmatpush.msrb.mxu1 %v1777_v9 }
0x16e0   :  { %1085 = vmatpush.msrb.mxu1 %v1783_v11 }
0x16e2   :  { %1086 = vmatpush.msrb.mxu1 %v1789_v13 }
0x16e4   :  { %1087 = vmatpush.msrb.mxu1 %v1795_v17 }
0x16e6   :  { %1088 = vmatpush.msrb.mxu1 %v1801_v19 }
0x16e8   :  { %1089 = vmatpush.msrb.mxu1 %v1808_v23 }
0x16ea   :  { %1090 = vmatpush.msrb.mxu1 %v1814_v25 }
0x16ec   :  { %1091 = vmatpush.msrb.mxu1 %v1820_v28 }
0x16ee   :  { %1092 = vmatpush.msrb.mxu1 %v1826_v29 }
0x16ef   :  { %1093 = vmatmul.f32.vlgmr.msrb.gmra.mxu1 %v2306_v33 }
0x176c   :  { %v1094_v31 = vpop.f32.mrf.mxu1 }
0x176d   :  { %v1095_v57 = vadd.f32 %v1845_v36, %v1094_v31 }
0x176f   :  { %v1097_v22 = vsel %vm110_vm4, %v1095_v57, -inf }
0x1770   :  { %1098 = vmax.xlane.f32.xlu0 %v1097_v22 }
0x17e3   :  { %v1099_v12 = vpop.xlane.xlu0 %1098 }
0x17e4   :  { %v1100_v55 = vsub.f32 %v1095_v57, %v1099_v12  ;;  %vm1160_vm14 = vcmp.eq.f32.partialorder %v1095_v57, %v1099_v12 }
0x17e5   :  { %v1161_v62 = vsel %vm1160_vm14, %v1855_v42, 16 }
0x17e6   :  { %v1101_v32 = vmul.f32 1.442695, %v1100_v55  ;;  %v1162_v21 = vsel %vm110_vm4, %v1161_v62, 2147483647  ;;  %v1134_v55 = vmul.f32 %v2306_v33, %v2306_v33 }
0x17e7   :  { %v1164_v40 = vshra.s32 %v1162_v21, 16  ;;  %v1163_v52 = vand.u32 65535, %v1162_v21 }
0x17e8   :  { %1603 = vpow2.f32 %v1101_v32  ;;  %v1135_v21 = vsub.f32 1.0, %v1134_v55 }
0x17e9   :  { %v1166_v18 = vcvt.s32.f32 %v1164_v40  ;;  %v1165_v20 = vcvt.s32.f32 %v1163_v52 }
0x17eb   :  { %1167 = vmin.xlane.f32.xlu1 %v1166_v18 }
0x17ee   :  { %v1604_v10 = vpop.eup %1603 }
0x17ef   :  { %v1103_v27 = vsel %vm110_vm4, %v1604_v10, 0.0 }
0x17f0   :  { %1104 = vadd.xlane.f32.xlu0 %v1103_v27 }
0x17f3   :  { %1178 = vmax.xlane.f32.xlu1 %v1073_v45 }
0x185e   :  { %v1168_v24 = vpop.xlane.xlu1 %1167 }
0x185f   :  { %vm1169_vm15 = vcmp.eq.f32.partialorder %v1166_v18, %v1168_v24  ;;  %v1174_v61 = vcvt.f32.s32 %v1168_v24 }
0x1860   :  { %v1170_v39 = vsel %vm1169_vm15, %v1165_v20, inf }
0x1861   :  { %1171 = vmin.xlane.f32.xlu2 %v1170_v39  ;;  %v1175_v16 = vshll.u32 %v1174_v61, 16 }
0x1863   :  { %v1105_v50 = vpop.xlane.xlu0 %1104 }
0x1864   :  { %1605 = vrcp.f32 %v1105_v50  ;;  %v1137_v50 = vmul.f32 0.9, %v2280_v46 }
0x1866   :  { %v1179_v58 = vpop.xlane.xlu1 %1178 }
0x1867   :  { %1607 = vrcp.f32 %v1179_v58 }
0x1869   :  { %1075 = vadd.xlane.f32.xlu2 %v1074_v60 }
0x186a   :  { %v1606_v30 = vpop.eup %1605 }
0x186b   :  { %v1107_v26 = vmul.f32 %v1606_v30, %v1604_v10  ;;  %v1140_v10 = vmul.f32 0.999, %v2276_v49 }
0x186d   :  { %v1108_v37 = vsub.f32 %v1107_v26, %v1876_v6  ;;  %v1608_v41 = vpop.eup %1607 }
0x186e   :  { %v1181_v38 = vmul.f32 %v1608_v41, %v1880_v15 }
0x186f   :  { %1465 = vmatmul.msk.f32.vlgmr.msra.gmra.mxu2 %vm110_vm4, %v1108_v37 }
0x1870   :  { %1609 = vlog2.f32 %v1181_v38 }
0x1876   :  { %v1610_v35 = vpop.eup %1609 }
0x1877   :  { %v1183_v44 = vmul.f32 0.6931472, %v1610_v35 }
0x1879   :  { %v1184_v59 = vmul.f32 8.685889, %v1183_v44 }
0x187b   :  { %vm1187_vm0 = vcmp.gt.f32.partialorder %v1184_v59, 20.0 }
0x18d4   :  { %v1172_v51 = vpop.xlane.xlu2 %1171 }
0x18d5   :  { %v1173_v43 = vcvt.f32.s32 %v1172_v51 }
0x18d7   :  { %v1176_v48 = vadd.s32 %v1175_v16, %v1173_v43 }
0x18d9   :  { %vm1177_vm1 = vcmp.ne.s32.totalorder %v1176_v48, %v1839_v34 }
0x18dc   :  { %v1076_v47 = vpop.xlane.xlu2 %1075 }
0x18dd   :  { %vm1185_vm2 = vcmp.gt.f32.partialorder %v2267_v14, %v1076_v47 }
0x18de   :  { %vm1186_vm3 = vmand %vm1177_vm1, %vm1185_vm2 }
0x18df   :  { %vm2323_vm5 = vmand %vm1186_vm3, %vm1187_vm0 }
0x18e0   :  { %v2330_v57 = vsel %vm2323_vm5, %v1076_v47, %v2267_v14  ;;  %v1190_v22 = vsel %vm2323_vm5, 1.0, %v1676_v63 }
0x18e1   :  { %v1191_v12 = vsel %vm203_vm12, %v1190_v22, -inf }
0x18e2   :  { %1192 = vmax.xlane.f32.xlu0 %v1191_v12 }
0x18f2   :  { %v1129_v62 = vpop.f32.mrf.mxu2 }
0x18f3   :  { %v1132_v32 = vmul.f32 20.0, %v1129_v62 }
0x18f5   :  { %v1133_v40 = vsub.f32 %v1073_v45, %v1132_v32  ;;  %v1145_v45 = vstv %s1466_s25 }
0x18f7   :  { %v1136_v18 = vmul.f32 %v1135_v21, %v1133_v40 }
0x18f9   :  { %v1141_v27 = vmul.f32 0.001, %v1136_v18  ;;  %v1138_v60 = vmul.f32 0.1, %v1136_v18 }
0x18fb   :  { %v1142_v14 = vmul.f32 %v1141_v27, %v1136_v18  ;;  %v2343_v37 = vadd.f32 %v1138_v60, %v1137_v50 }
0x18fd   :  { %v2339_v52 = vadd.f32 %v1142_v14, %v1140_v10  ;;  %v1146_v41 = vmul.f32 %v1145_v45, %v2343_v37 }
0x18ff   :  { %v1147_v24 = vadd.f32 1e-16, %v2339_v52 }
0x1901   :  { %1611 = vrsqrt.f32 %v1147_v24  ;;  %vm1154_vm7 = vweird.f32 %v1147_v24 }
0x1907   :  { %v1612_v20 = vpop.eup %1611 }
0x1908   :  { %v1149_v39 = vmul.f32 %v1612_v20, %v1147_v24  ;;  %vm1155_vm6 = vweird.f32 %v1612_v20 }
0x1909   :  { %vm1156_vm8 = vmor %vm1154_vm7, %vm1155_vm6 }
0x190a   :  { %v1150_v30 = vmul.f32 %v1612_v20, %v1149_v39 }
0x190c   :  { %v1151_v26 = vmul.f32 0.5, %v1150_v30 }
0x190e   :  { %v1152_v58 = vsub.f32 1.5, %v1151_v26 }
0x1910   :  { %v1153_v49 = vmul.f32 %v1612_v20, %v1152_v58 }
0x1912   :  { %v1157_v38 = vsel %vm1156_vm8, %v1612_v20, %v1153_v49 }
0x1913   :  { %v1158_v35 = vmul.f32 %v1157_v38, %v1146_v41 }
0x1915   :  { %v2347_v61 = vsub.f32 %v2284_v56, %v1158_v35 }
0x1955   :  { %v1193_v51 = vpop.xlane.xlu0 %1192 }
0x1956   :  { %v1194_v46 = vrot.slane %v1193_v51, 4 }
0x1958   :  { %v1195_v44 = vmax.f32 %v1193_v51, %v1194_v46 }
0x195a   :  { %v1196_v43 = vrot.slane %v1195_v44, 2 }
0x195c   :  { %v1197_v16 = vmax.f32 %v1195_v44, %v1196_v43 }
0x195e   :  { %v1198_v59 = vrot.slane %v1197_v16, 1 }
0x1960   :  { %v1199_v48 = vmax.f32 %v1197_v16, %v1198_v59 }
0x1962   :  { %1483 = vpush %v1199_v48 }
0x1993   :  { %s1484_s26 = spop %1483 }
0x1994   :  { %p1201_p7 = scmp.gt.f32.partialorder %s1484_s26, 0.0 }
0x1995   :  { %v1684_v47 = vmov (%p1201_p7), 0   ;;  %v1205_v12 = vld [vmem:[#allocation4] sm:$0xff] (%p1201_p7) }
0x1996   :  { %1204 = sbr.rel (!%p1201_p7) target bundleno = 6669 (0x1a0d), region = 53  ;;  %1613 = vset.pattern.permute.xlu0 (%p1201_p7), %v1684_v47  ;;  %v1206_v22 = vsel (%p1201_p7), %vm2323_vm5, 1, %v1684_v47 }
0x1997   :  { %1208 = vperm.xlu0 (%p1201_p7), %1613, %v1206_v22  }
0x1a09   :  { %v1209_v56 = vpop.permute.xlu0 %1208 }
0x1a0a   :  { %vm1210_vm9 = vcmp.eq.s32.totalorder %v1209_v56, 1 }
0x1a0b   :  { %v1211_v55 = vsel %vm1210_vm9, %v2306_v33, %v1205_v12 }
0x1a0c   :  { %1212 = vst [vmem:[#allocation4] sm:$0xff] %v1211_v55 }
0x1a0d PF:  { %1218 = vmatpush.msra.mxu0 %v1729_v0  ;;  %1267 = vmatpush.msrb.mxu2 %v1865_v53  ;;  %1614 = vtanh.f32 %v2347_v61  ;;  %s1468_s27 = sld [smem:[#allocation3 + $0x8]] }
0x1a0f   :  { %1219 = vmatpush.msra.mxu0 %v1734_v1  ;;  %1268 = vmatpush.msrb.mxu2 %v1870_v54 }
0x1a11   :  { %1220 = vmatpush.msra.mxu0 %v1740_v2 }
0x1a13   :  { %1221 = vmatpush.msra.mxu0 %v1746_v3  ;;  %v2369_v53 = vpop.eup %1614 }
0x1a14   :  { %v1214_v20 = vsub.f32 %v2369_v53, %v1752_v4 }
0x1a15   :  { %1222 = vmatpush.msra.mxu0 %v1757_v5 }
0x1a16   :  { %v1215_v45 = vmul.f32 %v1214_v20, %v1214_v20 }
0x1a17   :  { %1223 = vmatpush.msra.mxu0 %v1765_v7 }
0x1a19   :  { %1224 = vmatpush.msra.mxu0 %v1771_v8 }
0x1a1b   :  { %1225 = vmatpush.msra.mxu0 %v1777_v9 }
0x1a1d   :  { %1226 = vmatpush.msra.mxu0 %v1783_v11 }
0x1a1f   :  { %1227 = vmatpush.msra.mxu0 %v1789_v13 }
0x1a21   :  { %1228 = vmatpush.msra.mxu0 %v1795_v17 }
0x1a23   :  { %1229 = vmatpush.msra.mxu0 %v1801_v19 }
0x1a25   :  { %1230 = vmatpush.msra.mxu0 %v1808_v23 }
0x1a27   :  { %1231 = vmatpush.msra.mxu0 %v1814_v25 }
0x1a29   :  { %1232 = vmatpush.msra.mxu0 %v1820_v28 }
0x1a2b   :  { %1233 = vmatpush.msra.mxu0 %v1826_v29 }
0x1a2c   :  { %1234 = vmatmul.f32.vlgmr.msra.gmra.mxu0 %v2369_v53 }
0x1aa9   :  { %v1235_v54 = vpop.f32.mrf.mxu0 }
0x1aaa   :  { %v1236_v33 = vadd.f32 %v1845_v36, %v1235_v54 }
0x1aac   :  { %v1238_v31 = vsel %vm110_vm4, %v1236_v33, -inf }
0x1aad   :  { %1239 = vmax.xlane.f32.xlu0 %v1238_v31 }
0x1b20   :  { %v1240_v62 = vpop.xlane.xlu0 %1239 }
0x1b21   :  { %v1241_v32 = vsub.f32 %v1236_v33, %v1240_v62  ;;  %vm1301_vm10 = vcmp.eq.f32.partialorder %v1236_v33, %v1240_v62  ;;  %v1275_v33 = vmul.f32 %v2369_v53, %v2369_v53 }
0x1b22   :  { %v1302_v21 = vsel %vm1301_vm10, %v1855_v42, 16 }
0x1b23   :  { %v1242_v40 = vmul.f32 1.442695, %v1241_v32  ;;  %v1303_v18 = vsel %vm110_vm4, %v1302_v21, 2147483647  ;;  %v1276_v32 = vsub.f32 1.0, %v1275_v33 }
0x1b24   :  { %v1305_v10 = vshra.s32 %v1303_v18, 16  ;;  %v1304_v39 = vand.u32 65535, %v1303_v18  ;;  %v1281_v18 = vmul.f32 0.999, %v2339_v52 }
0x1b25   :  { %1616 = vpow2.f32 %v1242_v40 }
0x1b26   :  { %v1307_v27 = vcvt.s32.f32 %v1305_v10  ;;  %v1306_v60 = vcvt.s32.f32 %v1304_v39 }
0x1b28   :  { %1308 = vmin.xlane.f32.xlu1 %v1307_v27 }
0x1b2b   :  { %v1617_v14 = vpop.eup %1616 }
0x1b2c   :  { %v1244_v24 = vsel %vm110_vm4, %v1617_v14, 0.0 }
0x1b2d   :  { %1245 = vadd.xlane.f32.xlu0 %v1244_v24 }
0x1b30   :  { %1319 = vmax.xlane.f32.xlu1 %v1214_v20 }
0x1b9b   :  { %v1309_v50 = vpop.xlane.xlu1 %1308 }
0x1b9c   :  { %vm1310_vm11 = vcmp.eq.f32.partialorder %v1307_v27, %v1309_v50  ;;  %v1315_v44 = vcvt.f32.s32 %v1309_v50 }
0x1b9d   :  { %v1311_v30 = vsel %vm1310_vm11, %v1306_v60, inf  ;;  %v1278_v60 = vmul.f32 0.9, %v2343_v37 }
0x1b9e   :  { %1312 = vmin.xlane.f32.xlu2 %v1311_v30  ;;  %v1316_v48 = vshll.u32 %v1315_v44, 16 }
0x1ba0   :  { %v1246_v26 = vpop.xlane.xlu0 %1245 }
0x1ba1   :  { %1618 = vrcp.f32 %v1246_v26 }
0x1ba3   :  { %v1320_v38 = vpop.xlane.xlu1 %1319 }
0x1ba4   :  { %1620 = vrcp.f32 %v1320_v38 }
0x1ba6   :  { %1216 = vadd.xlane.f32.xlu2 %v1215_v45 }
0x1ba7   :  { %v1619_v58 = vpop.eup %1618 }
0x1ba8   :  { %v1248_v49 = vmul.f32 %v1619_v58, %v1617_v14 }
0x1baa   :  { %v1249_v41 = vsub.f32 %v1248_v49, %v1876_v6  ;;  %v1621_v35 = vpop.eup %1620  ;;  %v1286_v49 = vstv %s1468_s27 }
0x1bab   :  { %v1322_v51 = vmul.f32 %v1621_v35, %v1880_v15 }
0x1bac   :  { %1467 = vmatmul.msk.f32.vlgmr.msrb.gmra.mxu2 %vm110_vm4, %v1249_v41 }
0x1bad   :  { %1622 = vlog2.f32 %v1322_v51 }
0x1bb3   :  { %v1623_v46 = vpop.eup %1622 }
0x1bb4   :  { %v1324_v16 = vmul.f32 0.6931472, %v1623_v46 }
0x1bb6   :  { %v1325_v47 = vmul.f32 8.685889, %v1324_v16 }
0x1bb8   :  { %vm1328_vm13 = vcmp.gt.f32.partialorder %v1325_v47, 20.0 }
0x1c11   :  { %v1313_v43 = vpop.xlane.xlu2 %1312 }
0x1c12   :  { %v1314_v59 = vcvt.f32.s32 %v1313_v43 }
0x1c14   :  { %v1317_v22 = vadd.s32 %v1316_v48, %v1314_v59 }
0x1c16   :  { %vm1318_vm14 = vcmp.ne.s32.totalorder %v1317_v22, %v1839_v34 }
0x1c19   :  { %v2384_v12 = vpop.xlane.xlu2 %1216 }
0x1c1a   :  { %vm1326_vm15 = vcmp.gt.f32.partialorder %v2330_v57, %v2384_v12 }
0x1c1b   :  { %vm1327_vm0 = vmand %vm1318_vm14, %vm1326_vm15 }
0x1c1c   :  { %vm2389_vm1 = vmand %vm1327_vm0, %vm1328_vm13 }
0x1c1d   :  { %v1330_v56 = vsel %vm2389_vm1, %v2384_v12, %v2330_v57  ;;  %v1331_v55 = vsel %vm2389_vm1, 1.0, %v1676_v63 }
0x1c1e   :  { %v1332_v54 = vsel %vm203_vm12, %v1331_v55, -inf }
0x1c1f   :  { %1333 = vmax.xlane.f32.xlu0 %v1332_v54 }
0x1c2f   :  { %v1270_v31 = vpop.f32.mrf.mxu2 }
0x1c30   :  { %v1273_v62 = vmul.f32 20.0, %v1270_v31 }
0x1c32   :  { %v1274_v21 = vsub.f32 %v1214_v20, %v1273_v62 }
0x1c34   :  { %v1277_v40 = vmul.f32 %v1276_v32, %v1274_v21 }
0x1c36   :  { %v1282_v10 = vmul.f32 0.001, %v1277_v40  ;;  %v1279_v30 = vmul.f32 0.1, %v1277_v40 }
0x1c38   :  { %v1283_v27 = vmul.f32 %v1282_v10, %v1277_v40  ;;  %v1280_v58 = vadd.f32 %v1279_v30, %v1278_v60 }
0x1c3a   :  { %v1284_v14 = vadd.f32 %v1283_v27, %v1281_v18  ;;  %v1287_v52 = vmul.f32 %v1286_v49, %v1280_v58 }
0x1c3c   :  { %v1288_v24 = vadd.f32 1e-16, %v1284_v14 }
0x1c3e   :  { %1624 = vrsqrt.f32 %v1288_v24  ;;  %vm1295_vm3 = vweird.f32 %v1288_v24 }
0x1c44   :  { %v1625_v39 = vpop.eup %1624 }
0x1c45   :  { %v1290_v50 = vmul.f32 %v1625_v39, %v1288_v24  ;;  %vm1296_vm2 = vweird.f32 %v1625_v39 }
0x1c46   :  { %vm1297_vm5 = vmor %vm1295_vm3, %vm1296_vm2 }
0x1c47   :  { %v1291_v26 = vmul.f32 %v1625_v39, %v1290_v50 }
0x1c49   :  { %v1292_v45 = vmul.f32 0.5, %v1291_v26 }
0x1c4b   :  { %v1293_v41 = vsub.f32 1.5, %v1292_v45 }
0x1c4d   :  { %v1294_v20 = vmul.f32 %v1625_v39, %v1293_v41 }
0x1c4f   :  { %v1298_v38 = vsel %vm1297_vm5, %v1625_v39, %v1294_v20 }
0x1c50   :  { %v1299_v35 = vmul.f32 %v1298_v38, %v1287_v52 }
0x1c52   :  { %v1300_v51 = vsub.f32 %v2347_v61, %v1299_v35 }
0x1c92   :  { %v1334_v46 = vpop.xlane.xlu0 %1333 }
0x1c93   :  { %v1335_v44 = vrot.slane %v1334_v46, 4 }
0x1c95   :  { %v1336_v43 = vmax.f32 %v1334_v46, %v1335_v44 }
0x1c97   :  { %v1337_v16 = vrot.slane %v1336_v43, 2 }
0x1c99   :  { %v1338_v37 = vmax.f32 %v1336_v43, %v1337_v16 }
0x1c9b   :  { %v1339_v59 = vrot.slane %v1338_v37, 1 }
0x1c9d   :  { %v1340_v48 = vmax.f32 %v1338_v37, %v1339_v59 }
0x1c9f   :  { %1485 = vpush %v1340_v48 }
0x1cd0   :  { %s1486_s28 = spop %1485 }
0x1cd1   :  { %p1342_p8 = scmp.gt.f32.partialorder %s1486_s28, 0.0 }
0x1cd2   :  { %v1685_v47 = vmov (%p1342_p8), 0   ;;  %v1346_v55 = vld [vmem:[#allocation4] sm:$0xff] (%p1342_p8) }
0x1cd3   :  { %1345 = sbr.rel (!%p1342_p8) target bundleno = 7498 (0x1d4a), region = 57  ;;  %1626 = vset.pattern.permute.xlu0 (%p1342_p8), %v1685_v47  ;;  %v1347_v22 = vsel (%p1342_p8), %vm2389_vm1, 1, %v1685_v47 }
0x1cd4   :  { %1349 = vperm.xlu0 (%p1342_p8), %1626, %v1347_v22  }
0x1d46   :  { %v1350_v54 = vpop.permute.xlu0 %1349 }
0x1d47   :  { %vm1351_vm6 = vcmp.eq.s32.totalorder %v1350_v54, 1 }
0x1d48   :  { %v1352_v61 = vsel %vm1351_vm6, %v2369_v53, %v1346_v55 }
0x1d49   :  { %1353 = vst [vmem:[#allocation4] sm:$0xff] %v1352_v61 }
0x1d4a PF:  { %1359 = vmatpush.msrb.mxu3 %v1729_v0  ;;  %1627 = vtanh.f32 %v1300_v51 }
0x1d4c   :  { %1360 = vmatpush.msrb.mxu3 %v1734_v1 }
0x1d4e   :  { %1361 = vmatpush.msrb.mxu3 %v1740_v2 }
0x1d50   :  { %1362 = vmatpush.msrb.mxu3 %v1746_v3  ;;  %v2423_v0 = vpop.eup %1627 }
0x1d52   :  { %1363 = vmatpush.msrb.mxu3 %v1757_v5  ;;  %v1355_v5 = vsub.f32 %v2423_v0, %v1752_v4 }
0x1d54   :  { %1364 = vmatpush.msrb.mxu3 %v1765_v7  ;;  %1400 = vmax.xlane.f32.xlu1 %v1355_v5 }
0x1d56   :  { %1365 = vmatpush.msrb.mxu3 %v1771_v8 }
0x1d58   :  { %1366 = vmatpush.msrb.mxu3 %v1777_v9 }
0x1d5a   :  { %1367 = vmatpush.msrb.mxu3 %v1783_v11 }
0x1d5c   :  { %1368 = vmatpush.msrb.mxu3 %v1789_v13 }
0x1d5e   :  { %1369 = vmatpush.msrb.mxu3 %v1795_v17  ;;  %v1356_v17 = vmul.f32 %v1355_v5, %v1355_v5 }
0x1d60   :  { %1370 = vmatpush.msrb.mxu3 %v1801_v19  ;;  %1357 = vadd.xlane.f32.xlu2 %v1356_v17 }
0x1d62   :  { %1371 = vmatpush.msrb.mxu3 %v1808_v23 }
0x1d64   :  { %1372 = vmatpush.msrb.mxu3 %v1814_v25 }
0x1d66   :  { %1373 = vmatpush.msrb.mxu3 %v1820_v28 }
0x1d68   :  { %1374 = vmatpush.msrb.mxu3 %v1826_v29 }
0x1d69   :  { %1375 = vmatmul.f32.vlgmr.msrb.gmra.mxu3 %v2423_v0 }
0x1dc7   :  { %v1401_v29 = vpop.xlane.xlu1 %1400 }
0x1dc8   :  { %1629 = vrcp.f32 %v1401_v29 }
0x1dce   :  { %v1630_v4 = vpop.eup %1629 }
0x1dd3   :  { %v1358_v62 = vpop.xlane.xlu2 %1357 }
0x1dec   :  { %v1376_v1 = vpop.f32.mrf.mxu3 }
0x1ded   :  { %v1377_v2 = vadd.f32 %v1845_v36, %v1376_v1  ;;  %v1403_v36 = vmul.f32 %v1630_v4, %v1880_v15 }
0x1def   :  { %v1379_v3 = vsel %vm110_vm4, %v1377_v2, -inf  ;;  %1631 = vlog2.f32 %v1403_v36 }
0x1df0   :  { %1380 = vmax.xlane.f32.xlu0 %v1379_v3 }
0x1e63   :  { %v1381_v7 = vpop.xlane.xlu0 %1380 }
0x1e64   :  { %vm1382_vm7 = vcmp.eq.f32.partialorder %v1377_v2, %v1381_v7 }
0x1e65   :  { %v1383_v8 = vsel %vm1382_vm7, %v1855_v42, 16  ;;  %v1632_v42 = vpop.eup %1631 }
0x1e66   :  { %v1384_v9 = vsel %vm110_vm4, %v1383_v8, 2147483647  ;;  %v1405_v53 = vmul.f32 0.6931472, %v1632_v42  ;;  %vm1407_vm4 = vcmp.gt.f32.partialorder %v1330_v56, %v1358_v62 }
0x1e67   :  { %v1386_v11 = vshra.s32 %v1384_v9, 16  ;;  %v1385_v19 = vand.u32 65535, %v1384_v9 }
0x1e68   :  { %v1406_v32 = vmul.f32 8.685889, %v1405_v53 }
0x1e69   :  { %v1388_v13 = vcvt.s32.f32 %v1386_v11  ;;  %v1387_v25 = vcvt.s32.f32 %v1385_v19 }
0x1e6a   :  { %vm1409_vm9 = vcmp.gt.f32.partialorder %v1406_v32, 20.0 }
0x1e6b   :  { %1389 = vmin.xlane.f32.xlu0 %v1388_v13 }
0x1ede   :  { %v1390_v23 = vpop.xlane.xlu0 %1389 }
0x1edf   :  { %vm1391_vm8 = vcmp.eq.f32.partialorder %v1388_v13, %v1390_v23  ;;  %v1396_v33 = vcvt.f32.s32 %v1390_v23 }
0x1ee0   :  { %v1392_v28 = vsel %vm1391_vm8, %v1387_v25, inf }
0x1ee1   :  { %1393 = vmin.xlane.f32.xlu1 %v1392_v28  ;;  %v1397_v21 = vshll.u32 %v1396_v33, 16 }
0x1f54   :  { %v1394_v31 = vpop.xlane.xlu1 %1393 }
0x1f55   :  { %v1395_v40 = vcvt.f32.s32 %v1394_v31 }
0x1f57   :  { %v1398_v18 = vadd.s32 %v1397_v21, %v1395_v40 }
0x1f59   :  { %vm1399_vm10 = vcmp.ne.s32.totalorder %v1398_v18, %v1839_v34 }
0x1f5a   :  { %vm1408_vm11 = vmand %vm1399_vm10, %vm1407_vm4 }
0x1f5b   :  { %vm2441_vm13 = vmand %vm1408_vm11, %vm1409_vm9 }
0x1f5c   :  { %v1411_v10 = vsel %vm2441_vm13, 1.0, %v1676_v63 }
0x1f5d   :  { %v1412_v27 = vsel %vm203_vm12, %v1411_v10, -inf }
0x1f5e   :  { %1413 = vmax.xlane.f32.xlu2 %v1412_v27 }
0x1fd1   :  { %v1414_v6 = vpop.xlane.xlu2 %1413 }
0x1fd2   :  { %v1415_v14 = vrot.slane %v1414_v6, 4 }
0x1fd4   :  { %v1416_v24 = vmax.f32 %v1414_v6, %v1415_v14 }
0x1fd6   :  { %v1417_v57 = vrot.slane %v1416_v24, 2 }
0x1fd8   :  { %v1418_v12 = vmax.f32 %v1416_v24, %v1417_v57 }
0x1fda   :  { %v1419_v56 = vrot.slane %v1418_v12, 1 }
0x1fdc   :  { %v1420_v39 = vmax.f32 %v1418_v12, %v1419_v56 }
0x1fde   :  { %1487 = vpush %v1420_v39 }
0x200f   :  { %s1488_s0 = spop %1487 }
0x2010   :  { %p1422_p9 = scmp.gt.f32.partialorder %s1488_s0, 0.0 }
0x2011   :  { %v1686_v34 = vmov (%p1422_p9), 0   ;;  %v1426_v63 = vld [vmem:[#allocation4] sm:$0xff] (%p1422_p9) }
0x2012   :  { %1425 = sbr.rel (!%p1422_p9) target bundleno = 8329 (0x2089), region = 61  ;;  %1633 = vset.pattern.permute.xlu0 (%p1422_p9), %v1686_v34  ;;  %v1427_v50 = vsel (%p1422_p9), %vm2441_vm13, 1, %v1686_v34 }
0x2013   :  { %1429 = vperm.xlu0 (%p1422_p9), %1633, %v1427_v50  }
0x2085   :  { %v1430_v60 = vpop.permute.xlu0 %1429 }
0x2086   :  { %vm1431_vm12 = vcmp.eq.s32.totalorder %v1430_v60, 1 }
0x2087   :  { %v1432_v30 = vsel %vm1431_vm12, %v2423_v0, %v1426_v63 }
0x2088   :  { %1433 = vst [vmem:[#allocation4] sm:$0xff] %v1432_v30 }
0x2089 PF:  { %s1441_s7 = sshll.u32 %s2461_s6, 4  ;;  %s1687_s8 = smov [#allocation4]   ;;  %s1442_s7 = int_to_ptr.hbm [resolvable:$true] %s1441_s7 }
0x208a   :  { %s1439_s9 = sshll.u32 %s1687_s8, 4  ;;  %s1440_s9 = int_to_ptr.vmem [resolvable:$true] %s1439_s9 }
0x208b   :  { %1444 = dma.vmem_to_hbm [thread:$0]  %s1440_s9, 128, %s1442_s7, [#allocation5]  }
0x208c   :  { %1672 = dma.done.wait [#allocation5], 128  }
0x208d   :  { %1673 = vsyncadd [#allocation5], 4294967168 }
0x208e   :  { %1449 = vsyncpa [#allocation5], 1 }

</bundles_post_ra>
